<compile_context>
chip_gen: v6e
topology: v6e:2x2x1
jax: 0.10.0
libtpu: 0.0.40
codegen_flags: <defaults>
</compile_context>

<pallas_src>
import jax
import jax.numpy as jnp
from jax.experimental import pallas as pl
from jax.experimental.pallas import tpu as pltpu

K = 3          # Conv3d kernel size (3x3x3), padding 1 -> "same" output size
LANE = 128     # TPU lane width; packed lane dims are padded to multiples of it


def _round_up(n, m):
    return -(-n // m) * m


def _shift_mat(L, pad_out):
    """Selection matrices S[kw, i, o]: padded-input index i feeds output o via tap kw."""
    l_out = L + 2 if pad_out else L
    off = 1 if pad_out else 0
    i = jnp.arange(L + 2)[None, :, None]
    o = jnp.arange(l_out)[None, None, :]
    k = jnp.arange(K)[:, None, None]
    sel = i == (o - off + k)
    if pad_out:
        sel = sel & (o >= 1) & (o <= L)   # keep W-halo columns exactly zero
    return sel.astype(jnp.float32)


def _fuse_kw(w, W, pad_out, k_pad, n_pad):
    """torch (Co,Ci,3,3,3) -> (9, k_pad, n_pad) kw/W-fused block-Toeplitz weights."""
    Co, Ci = w.shape[0], w.shape[1]
    wt = jnp.transpose(w, (2, 3, 4, 1, 0)).astype(jnp.float32)   # (kd,kh,kw,Ci,Co)
    Sw = _shift_mat(W, pad_out)                                  # (kw, W+2, Wout)
    t = jnp.einsum("kxq,dhkio->dhxiqo", Sw, wt)                  # (kd,kh,W+2,Ci,Wout,Co)
    w_out = W + 2 if pad_out else W
    t = t.reshape(K * K, (W + 2) * Ci, w_out * Co)
    # Lane padding of the matmul K / N dims to multiples of 128 (zero rows/cols).
    return jnp.pad(t, ((0, 0), (0, k_pad - t.shape[1]), (0, n_pad - t.shape[2])))


def convblock_kernel(x_ref, w1_ref, b1_ref, w2_ref, b2_ref, o_ref, mid_ref):
    # x_ref  : (NB, D+2, H+2, Lin)   bf16, zero-padded, (w, c) lane-packed, lane-padded
    # w1_ref : (9, Lin, Lmid)        bf16 per-(kd,kh) kw/W-fused Toeplitz weights
    # b1_ref : (1, Lmid)             f32, zero on W-halo / lane-pad columns
    # w2_ref : (9, Lmid, Lout)       bf16
    # b2_ref : (1, Lout)             f32, zero on lane-pad columns
    # o_ref  : (NB, D*H, Lout)       f32 lane-dense output slab
    # mid_ref: (NB, D+2, H+2, Lmid)  bf16 scratch: padded ReLU(conv1)
    NB, Dp2, Hp2, _ = x_ref.shape
    D, H = Dp2 - 2, Hp2 - 2
    Lmid = mid_ref.shape[-1]
    Lout = o_ref.shape[-1]

    # Keep the D/H halo of mid at zero (the W-halo and lane-pad columns are
    # exact zeros via masked Toeplitz weights + masked bias + ReLU).  Four wide
    # stores; re-done every grid step so the kernel stays correct when the
    # batch grid axis is sharded across TensorCores.
    zplane = jnp.zeros((NB, 1, Hp2, Lmid), mid_ref.dtype)
    mid_ref[:, 0:1, :, :] = zplane
    mid_ref[:, Dp2 - 1:Dp2, :, :] = zplane
    zcol = jnp.zeros((NB, Dp2, 1, Lmid), mid_ref.dtype)
    mid_ref[:, :, 0:1, :] = zcol
    mid_ref[:, :, Hp2 - 1:Hp2, :] = zcol

    # ---- conv1 + ReLU: 9 MXU matmuls over (kd, kh); kw and W live in K / N ----
    acc1 = jnp.zeros((NB * D * H, Lmid), jnp.float32)
    for kd in range(K):
        for kh in range(K):
            slab = x_ref[:, kd:kd + D, kh:kh + H, :].reshape(NB * D * H, -1)
            acc1 = acc1 + jnp.dot(slab, w1_ref[kd * K + kh],
                                  preferred_element_type=jnp.float32)
    mid = jnp.maximum(acc1 + b1_ref[...], 0.0).astype(mid_ref.dtype)   # single bf16 cast
    mid_ref[:, 1:1 + D, 1:1 + H, :] = mid.reshape(NB, D, H, Lmid)

    # ---- conv2 + ReLU (mid is already bf16 -> no per-tap casts) ----
    acc2 = jnp.zeros((NB * D * H, Lout), jnp.float32)
    for kd in range(K):
        for kh in range(K):
            slab = mid_ref[:, kd:kd + D, kh:kh + H, :].reshape(NB * D * H, -1)
            acc2 = acc2 + jnp.dot(slab, w2_ref[kd * K + kh],
                                  preferred_element_type=jnp.float32)
    out = jnp.maximum(acc2 + b2_ref[...], 0.0)
    o_ref[...] = out.reshape(NB, D * H, Lout).astype(o_ref.dtype)


def _const_block_spec(shape):
    """BlockSpec for grid-invariant operands; single-buffered when supported."""
    index_map = lambda b: (0,) * len(shape)
    try:
        return pl.BlockSpec(shape, index_map,
                            pipeline_mode=pl.Buffered(buffer_count=1))
    except Exception:   # pipeline_mode unavailable -> default double buffering
        return pl.BlockSpec(shape, index_map)


def _default_vmem_limit():
    try:
        cap = pltpu.get_tpu_info().vmem_capacity_bytes
    except Exception:
        cap = 64 * 1024 * 1024          # conservative (v7x-sized) fallback
    # ~100 MiB on 128-MiB parts (v5e/v6e), ~48 MiB on 64-MiB parts (v7x).
    return int(max(32 * 1024 * 1024,
                   min(cap - 16 * 1024 * 1024, 100 * 1024 * 1024)))


def _pick_batch_block(n, rows_per_elem, target_rows=256):
    """Largest divisor of n whose row count reaches ~target_rows (MXU M dim)."""
    nb = max(1, min(n, -(-target_rows // rows_per_elem)))
    while n % nb:
        nb -= 1
    return nb


@jax.jit
def conv_block(x_ncdhw, w1, b1, w2, b2):
    """ConvBlock forward.

    x_ncdhw: (N, Cin, D, H, W) float32 (PyTorch NCDHW)
    w1: (Cmid, Cin, 3, 3, 3), b1: (Cmid,)   -- torch Conv3d param shapes
    w2: (Cout, Cmid, 3, 3, 3), b2: (Cout,)
    returns (N, Cout, D, H, W)
    """
    N, Cin, D, H, W = x_ncdhw.shape
    Cmid = w1.shape[0]
    Cout = w2.shape[0]

    Lin = _round_up((W + 2) * Cin, LANE)
    Lmid = _round_up((W + 2) * Cmid, LANE)
    Lout = _round_up(W * Cout, LANE)

    # NCDHW -> NDHWC, zero-pad spatial dims, pack (W, C) onto the lane axis,
    # lane-pad to a multiple of 128, cast bf16 (MXU-native, halves the DMA).
    x = jnp.transpose(x_ncdhw, (0, 2, 3, 4, 1))
    x = jnp.pad(x, ((0, 0), (1, 1), (1, 1), (1, 1), (0, 0)))
    x = x.reshape(N, D + 2, H + 2, (W + 2) * Cin)
    x = jnp.pad(x, ((0, 0), (0, 0), (0, 0), (0, Lin - (W + 2) * Cin)))
    x = x.astype(jnp.bfloat16)

    # Host-side weight prep: lane-padded kw/W-fused block-Toeplitz weights and
    # bias rows matching the (w, c) lane layout (zero on W-halo / pad columns).
    w1_f = _fuse_kw(w1, W, True, Lin, Lmid).astype(jnp.bfloat16)
    w2_f = _fuse_kw(w2, W, False, Lmid, Lout).astype(jnp.bfloat16)
    wmask = ((jnp.arange(W + 2) >= 1) & (jnp.arange(W + 2) <= W)).astype(jnp.float32)
    b1_row = (wmask[:, None] * b1.astype(jnp.float32)[None, :]).reshape(-1)
    b1_row = jnp.pad(b1_row, (0, Lmid - b1_row.shape[0]))[None, :]
    b2_row = jnp.tile(b2.astype(jnp.float32), W)
    b2_row = jnp.pad(b2_row, (0, Lout - b2_row.shape[0]))[None, :]

    # Batch-block so each matmul has M = NB*D*H >= ~256 rows (>=128 at N=2).
    NB = _pick_batch_block(N, D * H)
    grid = (N // NB,)

    out_flat = pl.pallas_call(
        convblock_kernel,
        out_shape=jax.ShapeDtypeStruct((N, D * H, Lout), jnp.float32),
        grid_spec=pltpu.PrefetchScalarGridSpec(
            num_scalar_prefetch=0,
            grid=grid,
            in_specs=[
                pl.BlockSpec((NB, D + 2, H + 2, Lin), lambda b: (b, 0, 0, 0)),
                _const_block_spec((K * K, Lin, Lmid)),
                _const_block_spec((1, Lmid)),
                _const_block_spec((K * K, Lmid, Lout)),
                _const_block_spec((1, Lout)),
            ],
            out_specs=pl.BlockSpec((NB, D * H, Lout), lambda b: (b, 0, 0)),
            scratch_shapes=[
                pltpu.VMEM((NB, D + 2, H + 2, Lmid), jnp.bfloat16),
            ],
        ),
        compiler_params=pltpu.CompilerParams(
            dimension_semantics=("parallel",),
            vmem_limit_bytes=_default_vmem_limit()),
    )(x, w1_f, b1_row, w2_f, b2_row)

    # (N, D*H, Lout) -> drop lane padding -> NDHWC -> NCDHW
    out = out_flat[:, :, :W * Cout].reshape(N, D, H, W, Cout)
    return jnp.transpose(out, (0, 4, 1, 2, 3)).astype(x_ncdhw.dtype)


def conv_block_ref(x, w1, b1, w2, b2):
    """Pure-JAX f32 reference (matches torch nn.Conv3d semantics, NCDHW)."""
    dn = ("NCDHW", "OIDHW", "NCDHW")
    y = jax.lax.conv_general_dilated(x, w1, (1, 1, 1), "SAME",
                                     dimension_numbers=dn)
    y = jnp.maximum(y + b1[None, :, None, None, None], 0.0)
    y = jax.lax.conv_general_dilated(y, w2, (1, 1, 1), "SAME",
                                     dimension_numbers=dn)
    return jnp.maximum(y + b2[None, :, None, None, None], 0.0)


if __name__ == "__main__":
    key = jax.random.PRNGKey(0)
    kx, k1, k2, k3, k4 = jax.random.split(key, 5)

    N, Cin, Cout = 2, 4, 8
    D = H = W = 8
    x = jax.random.normal(kx, (N, Cin, D, H, W), jnp.float32)

    # Deterministic init mimicking nn.Conv3d's uniform(-1/sqrt(fan_in), ...).
    fan1 = float(Cin * K * K * K)
    fan2 = float(Cout * K * K * K)
    bnd1 = 1.0 / (fan1 ** 0.5)
    bnd2 = 1.0 / (fan2 ** 0.5)
    w1 = jax.random.uniform(k1, (Cout, Cin, K, K, K), jnp.float32, -bnd1, bnd1)
    b1 = jax.random.uniform(k2, (Cout,), jnp.float32, -bnd1, bnd1)
    w2 = jax.random.uniform(k3, (Cout, Cout, K, K, K), jnp.float32, -bnd2, bnd2)
    b2 = jax.random.uniform(k4, (Cout,), jnp.float32, -bnd2, bnd2)

    out = conv_block(x, w1, b1, w2, b2)
    jax.block_until_ready(out)

    ref = conv_block_ref(x, w1, b1, w2, b2)
    assert out.shape == (N, Cout, D, H, W)
    # bf16 MXU operands -> tolerance loosened vs an all-f32 implementation.
    assert jnp.allclose(out, ref, atol=3e-2, rtol=3e-2), (
        "Pallas ConvBlock mismatch vs lax reference")

    print("KERNEL_OK")
</pallas_src>

<mosaic_0001>
module attributes {stable_mosaic.version = 11 : i64} {
  func.func @convblock_kernel(%arg0: i32, %arg1: memref<2x10x10x128xbf16, #tpu.memory_space<vmem>>, %arg2: memref<9x128x128xbf16, #tpu.memory_space<vmem>>, %arg3: memref<1x128xf32, #tpu.memory_space<vmem>>, %arg4: memref<9x128x128xbf16, #tpu.memory_space<vmem>>, %arg5: memref<1x128xf32, #tpu.memory_space<vmem>>, %arg6: memref<2x64x128xf32, #tpu.memory_space<vmem>>, %arg7: memref<2x10x10x128xbf16, #tpu.memory_space<vmem>>) attributes {dimension_semantics = [#tpu.dimension_semantics<parallel>], iteration_bounds = array<i64: 1>, scalar_prefetch = 0 : i64, scratch_operands = 1 : i64, tpu.core_type = #tpu.core_type<tc>, window_params = [{transform_indices = @transform_0, window_bounds = array<i64: 2, 10, 10, 128>}, {pipeline_mode = #tpu.pipeline_mode<synchronous>, transform_indices = @transform_1, window_bounds = array<i64: 9, 128, 128>}, {pipeline_mode = #tpu.pipeline_mode<synchronous>, transform_indices = @transform_2, window_bounds = array<i64: 1, 128>}, {pipeline_mode = #tpu.pipeline_mode<synchronous>, transform_indices = @transform_3, window_bounds = array<i64: 9, 128, 128>}, {pipeline_mode = #tpu.pipeline_mode<synchronous>, transform_indices = @transform_4, window_bounds = array<i64: 1, 128>}, {transform_indices = @transform_5, window_bounds = array<i64: 2, 64, 128>}]} {
    %cst = arith.constant 0.000000e+00 : bf16
    %0 = vector.broadcast %cst : bf16 to vector<2x1x10x128xbf16>
    %c0 = arith.constant 0 : index
    %c0_0 = arith.constant 0 : index
    %c0_1 = arith.constant 0 : index
    %c0_2 = arith.constant 0 : index
    %1 = vector.load %arg7[%c0, %c0_0, %c0_1, %c0_2] : memref<2x10x10x128xbf16, #tpu.memory_space<vmem>>, vector<2x1x10x128xbf16>
    tpu.vector_store %arg7[%c0, %c0_0, %c0_1, %c0_2], %0 {strides = array<i32>} : memref<2x10x10x128xbf16, #tpu.memory_space<vmem>>, vector<2x1x10x128xbf16>,
    %c0_3 = arith.constant 0 : index
    %c9 = arith.constant 9 : index
    %c0_4 = arith.constant 0 : index
    %c0_5 = arith.constant 0 : index
    %2 = vector.load %arg7[%c0_3, %c9, %c0_4, %c0_5] : memref<2x10x10x128xbf16, #tpu.memory_space<vmem>>, vector<2x1x10x128xbf16>
    tpu.vector_store %arg7[%c0_3, %c9, %c0_4, %c0_5], %0 {strides = array<i32>} : memref<2x10x10x128xbf16, #tpu.memory_space<vmem>>, vector<2x1x10x128xbf16>,
    %cst_6 = arith.constant 0.000000e+00 : bf16
    %3 = vector.broadcast %cst_6 : bf16 to vector<2x10x1x128xbf16>
    %c0_7 = arith.constant 0 : index
    %c0_8 = arith.constant 0 : index
    %c0_9 = arith.constant 0 : index
    %c0_10 = arith.constant 0 : index
    %4 = vector.load %arg7[%c0_7, %c0_8, %c0_9, %c0_10] : memref<2x10x10x128xbf16, #tpu.memory_space<vmem>>, vector<2x10x1x128xbf16>
    tpu.vector_store %arg7[%c0_7, %c0_8, %c0_9, %c0_10], %3 {strides = array<i32>} : memref<2x10x10x128xbf16, #tpu.memory_space<vmem>>, vector<2x10x1x128xbf16>,
    %c0_11 = arith.constant 0 : index
    %c0_12 = arith.constant 0 : index
    %c9_13 = arith.constant 9 : index
    %c0_14 = arith.constant 0 : index
    %5 = vector.load %arg7[%c0_11, %c0_12, %c9_13, %c0_14] : memref<2x10x10x128xbf16, #tpu.memory_space<vmem>>, vector<2x10x1x128xbf16>
    tpu.vector_store %arg7[%c0_11, %c0_12, %c9_13, %c0_14], %3 {strides = array<i32>} : memref<2x10x10x128xbf16, #tpu.memory_space<vmem>>, vector<2x10x1x128xbf16>,
    %cst_15 = arith.constant 0.000000e+00 : f32
    %6 = vector.broadcast %cst_15 : f32 to vector<128x128xf32>
    %c0_16 = arith.constant 0 : index
    %c0_17 = arith.constant 0 : index
    %c0_18 = arith.constant 0 : index
    %c0_19 = arith.constant 0 : index
    %7 = vector.load %arg1[%c0_16, %c0_17, %c0_18, %c0_19] : memref<2x10x10x128xbf16, #tpu.memory_space<vmem>>, vector<2x8x8x128xbf16>
    %8 = vector.shape_cast %7 : vector<2x8x8x128xbf16> to vector<128x128xbf16>
    %c0_20 = arith.constant 0 : index
    %c0_21 = arith.constant 0 : index
    %c0_22 = arith.constant 0 : index
    %9 = vector.load %arg2[%c0_20, %c0_21, %c0_22] : memref<9x128x128xbf16, #tpu.memory_space<vmem>>, vector<1x128x128xbf16>
    %10 = vector.shape_cast %9 : vector<1x128x128xbf16> to vector<128x128xbf16>
    %cst_23 = arith.constant dense<0.000000e+00> : vector<128x128xf32>
    %11 = tpu.matmul %8, %10, %cst_23 {dimension_numbers = #tpu.dot_dimension_numbers<[1], [0], [0], [1], [0, 0, 1, 1], [], []>} : vector<128x128xbf16>, vector<128x128xbf16>, vector<128x128xf32> -> vector<128x128xf32>
    %12 = arith.addf %6, %11 : vector<128x128xf32>
    %c0_24 = arith.constant 0 : index
    %c0_25 = arith.constant 0 : index
    %c1 = arith.constant 1 : index
    %c0_26 = arith.constant 0 : index
    %13 = vector.load %arg1[%c0_24, %c0_25, %c1, %c0_26] : memref<2x10x10x128xbf16, #tpu.memory_space<vmem>>, vector<2x8x8x128xbf16>
    %14 = vector.shape_cast %13 : vector<2x8x8x128xbf16> to vector<128x128xbf16>
    %c1_27 = arith.constant 1 : index
    %c0_28 = arith.constant 0 : index
    %c0_29 = arith.constant 0 : index
    %15 = vector.load %arg2[%c1_27, %c0_28, %c0_29] : memref<9x128x128xbf16, #tpu.memory_space<vmem>>, vector<1x128x128xbf16>
    %16 = vector.shape_cast %15 : vector<1x128x128xbf16> to vector<128x128xbf16>
    %cst_30 = arith.constant dense<0.000000e+00> : vector<128x128xf32>
    %17 = tpu.matmul %14, %16, %cst_30 {dimension_numbers = #tpu.dot_dimension_numbers<[1], [0], [0], [1], [0, 0, 1, 1], [], []>} : vector<128x128xbf16>, vector<128x128xbf16>, vector<128x128xf32> -> vector<128x128xf32>
    %18 = arith.addf %12, %17 : vector<128x128xf32>
    %c0_31 = arith.constant 0 : index
    %c0_32 = arith.constant 0 : index
    %c2 = arith.constant 2 : index
    %c0_33 = arith.constant 0 : index
    %19 = vector.load %arg1[%c0_31, %c0_32, %c2, %c0_33] : memref<2x10x10x128xbf16, #tpu.memory_space<vmem>>, vector<2x8x8x128xbf16>
    %20 = vector.shape_cast %19 : vector<2x8x8x128xbf16> to vector<128x128xbf16>
    %c2_34 = arith.constant 2 : index
    %c0_35 = arith.constant 0 : index
    %c0_36 = arith.constant 0 : index
    %21 = vector.load %arg2[%c2_34, %c0_35, %c0_36] : memref<9x128x128xbf16, #tpu.memory_space<vmem>>, vector<1x128x128xbf16>
    %22 = vector.shape_cast %21 : vector<1x128x128xbf16> to vector<128x128xbf16>
    %cst_37 = arith.constant dense<0.000000e+00> : vector<128x128xf32>
    %23 = tpu.matmul %20, %22, %cst_37 {dimension_numbers = #tpu.dot_dimension_numbers<[1], [0], [0], [1], [0, 0, 1, 1], [], []>} : vector<128x128xbf16>, vector<128x128xbf16>, vector<128x128xf32> -> vector<128x128xf32>
    %24 = arith.addf %18, %23 : vector<128x128xf32>
    %c0_38 = arith.constant 0 : index
    %c1_39 = arith.constant 1 : index
    %c0_40 = arith.constant 0 : index
    %c0_41 = arith.constant 0 : index
    %25 = vector.load %arg1[%c0_38, %c1_39, %c0_40, %c0_41] : memref<2x10x10x128xbf16, #tpu.memory_space<vmem>>, vector<2x8x8x128xbf16>
    %26 = vector.shape_cast %25 : vector<2x8x8x128xbf16> to vector<128x128xbf16>
    %c3 = arith.constant 3 : index
    %c0_42 = arith.constant 0 : index
    %c0_43 = arith.constant 0 : index
    %27 = vector.load %arg2[%c3, %c0_42, %c0_43] : memref<9x128x128xbf16, #tpu.memory_space<vmem>>, vector<1x128x128xbf16>
    %28 = vector.shape_cast %27 : vector<1x128x128xbf16> to vector<128x128xbf16>
    %cst_44 = arith.constant dense<0.000000e+00> : vector<128x128xf32>
    %29 = tpu.matmul %26, %28, %cst_44 {dimension_numbers = #tpu.dot_dimension_numbers<[1], [0], [0], [1], [0, 0, 1, 1], [], []>} : vector<128x128xbf16>, vector<128x128xbf16>, vector<128x128xf32> -> vector<128x128xf32>
    %30 = arith.addf %24, %29 : vector<128x128xf32>
    %c0_45 = arith.constant 0 : index
    %c1_46 = arith.constant 1 : index
    %c1_47 = arith.constant 1 : index
    %c0_48 = arith.constant 0 : index
    %31 = vector.load %arg1[%c0_45, %c1_46, %c1_47, %c0_48] : memref<2x10x10x128xbf16, #tpu.memory_space<vmem>>, vector<2x8x8x128xbf16>
    %32 = vector.shape_cast %31 : vector<2x8x8x128xbf16> to vector<128x128xbf16>
    %c4 = arith.constant 4 : index
    %c0_49 = arith.constant 0 : index
    %c0_50 = arith.constant 0 : index
    %33 = vector.load %arg2[%c4, %c0_49, %c0_50] : memref<9x128x128xbf16, #tpu.memory_space<vmem>>, vector<1x128x128xbf16>
    %34 = vector.shape_cast %33 : vector<1x128x128xbf16> to vector<128x128xbf16>
    %cst_51 = arith.constant dense<0.000000e+00> : vector<128x128xf32>
    %35 = tpu.matmul %32, %34, %cst_51 {dimension_numbers = #tpu.dot_dimension_numbers<[1], [0], [0], [1], [0, 0, 1, 1], [], []>} : vector<128x128xbf16>, vector<128x128xbf16>, vector<128x128xf32> -> vector<128x128xf32>
    %36 = arith.addf %30, %35 : vector<128x128xf32>
    %c0_52 = arith.constant 0 : index
    %c1_53 = arith.constant 1 : index
    %c2_54 = arith.constant 2 : index
    %c0_55 = arith.constant 0 : index
    %37 = vector.load %arg1[%c0_52, %c1_53, %c2_54, %c0_55] : memref<2x10x10x128xbf16, #tpu.memory_space<vmem>>, vector<2x8x8x128xbf16>
    %38 = vector.shape_cast %37 : vector<2x8x8x128xbf16> to vector<128x128xbf16>
    %c5 = arith.constant 5 : index
    %c0_56 = arith.constant 0 : index
    %c0_57 = arith.constant 0 : index
    %39 = vector.load %arg2[%c5, %c0_56, %c0_57] : memref<9x128x128xbf16, #tpu.memory_space<vmem>>, vector<1x128x128xbf16>
    %40 = vector.shape_cast %39 : vector<1x128x128xbf16> to vector<128x128xbf16>
    %cst_58 = arith.constant dense<0.000000e+00> : vector<128x128xf32>
    %41 = tpu.matmul %38, %40, %cst_58 {dimension_numbers = #tpu.dot_dimension_numbers<[1], [0], [0], [1], [0, 0, 1, 1], [], []>} : vector<128x128xbf16>, vector<128x128xbf16>, vector<128x128xf32> -> vector<128x128xf32>
    %42 = arith.addf %36, %41 : vector<128x128xf32>
    %c0_59 = arith.constant 0 : index
    %c2_60 = arith.constant 2 : index
    %c0_61 = arith.constant 0 : index
    %c0_62 = arith.constant 0 : index
    %43 = vector.load %arg1[%c0_59, %c2_60, %c0_61, %c0_62] : memref<2x10x10x128xbf16, #tpu.memory_space<vmem>>, vector<2x8x8x128xbf16>
    %44 = vector.shape_cast %43 : vector<2x8x8x128xbf16> to vector<128x128xbf16>
    %c6 = arith.constant 6 : index
    %c0_63 = arith.constant 0 : index
    %c0_64 = arith.constant 0 : index
    %45 = vector.load %arg2[%c6, %c0_63, %c0_64] : memref<9x128x128xbf16, #tpu.memory_space<vmem>>, vector<1x128x128xbf16>
    %46 = vector.shape_cast %45 : vector<1x128x128xbf16> to vector<128x128xbf16>
    %cst_65 = arith.constant dense<0.000000e+00> : vector<128x128xf32>
    %47 = tpu.matmul %44, %46, %cst_65 {dimension_numbers = #tpu.dot_dimension_numbers<[1], [0], [0], [1], [0, 0, 1, 1], [], []>} : vector<128x128xbf16>, vector<128x128xbf16>, vector<128x128xf32> -> vector<128x128xf32>
    %48 = arith.addf %42, %47 : vector<128x128xf32>
    %c0_66 = arith.constant 0 : index
    %c2_67 = arith.constant 2 : index
    %c1_68 = arith.constant 1 : index
    %c0_69 = arith.constant 0 : index
    %49 = vector.load %arg1[%c0_66, %c2_67, %c1_68, %c0_69] : memref<2x10x10x128xbf16, #tpu.memory_space<vmem>>, vector<2x8x8x128xbf16>
    %50 = vector.shape_cast %49 : vector<2x8x8x128xbf16> to vector<128x128xbf16>
    %c7 = arith.constant 7 : index
    %c0_70 = arith.constant 0 : index
    %c0_71 = arith.constant 0 : index
    %51 = vector.load %arg2[%c7, %c0_70, %c0_71] : memref<9x128x128xbf16, #tpu.memory_space<vmem>>, vector<1x128x128xbf16>
    %52 = vector.shape_cast %51 : vector<1x128x128xbf16> to vector<128x128xbf16>
    %cst_72 = arith.constant dense<0.000000e+00> : vector<128x128xf32>
    %53 = tpu.matmul %50, %52, %cst_72 {dimension_numbers = #tpu.dot_dimension_numbers<[1], [0], [0], [1], [0, 0, 1, 1], [], []>} : vector<128x128xbf16>, vector<128x128xbf16>, vector<128x128xf32> -> vector<128x128xf32>
    %54 = arith.addf %48, %53 : vector<128x128xf32>
    %c0_73 = arith.constant 0 : index
    %c2_74 = arith.constant 2 : index
    %c2_75 = arith.constant 2 : index
    %c0_76 = arith.constant 0 : index
    %55 = vector.load %arg1[%c0_73, %c2_74, %c2_75, %c0_76] : memref<2x10x10x128xbf16, #tpu.memory_space<vmem>>, vector<2x8x8x128xbf16>
    %56 = vector.shape_cast %55 : vector<2x8x8x128xbf16> to vector<128x128xbf16>
    %c8 = arith.constant 8 : index
    %c0_77 = arith.constant 0 : index
    %c0_78 = arith.constant 0 : index
    %57 = vector.load %arg2[%c8, %c0_77, %c0_78] : memref<9x128x128xbf16, #tpu.memory_space<vmem>>, vector<1x128x128xbf16>
    %58 = vector.shape_cast %57 : vector<1x128x128xbf16> to vector<128x128xbf16>
    %cst_79 = arith.constant dense<0.000000e+00> : vector<128x128xf32>
    %59 = tpu.matmul %56, %58, %cst_79 {dimension_numbers = #tpu.dot_dimension_numbers<[1], [0], [0], [1], [0, 0, 1, 1], [], []>} : vector<128x128xbf16>, vector<128x128xbf16>, vector<128x128xf32> -> vector<128x128xf32>
    %60 = arith.addf %54, %59 : vector<128x128xf32>
    %c0_80 = arith.constant 0 : index
    %c0_81 = arith.constant 0 : index
    %61 = vector.load %arg3[%c0_80, %c0_81] : memref<1x128xf32, #tpu.memory_space<vmem>>, vector<1x128xf32>
    %62 = vector.broadcast %61 : vector<1x128xf32> to vector<128x128xf32>
    %63 = arith.addf %60, %62 : vector<128x128xf32>
    %cst_82 = arith.constant 0.000000e+00 : f32
    %64 = vector.broadcast %cst_82 : f32 to vector<128x128xf32>
    %65 = arith.maximumf %63, %64 : vector<128x128xf32>
    %66 = arith.truncf %65 : vector<128x128xf32> to vector<128x128xbf16>
    %67 = vector.shape_cast %66 : vector<128x128xbf16> to vector<2x8x8x128xbf16>
    %c0_83 = arith.constant 0 : index
    %c1_84 = arith.constant 1 : index
    %c1_85 = arith.constant 1 : index
    %c0_86 = arith.constant 0 : index
    %68 = vector.load %arg7[%c0_83, %c1_84, %c1_85, %c0_86] : memref<2x10x10x128xbf16, #tpu.memory_space<vmem>>, vector<2x8x8x128xbf16>
    tpu.vector_store %arg7[%c0_83, %c1_84, %c1_85, %c0_86], %67 {strides = array<i32>} : memref<2x10x10x128xbf16, #tpu.memory_space<vmem>>, vector<2x8x8x128xbf16>,
    %cst_87 = arith.constant 0.000000e+00 : f32
    %69 = vector.broadcast %cst_87 : f32 to vector<128x128xf32>
    %c0_88 = arith.constant 0 : index
    %c0_89 = arith.constant 0 : index
    %c0_90 = arith.constant 0 : index
    %c0_91 = arith.constant 0 : index
    %70 = vector.load %arg7[%c0_88, %c0_89, %c0_90, %c0_91] : memref<2x10x10x128xbf16, #tpu.memory_space<vmem>>, vector<2x8x8x128xbf16>
    %71 = vector.shape_cast %70 : vector<2x8x8x128xbf16> to vector<128x128xbf16>
    %c0_92 = arith.constant 0 : index
    %c0_93 = arith.constant 0 : index
    %c0_94 = arith.constant 0 : index
    %72 = vector.load %arg4[%c0_92, %c0_93, %c0_94] : memref<9x128x128xbf16, #tpu.memory_space<vmem>>, vector<1x128x128xbf16>
    %73 = vector.shape_cast %72 : vector<1x128x128xbf16> to vector<128x128xbf16>
    %cst_95 = arith.constant dense<0.000000e+00> : vector<128x128xf32>
    %74 = tpu.matmul %71, %73, %cst_95 {dimension_numbers = #tpu.dot_dimension_numbers<[1], [0], [0], [1], [0, 0, 1, 1], [], []>} : vector<128x128xbf16>, vector<128x128xbf16>, vector<128x128xf32> -> vector<128x128xf32>
    %75 = arith.addf %69, %74 : vector<128x128xf32>
    %c0_96 = arith.constant 0 : index
    %c0_97 = arith.constant 0 : index
    %c1_98 = arith.constant 1 : index
    %c0_99 = arith.constant 0 : index
    %76 = vector.load %arg7[%c0_96, %c0_97, %c1_98, %c0_99] : memref<2x10x10x128xbf16, #tpu.memory_space<vmem>>, vector<2x8x8x128xbf16>
    %77 = vector.shape_cast %76 : vector<2x8x8x128xbf16> to vector<128x128xbf16>
    %c1_100 = arith.constant 1 : index
    %c0_101 = arith.constant 0 : index
    %c0_102 = arith.constant 0 : index
    %78 = vector.load %arg4[%c1_100, %c0_101, %c0_102] : memref<9x128x128xbf16, #tpu.memory_space<vmem>>, vector<1x128x128xbf16>
    %79 = vector.shape_cast %78 : vector<1x128x128xbf16> to vector<128x128xbf16>
    %cst_103 = arith.constant dense<0.000000e+00> : vector<128x128xf32>
    %80 = tpu.matmul %77, %79, %cst_103 {dimension_numbers = #tpu.dot_dimension_numbers<[1], [0], [0], [1], [0, 0, 1, 1], [], []>} : vector<128x128xbf16>, vector<128x128xbf16>, vector<128x128xf32> -> vector<128x128xf32>
    %81 = arith.addf %75, %80 : vector<128x128xf32>
    %c0_104 = arith.constant 0 : index
    %c0_105 = arith.constant 0 : index
    %c2_106 = arith.constant 2 : index
    %c0_107 = arith.constant 0 : index
    %82 = vector.load %arg7[%c0_104, %c0_105, %c2_106, %c0_107] : memref<2x10x10x128xbf16, #tpu.memory_space<vmem>>, vector<2x8x8x128xbf16>
    %83 = vector.shape_cast %82 : vector<2x8x8x128xbf16> to vector<128x128xbf16>
    %c2_108 = arith.constant 2 : index
    %c0_109 = arith.constant 0 : index
    %c0_110 = arith.constant 0 : index
    %84 = vector.load %arg4[%c2_108, %c0_109, %c0_110] : memref<9x128x128xbf16, #tpu.memory_space<vmem>>, vector<1x128x128xbf16>
    %85 = vector.shape_cast %84 : vector<1x128x128xbf16> to vector<128x128xbf16>
    %cst_111 = arith.constant dense<0.000000e+00> : vector<128x128xf32>
    %86 = tpu.matmul %83, %85, %cst_111 {dimension_numbers = #tpu.dot_dimension_numbers<[1], [0], [0], [1], [0, 0, 1, 1], [], []>} : vector<128x128xbf16>, vector<128x128xbf16>, vector<128x128xf32> -> vector<128x128xf32>
    %87 = arith.addf %81, %86 : vector<128x128xf32>
    %c0_112 = arith.constant 0 : index
    %c1_113 = arith.constant 1 : index
    %c0_114 = arith.constant 0 : index
    %c0_115 = arith.constant 0 : index
    %88 = vector.load %arg7[%c0_112, %c1_113, %c0_114, %c0_115] : memref<2x10x10x128xbf16, #tpu.memory_space<vmem>>, vector<2x8x8x128xbf16>
    %89 = vector.shape_cast %88 : vector<2x8x8x128xbf16> to vector<128x128xbf16>
    %c3_116 = arith.constant 3 : index
    %c0_117 = arith.constant 0 : index
    %c0_118 = arith.constant 0 : index
    %90 = vector.load %arg4[%c3_116, %c0_117, %c0_118] : memref<9x128x128xbf16, #tpu.memory_space<vmem>>, vector<1x128x128xbf16>
    %91 = vector.shape_cast %90 : vector<1x128x128xbf16> to vector<128x128xbf16>
    %cst_119 = arith.constant dense<0.000000e+00> : vector<128x128xf32>
    %92 = tpu.matmul %89, %91, %cst_119 {dimension_numbers = #tpu.dot_dimension_numbers<[1], [0], [0], [1], [0, 0, 1, 1], [], []>} : vector<128x128xbf16>, vector<128x128xbf16>, vector<128x128xf32> -> vector<128x128xf32>
    %93 = arith.addf %87, %92 : vector<128x128xf32>
    %c0_120 = arith.constant 0 : index
    %c1_121 = arith.constant 1 : index
    %c1_122 = arith.constant 1 : index
    %c0_123 = arith.constant 0 : index
    %94 = vector.load %arg7[%c0_120, %c1_121, %c1_122, %c0_123] : memref<2x10x10x128xbf16, #tpu.memory_space<vmem>>, vector<2x8x8x128xbf16>
    %95 = vector.shape_cast %94 : vector<2x8x8x128xbf16> to vector<128x128xbf16>
    %c4_124 = arith.constant 4 : index
    %c0_125 = arith.constant 0 : index
    %c0_126 = arith.constant 0 : index
    %96 = vector.load %arg4[%c4_124, %c0_125, %c0_126] : memref<9x128x128xbf16, #tpu.memory_space<vmem>>, vector<1x128x128xbf16>
    %97 = vector.shape_cast %96 : vector<1x128x128xbf16> to vector<128x128xbf16>
    %cst_127 = arith.constant dense<0.000000e+00> : vector<128x128xf32>
    %98 = tpu.matmul %95, %97, %cst_127 {dimension_numbers = #tpu.dot_dimension_numbers<[1], [0], [0], [1], [0, 0, 1, 1], [], []>} : vector<128x128xbf16>, vector<128x128xbf16>, vector<128x128xf32> -> vector<128x128xf32>
    %99 = arith.addf %93, %98 : vector<128x128xf32>
    %c0_128 = arith.constant 0 : index
    %c1_129 = arith.constant 1 : index
    %c2_130 = arith.constant 2 : index
    %c0_131 = arith.constant 0 : index
    %100 = vector.load %arg7[%c0_128, %c1_129, %c2_130, %c0_131] : memref<2x10x10x128xbf16, #tpu.memory_space<vmem>>, vector<2x8x8x128xbf16>
    %101 = vector.shape_cast %100 : vector<2x8x8x128xbf16> to vector<128x128xbf16>
    %c5_132 = arith.constant 5 : index
    %c0_133 = arith.constant 0 : index
    %c0_134 = arith.constant 0 : index
    %102 = vector.load %arg4[%c5_132, %c0_133, %c0_134] : memref<9x128x128xbf16, #tpu.memory_space<vmem>>, vector<1x128x128xbf16>
    %103 = vector.shape_cast %102 : vector<1x128x128xbf16> to vector<128x128xbf16>
    %cst_135 = arith.constant dense<0.000000e+00> : vector<128x128xf32>
    %104 = tpu.matmul %101, %103, %cst_135 {dimension_numbers = #tpu.dot_dimension_numbers<[1], [0], [0], [1], [0, 0, 1, 1], [], []>} : vector<128x128xbf16>, vector<128x128xbf16>, vector<128x128xf32> -> vector<128x128xf32>
    %105 = arith.addf %99, %104 : vector<128x128xf32>
    %c0_136 = arith.constant 0 : index
    %c2_137 = arith.constant 2 : index
    %c0_138 = arith.constant 0 : index
    %c0_139 = arith.constant 0 : index
    %106 = vector.load %arg7[%c0_136, %c2_137, %c0_138, %c0_139] : memref<2x10x10x128xbf16, #tpu.memory_space<vmem>>, vector<2x8x8x128xbf16>
    %107 = vector.shape_cast %106 : vector<2x8x8x128xbf16> to vector<128x128xbf16>
    %c6_140 = arith.constant 6 : index
    %c0_141 = arith.constant 0 : index
    %c0_142 = arith.constant 0 : index
    %108 = vector.load %arg4[%c6_140, %c0_141, %c0_142] : memref<9x128x128xbf16, #tpu.memory_space<vmem>>, vector<1x128x128xbf16>
    %109 = vector.shape_cast %108 : vector<1x128x128xbf16> to vector<128x128xbf16>
    %cst_143 = arith.constant dense<0.000000e+00> : vector<128x128xf32>
    %110 = tpu.matmul %107, %109, %cst_143 {dimension_numbers = #tpu.dot_dimension_numbers<[1], [0], [0], [1], [0, 0, 1, 1], [], []>} : vector<128x128xbf16>, vector<128x128xbf16>, vector<128x128xf32> -> vector<128x128xf32>
    %111 = arith.addf %105, %110 : vector<128x128xf32>
    %c0_144 = arith.constant 0 : index
    %c2_145 = arith.constant 2 : index
    %c1_146 = arith.constant 1 : index
    %c0_147 = arith.constant 0 : index
    %112 = vector.load %arg7[%c0_144, %c2_145, %c1_146, %c0_147] : memref<2x10x10x128xbf16, #tpu.memory_space<vmem>>, vector<2x8x8x128xbf16>
    %113 = vector.shape_cast %112 : vector<2x8x8x128xbf16> to vector<128x128xbf16>
    %c7_148 = arith.constant 7 : index
    %c0_149 = arith.constant 0 : index
    %c0_150 = arith.constant 0 : index
    %114 = vector.load %arg4[%c7_148, %c0_149, %c0_150] : memref<9x128x128xbf16, #tpu.memory_space<vmem>>, vector<1x128x128xbf16>
    %115 = vector.shape_cast %114 : vector<1x128x128xbf16> to vector<128x128xbf16>
    %cst_151 = arith.constant dense<0.000000e+00> : vector<128x128xf32>
    %116 = tpu.matmul %113, %115, %cst_151 {dimension_numbers = #tpu.dot_dimension_numbers<[1], [0], [0], [1], [0, 0, 1, 1], [], []>} : vector<128x128xbf16>, vector<128x128xbf16>, vector<128x128xf32> -> vector<128x128xf32>
    %117 = arith.addf %111, %116 : vector<128x128xf32>
    %c0_152 = arith.constant 0 : index
    %c2_153 = arith.constant 2 : index
    %c2_154 = arith.constant 2 : index
    %c0_155 = arith.constant 0 : index
    %118 = vector.load %arg7[%c0_152, %c2_153, %c2_154, %c0_155] : memref<2x10x10x128xbf16, #tpu.memory_space<vmem>>, vector<2x8x8x128xbf16>
    %119 = vector.shape_cast %118 : vector<2x8x8x128xbf16> to vector<128x128xbf16>
    %c8_156 = arith.constant 8 : index
    %c0_157 = arith.constant 0 : index
    %c0_158 = arith.constant 0 : index
    %120 = vector.load %arg4[%c8_156, %c0_157, %c0_158] : memref<9x128x128xbf16, #tpu.memory_space<vmem>>, vector<1x128x128xbf16>
    %121 = vector.shape_cast %120 : vector<1x128x128xbf16> to vector<128x128xbf16>
    %cst_159 = arith.constant dense<0.000000e+00> : vector<128x128xf32>
    %122 = tpu.matmul %119, %121, %cst_159 {dimension_numbers = #tpu.dot_dimension_numbers<[1], [0], [0], [1], [0, 0, 1, 1], [], []>} : vector<128x128xbf16>, vector<128x128xbf16>, vector<128x128xf32> -> vector<128x128xf32>
    %123 = arith.addf %117, %122 : vector<128x128xf32>
    %c0_160 = arith.constant 0 : index
    %c0_161 = arith.constant 0 : index
    %124 = vector.load %arg5[%c0_160, %c0_161] : memref<1x128xf32, #tpu.memory_space<vmem>>, vector<1x128xf32>
    %125 = vector.broadcast %124 : vector<1x128xf32> to vector<128x128xf32>
    %126 = arith.addf %123, %125 : vector<128x128xf32>
    %cst_162 = arith.constant 0.000000e+00 : f32
    %127 = vector.broadcast %cst_162 : f32 to vector<128x128xf32>
    %128 = arith.maximumf %126, %127 : vector<128x128xf32>
    %129 = vector.shape_cast %128 : vector<128x128xf32> to vector<2x64x128xf32>
    %c0_163 = arith.constant 0 : index
    %c0_164 = arith.constant 0 : index
    %c0_165 = arith.constant 0 : index
    %130 = vector.load %arg6[%c0_163, %c0_164, %c0_165] : memref<2x64x128xf32, #tpu.memory_space<vmem>>, vector<2x64x128xf32>
    tpu.vector_store %arg6[%c0_163, %c0_164, %c0_165], %129 {strides = array<i32>} : memref<2x64x128xf32, #tpu.memory_space<vmem>>, vector<2x64x128xf32>,
    return
  }
  func.func @transform_0(%arg0: i32) -> (i32, i32, i32, i32) {
    %c0_i32 = arith.constant 0 : i32
    %c0_i32_0 = arith.constant 0 : i32
    %c0_i32_1 = arith.constant 0 : i32
    %c0_i32_2 = arith.constant 0 : i32
    return %arg0, %c0_i32, %c0_i32_0, %c0_i32_1 : i32, i32, i32, i32
  }
  func.func @transform_1(%arg0: i32) -> (i32, i32, i32) {
    %c0_i32 = arith.constant 0 : i32
    %c0_i32_0 = arith.constant 0 : i32
    %c0_i32_1 = arith.constant 0 : i32
    %c0_i32_2 = arith.constant 0 : i32
    return %c0_i32, %c0_i32_0, %c0_i32_1 : i32, i32, i32
  }
  func.func @transform_2(%arg0: i32) -> (i32, i32) {
    %c0_i32 = arith.constant 0 : i32
    %c0_i32_0 = arith.constant 0 : i32
    %c0_i32_1 = arith.constant 0 : i32
    return %c0_i32, %c0_i32_0 : i32, i32
  }
  func.func @transform_3(%arg0: i32) -> (i32, i32, i32) {
    %c0_i32 = arith.constant 0 : i32
    %c0_i32_0 = arith.constant 0 : i32
    %c0_i32_1 = arith.constant 0 : i32
    %c0_i32_2 = arith.constant 0 : i32
    return %c0_i32, %c0_i32_0, %c0_i32_1 : i32, i32, i32
  }
  func.func @transform_4(%arg0: i32) -> (i32, i32) {
    %c0_i32 = arith.constant 0 : i32
    %c0_i32_0 = arith.constant 0 : i32
    %c0_i32_1 = arith.constant 0 : i32
    return %c0_i32, %c0_i32_0 : i32, i32
  }
  func.func @transform_5(%arg0: i32) -> (i32, i32, i32) {
    %c0_i32 = arith.constant 0 : i32
    %c0_i32_0 = arith.constant 0 : i32
    %c0_i32_1 = arith.constant 0 : i32
    return %arg0, %c0_i32, %c0_i32_0 : i32, i32, i32
  }
}

</mosaic_0001>

<bundles_post_ra>
// kernel: tile.8
= control target key start
LH: loop header
LB: loop body
LE: loop exit
PB: predicated region body
PF: predicated region fallthrough
CT: control target
= control target key end

     0   :  { %s22_s0 = inlined_call_operand.vmem [shape: f32[8], index: 0, kind: input, shape index: {}]   ;;  %s23_s1 = inlined_call_operand.vmem [shape: f32[8,8], index: 1, kind: output, shape index: {}]  }
   0x1   :  { %v4_v0 = vld [vmem:[%s22_s0] ss:$0 sm:$0xff] }
   0x2   :  { %5 = vst [vmem:[%s23_s1] sm:$0xff] %v4_v0 }

// kernel: tile.9
= control target key start
LH: loop header
LB: loop body
LE: loop exit
PB: predicated region body
PF: predicated region fallthrough
CT: control target
= control target key end

     0   :  { %s69_s10 = smov 56   ;;  %s70_s11 = smov 40   ;;  %vm3_vm0 = vcmask 64512   ;;  %vm9_vm1 = vcmask 523712   ;;  %vm15_vm2 = vcmask 458112   ;;  %vm21_vm3 = vcmask 392512   ;;  %s113_s0 = inlined_call_operand.vmem [shape: f32[8,8], index: 0, kind: input, shape index: {}]   ;;  %s114_s1 = inlined_call_operand.vmem [shape: f32[64], index: 1, kind: output, shape index: {}]  }
   0x1   :  { %v55_v0 = vld [vmem:[%s113_s0 + $0x7] sm:$0x1]   ;;  %v57_v1 = vld [vmem:[%s113_s0 + $0x5] sm:$0x1]   ;;  %v56_v2 = vld [vmem:[%s113_s0 + $0x6] sm:$0x1]  }
   0x2   :  { %7 = vrot.lane.b32.xlu0 %v55_v0, %s69_s10  ;;  %19 = vrot.lane.b32.xlu1 %v57_v1, %s70_s11  ;;  %v58_v3 = vld [vmem:[%s113_s0 + $0x4] sm:$0x1]   ;;  %v2_v4 = vld [vmem:[%s113_s0] sm:$0x1]   ;;  %s71_s18 = smov 48   ;;  %s72_s19 = smov 32  }
   0x3   :  { %4 = vst.msk [vmem:[#allocation0] sm:$0x1] %vm3_vm0, %v2_v4   ;;  %v59_v5 = vld [vmem:[%s113_s0 + $0x3] sm:$0x1]   ;;  %v60_v6 = vld [vmem:[%s113_s0 + $0x2] sm:$0x1]  }
   0x4   :  { %s73_s24 = smov 24   ;;  %s74_s25 = smov 16   ;;  %v61_v7 = vld [vmem:[%s113_s0 + $0x1] sm:$0x1]   ;;  %vm27_vm4 = vcmask 326912   ;;  %vm33_vm5 = vcmask 261312  }
   0x5   :  { %s75_s0 = smov 8   ;;  %vm39_vm6 = vcmask 195712   ;;  %vm45_vm7 = vcmask 130112  }
   0x6   :  { %13 = vrot.lane.b32.xlu0 %v56_v2, %s71_s18  ;;  %25 = vrot.lane.b32.xlu1 %v58_v3, %s72_s19 }
   0xa   :  { %31 = vrot.lane.b32.xlu0 %v59_v5, %s73_s24  ;;  %37 = vrot.lane.b32.xlu1 %v60_v6, %s74_s25 }
   0xe   :  { %43 = vrot.lane.b32.xlu0 %v61_v7, %s75_s0 }
  0x74   :  { %v8_v8 = vpop.permute.xlu0 %7   ;;  %v20_v9 = vpop.permute.xlu1 %19  }
  0x75   :  { %10 = vst.msk [vmem:[#allocation0] sm:$0x1] %vm9_vm1, %v8_v8  }
  0x78   :  { %v14_v10 = vpop.permute.xlu0 %13   ;;  %v26_v11 = vpop.permute.xlu1 %25  }
  0x79   :  { %16 = vst.msk [vmem:[#allocation0] sm:$0x1] %vm15_vm2, %v14_v10  }
  0x7a   :  { %22 = vst.msk [vmem:[#allocation0] sm:$0x1] %vm21_vm3, %v20_v9  }
  0x7b   :  { %28 = vst.msk [vmem:[#allocation0] sm:$0x1] %vm27_vm4, %v26_v11  }
  0x7c   :  { %v32_v12 = vpop.permute.xlu0 %31   ;;  %v38_v13 = vpop.permute.xlu1 %37  }
  0x7d   :  { %34 = vst.msk [vmem:[#allocation0] sm:$0x1] %vm33_vm5, %v32_v12  }
  0x7e   :  { %40 = vst.msk [vmem:[#allocation0] sm:$0x1] %vm39_vm6, %v38_v13  }
  0x80   :  { %v44_v14 = vpop.permute.xlu0 %43  }
  0x81   :  { %46 = vst.msk [vmem:[#allocation0] sm:$0x1] %vm45_vm7, %v44_v14  }
  0x88   :  { %v51_v15 = vld [vmem:[#allocation0] sm:$0x1] }
  0x89   :  { %54 = vst [vmem:[%s114_s1] sm:$0x1] %v51_v15 }

// kernel: conv_block.1
= control target key start
LH: loop header
LB: loop body
LE: loop exit
PB: predicated region body
PF: predicated region fallthrough
CT: control target
= control target key end

     0   :  { %vm203_vm0 = vsmask.f32 3328  ;;  %vm204_vm1 = vsmask.f32 7440  ;;  %v11367_v40 = vmov 0  ;;  %vm865_vm3 = vcmask 1042432   ;;  %s11352_s1 = inlined_call_operand.vmem [shape: bf16[9,128,128], index: 1, kind: input, shape index: {}]   ;;  %s11353_s0 = inlined_call_operand.vmem [shape: bf16[2,10,10,128], index: 0, kind: input, shape index: {}]   ;;  %s11354_s3 = inlined_call_operand.vmem [shape: bf16[9,128,128], index: 3, kind: input, shape index: {}]   ;;  %s11355_s2 = inlined_call_operand.vmem [shape: f32[1,128], index: 2, kind: input, shape index: {}]   ;;  %s11356_s4 = inlined_call_operand.vmem [shape: f32[1,128], index: 4, kind: input, shape index: {}]   ;;  %s11357_s5 = inlined_call_operand.vmem [shape: f32[2,64,128], index: 5, kind: output, shape index: {}]  }
   0x1   :  { %v8318_v0 = vld [vmem:[%s11352_s1 + $0x78] sm:$0xff]   ;;  %v8320_v2 = vld [vmem:[%s11352_s1 + $0x70] sm:$0xff]   ;;  %v8322_v4 = vld [vmem:[%s11352_s1 + $0x68] sm:$0xff]   ;;  %vm866_vm4 = vcmask 1046532   ;;  %vm30_vm6 = vcmask 1040384   ;;  %vm3452_vm11 = vcmask 1043456  }
   0x2   :  { %v8319_v1 = vld [vmem:[%s11352_s1 + $0x38] sm:$0xff]   ;;  %7741 = vmatprep.subr.bf16.mxu0 %v8318_v0  ;;  %v8321_v3 = vld [vmem:[%s11352_s1 + $0x30] sm:$0xff]   ;;  %v8323_v5 = vld [vmem:[%s11352_s1 + $0x28] sm:$0xff]   ;;  %vm31_vm7 = vsmask.f32 256 }
   0x3   :  { %7773 = vmatprep.subr.bf16.mxu1 %v8319_v1  ;;  %7742 = vmatpush3.bf16.msra.mxu0 %v8318_v0  ;;  %v8324_v6 = vld [vmem:[%s11352_s1 + $0x60] sm:$0xff]   ;;  %v8326_v8 = vld [vmem:[%s11352_s1 + $0x58] sm:$0xff]   ;;  %v8328_v10 = vld [vmem:[%s11352_s1 + $0x50] sm:$0xff]   ;;  %vm93_vm9 = vsmask.f32 7938 }
   0x4   :  { %7774 = vmatpush3.bf16.msra.mxu1 %v8319_v1  ;;  %7743 = vmatprep.subr.bf16.mxu0 %v8320_v2  ;;  %v8325_v7 = vld [vmem:[%s11352_s1 + $0x20] sm:$0xff]   ;;  %v8327_v9 = vld [vmem:[%s11352_s1 + $0x18] sm:$0xff]   ;;  %v8329_v11 = vld [vmem:[%s11352_s1 + $0x10] sm:$0xff]  }
   0x5   :  { %7775 = vmatprep.subr.bf16.mxu1 %v8321_v3  ;;  %v155_v12 = vld [vmem:[%s11353_s0] sm:$0xf]  ;;  %v156_v13 = vld [vmem:[%s11353_s0 + $0x8] sm:$0xf]  ;;  %v8588_v14 = vld [vmem:[%s11353_s0 + $0x4] sm:$0x1] }
   0x6   :  { %v8593_v15 = vld [vmem:[%s11353_s0 + $0xc] sm:$0x1]  ;;  %v207_v16 = vshrl.u32 %v155_v12, 16  ;;  %v210_v17 = vshll.u32 %v155_v12, 16  ;;  %v216_v18 = vshll.u32 %v8588_v14, 16  ;;  %v221_v19 = vshrl.u32 %v156_v13, 16  ;;  %vm8631_vm2 = vmor %vm203_vm0, %vm204_vm1 }
   0x7   :  { %7744 = vmatpush3.bf16.msra.mxu0 %v8320_v2  ;;  %v8330_v20 = vld [vmem:[%s11352_s1 + $0x48] sm:$0xff]   ;;  %v224_v21 = vshll.u32 %v156_v13, 16  ;;  %v230_v22 = vshll.u32 %v8593_v15, 16  ;;  %v8603_v23 = vld [vmem:[%s11353_s0 + $0x10] sm:$0xf]  ;;  %v6683_v31 = vcombine.low %v155_v12, %v156_v13  ;;  %v8332_v39 = vld [vmem:[%s11352_s1 + $0x40] sm:$0xff]  }
   0x8   :  { %7776 = vmatpush3.bf16.msra.mxu1 %v8321_v3  ;;  %7745 = vmatprep.subr.bf16.mxu0 %v8322_v4  ;;  %v209_v24 = vrot.slane %v207_v16, 4  ;;  %v212_v25 = vrot.slane %v210_v17, 5  ;;  %v218_v26 = vrot.slane %v216_v18, 5  ;;  %v223_v27 = vrot.slane %v221_v19, 4  ;;  %v8608_v28 = vld [vmem:[%s11353_s0 + $0x18] sm:$0xf]  ;;  %vm8864_vm5 = vmor %vm865_vm3, %vm866_vm4 }
   0x9   :  { %7777 = vmatprep.subr.bf16.mxu1 %v8323_v5  ;;  %v226_v29 = vrot.slane %v224_v21, 5  ;;  %v232_v30 = vrot.slane %v230_v22, 5  ;;  %v8613_v32 = vld [vmem:[%s11353_s0 + $0x14] sm:$0x1]  ;;  %v8618_v33 = vld [vmem:[%s11353_s0 + $0x1c] sm:$0x1]  ;;  %7789 = vmatprep.mubr.bf16.mxu1 %v6683_v31  ;;  %v6684_v3 = vcombine.low %v8603_v23, %v8608_v28  ;;  %vm9755_vm8 = vmand %vm30_vm6, %vm31_vm7 }
   0xa   :  { %v8331_v34 = vld [vmem:[%s11352_s1 + $0x8] sm:$0xff]   ;;  %v213_v35 = vor.u32 %v212_v25, %v209_v24  ;;  %v235_v36 = vshrl.u32 %v8603_v23, 16  ;;  %v238_v37 = vshll.u32 %v8603_v23, 16  ;;  %v244_v38 = vshll.u32 %v8613_v32, 16  ;;  %v8333_v45 = vld [vmem:[%s11352_s1] sm:$0xff]   ;;  %v8336_v60 = vld [vmem:[%s11352_s1 + $0xb8] sm:$0xff]  }
   0xb   :  { %7746 = vmatpush3.bf16.msra.mxu0 %v8322_v4  ;;  %v11368_v40 = vsel %vm8631_vm2, 4294967295, %v11367_v40  ;;  %v227_v41 = vor.u32 %v226_v29, %v223_v27  ;;  %v249_v42 = vshrl.u32 %v8608_v28, 16  ;;  %v252_v43 = vshll.u32 %v8608_v28, 16  ;;  %v8654_v0 = vld [vmem:[%s11353_s0 + $0x20] sm:$0xf]  ;;  %v8338_v22 = vld [vmem:[%s11352_s1 + $0xb0] sm:$0xff]   ;;  %vm9762_vm10 = vmand %vm30_vm6, %vm93_vm9 }
   0xc   :  { %7778 = vmatpush3.bf16.msra.mxu1 %v8323_v5  ;;  %7747 = vmatprep.subr.bf16.mxu0 %v8324_v6  ;;  %11369 = vst [vmem:[#allocation3_spill] sm:$0xff] %v11368_v40  ;;  %v258_v44 = vshll.u32 %v8618_v33, 16  ;;  %v214_v46 = vrot.slane %v213_v35, 4  ;;  %v237_v47 = vrot.slane %v235_v36, 4  ;;  %v240_v48 = vrot.slane %v238_v37, 5  ;;  %vm10208_vm12 = vmand %vm3452_vm11, %vm93_vm9 }
   0xd   :  { %7779 = vmatprep.subr.bf16.mxu1 %v8325_v7  ;;  %v228_v49 = vrot.slane %v227_v41, 4  ;;  %v870_v50 = vrot.slane %v8588_v14, 5  ;;  %v251_v51 = vrot.slane %v249_v42, 4  ;;  %v254_v52 = vrot.slane %v252_v43, 5  ;;  %v8659_v1 = vld [vmem:[%s11353_s0 + $0x28] sm:$0xf] }
   0xe   :  { %v219_v53 = vsel %vm8631_vm2, %v214_v46, %v218_v26  ;;  %v874_v54 = vrot.slane %v8593_v15, 5  ;;  %v241_v55 = vor.u32 %v240_v48, %v237_v47  ;;  %v246_v56 = vrot.slane %v244_v38, 5  ;;  %v8666_v4 = vld [vmem:[%s11353_s0 + $0x24] sm:$0x1]  ;;  %v8671_v5 = vld [vmem:[%s11353_s0 + $0x2c] sm:$0x1] }
   0xf   :  { %7748 = vmatpush3.bf16.msra.mxu0 %v8324_v6  ;;  %v233_v57 = vsel %vm8631_vm2, %v228_v49, %v232_v30  ;;  %v255_v58 = vor.u32 %v254_v52, %v251_v51  ;;  %v260_v59 = vrot.slane %v258_v44, 5  ;;  %v878_v63 = vrot.slane %v8613_v32, 5  ;;  %v8687_v13 = vld [vmem:[%s11353_s0 + $0x30] sm:$0xf]  ;;  %v8704_v26 = vld [vmem:[%s11353_s0 + $0x34] sm:$0x1] }
  0x10   :  { %7780 = vmatpush3.bf16.msra.mxu1 %v8325_v7  ;;  %7749 = vmatprep.subr.bf16.mxu0 %v8326_v8  ;;  %v6667_v61 = vcombine.low %v219_v53, %v233_v57  ;;  %v242_v62 = vrot.slane %v241_v55, 4  ;;  %v263_v6 = vshrl.u32 %v8654_v0, 16  ;;  %v6685_v7 = vcombine.low %v8654_v0, %v8659_v1  ;;  %v8709_v29 = vld [vmem:[%s11353_s0 + $0x3c] sm:$0x1]  ;;  %v8342_v44 = vld [vmem:[%s11352_s1 + $0xa8] sm:$0xff]  }
  0x11   :  { %7781 = vmatprep.subr.bf16.mxu1 %v8327_v9  ;;  %v256_v2 = vrot.slane %v255_v58, 4  ;;  %v277_v12 = vshrl.u32 %v8659_v1, 16  ;;  %v280_v18 = vshll.u32 %v8659_v1, 16  ;;  %v286_v19 = vshll.u32 %v8671_v5, 16  ;;  %v8343_v49 = vld [vmem:[%s11352_s1 + $0xe8] sm:$0xff]  }
  0x12   :  { %7757 = vmatprep.mubr.bf16.mxu0 %v6667_v61  ;;  %v265_v17 = vrot.slane %v263_v6, 4  ;;  %v291_v30 = vshrl.u32 %v8687_v13, 16  ;;  %v294_v31 = vshll.u32 %v8687_v13, 16  ;;  %v300_v36 = vshll.u32 %v8704_v26, 16  ;;  %v163_v61 = vld [vmem:[%s11353_s0 + $0x50] sm:$0xf] }
  0x13   :  { %7750 = vmatpush3.bf16.msra.mxu0 %v8326_v8  ;;  %v247_v8 = vsel %vm8631_vm2, %v242_v62, %v246_v56  ;;  %v261_v16 = vsel %vm8631_vm2, %v256_v2, %v260_v59  ;;  %v279_v25 = vrot.slane %v277_v12, 4  ;;  %v282_v27 = vrot.slane %v280_v18, 5  ;;  %v164_v62 = vld [vmem:[%s11353_s0 + $0x58] sm:$0xf]  ;;  %v8742_v2 = vld [vmem:[%s11353_s0 + $0x54] sm:$0x1] }
  0x14   :  { %7782 = vmatpush3.bf16.msra.mxu1 %v8327_v9  ;;  %7751 = vmatprep.subr.bf16.mxu0 %v8328_v10  ;;  %v8337_v9 = vld [vmem:[%s11352_s1 + $0xf8] sm:$0xff]   ;;  %v6668_v21 = vcombine.low %v247_v8, %v261_v16  ;;  %v288_v28 = vrot.slane %v286_v19, 5  ;;  %v293_v41 = vrot.slane %v291_v30, 4  ;;  %v296_v42 = vrot.slane %v294_v31, 5  ;;  %v8777_v31 = vld [vmem:[%s11353_s0 + $0x6c] sm:$0x1] }
  0x15   :  { %7783 = vmatprep.subr.bf16.mxu1 %v8329_v11  ;;  %v314_v43 = vshll.u32 %v8709_v29, 16  ;;  %v302_v46 = vrot.slane %v300_v36, 5  ;;  %v882_v57 = vrot.slane %v8618_v33, 5  ;;  %v319_v6 = vshrl.u32 %v163_v61, 16  ;;  %v8359_v14 = vld [vmem:[%s11353_s0 + $0x8] ss:$8 sps:$4 sm:$0xff]  }
  0x16   :  { %v297_v52 = vor.u32 %v296_v42, %v293_v41  ;;  %v333_v12 = vshrl.u32 %v164_v62, 16  ;;  %v336_v19 = vshll.u32 %v164_v62, 16  ;;  %v8348_v41 = vld [vmem:[%s11352_s1 + $0x98] sm:$0xff]   ;;  %v823_v32 = vld [vmem:[%s11353_s0 + $0x30] sm:$0xe]  ;;  %v8367_v33 = vld [vmem:[%s11352_s1 + $0x168] sm:$0xff]  }
  0x17   :  { %7752 = vmatpush3.bf16.msra.mxu0 %v8328_v10  ;;  %v266_v10 = vshll.u32 %v8654_v0, 16  ;;  %v316_v53 = vrot.slane %v314_v43, 5  ;;  %v321_v18 = vrot.slane %v319_v6, 4  ;;  %v168_v6 = vld [vmem:[%s11353_s0 + $0x78] sm:$0xf] }
  0x18   :  { %7784 = vmatpush3.bf16.msra.mxu1 %v8329_v11  ;;  %7753 = vmatprep.subr.bf16.mxu0 %v8330_v20  ;;  %v272_v11 = vshll.u32 %v8666_v4, 16  ;;  %v298_v59 = vrot.slane %v297_v52, 4  ;;  %v8360_v15 = vld [vmem:[%s11353_s0 + $0x18] ss:$8 sps:$4 sm:$0xff]  }
  0x19   :  { %7785 = vmatprep.subr.bf16.mxu1 %v8331_v34  ;;  %v268_v23 = vrot.slane %v266_v10, 5  ;;  %v322_v10 = vshll.u32 %v163_v61, 16 }
  0x1a   :  { %v274_v24 = vrot.slane %v272_v11, 5  ;;  %v303_v8 = vsel %vm8631_vm2, %v298_v59, %v302_v46  ;;  %v328_v11 = vshll.u32 %v8742_v2, 16  ;;  %v8349_v46 = vld [vmem:[%s11352_s1 + $0xd8] sm:$0xff]  }
  0x1b   :  { %7754 = vmatpush3.bf16.msra.mxu0 %v8330_v20  ;;  %v8696_v20 = vld [vmem:[%s11353_s0 + $0x38] sm:$0xf]  ;;  %v269_v35 = vor.u32 %v268_v23, %v265_v17  ;;  %v8345_v17 = vld [vmem:[%s11352_s1 + $0xe0] sm:$0xff]   ;;  %v324_v23 = vrot.slane %v322_v10, 5  ;;  %v8814_v10 = vld [vmem:[%s11353_s0 + $0x7c] sm:$0x1] }
  0x1c   :  { %7786 = vmatpush3.bf16.msra.mxu1 %v8331_v34  ;;  %7755 = vmatprep.subr.bf16.mxu0 %v8332_v39  ;;  %v8339_v34 = vld [vmem:[%s11352_s1 + $0xf0] sm:$0xff]   ;;  %v305_v37 = vshrl.u32 %v8696_v20, 16  ;;  %v308_v38 = vshll.u32 %v8696_v20, 16 }
  0x1d   :  { %7787 = vmatprep.subr.bf16.mxu1 %v8333_v45  ;;  %v325_v36 = vor.u32 %v324_v23, %v321_v18  ;;  %v389_v18 = vshrl.u32 %v168_v6, 16  ;;  %v398_v23 = vshll.u32 %v8814_v10, 16 }
  0x1e   :  { %v307_v47 = vrot.slane %v305_v37, 4  ;;  %v310_v48 = vrot.slane %v308_v38, 5 }
  0x1f   :  { %7756 = vmatpush3.bf16.msra.mxu0 %v8332_v39  ;;  %v283_v39 = vor.u32 %v282_v27, %v279_v25  ;;  %v335_v25 = vrot.slane %v333_v12, 4  ;;  %v8772_v27 = vld [vmem:[%s11353_s0 + $0x64] sm:$0x1] }
  0x20   :  { %7788 = vmatpush3.bf16.msra.mxu1 %v8333_v45  ;;  %7805 = vmatprep.subr.bf16.mxu0 %v8336_v60  ;;  %v270_v45 = vrot.slane %v269_v35, 4  ;;  %v311_v56 = vor.u32 %v310_v48, %v307_v47  ;;  %v356_v37 = vshll.u32 %v8772_v27, 16  ;;  %v326_v47 = vrot.slane %v325_v36, 4  ;;  %v8834_v36 = vld [vmem:[%s11353_s0 + $0x84] sm:$0x1] }
  0x21   :  { %7837 = vmatprep.subr.bf16.mxu1 %v8337_v9  ;;  %v284_v51 = vrot.slane %v283_v39, 4 }
  0x22   :  { %7758 = vmatmul.mubr.bf16.vlgmr.msra.gmra.mxu0 %v6668_v21  ;;  %v275_v55 = vsel %vm8631_vm2, %v270_v45, %v274_v24  ;;  %v312_v1 = vrot.slane %v311_v56, 4  ;;  %v166_v21 = vld [vmem:[%s11353_s0 + $0x68] sm:$0xf]  ;;  %v330_v24 = vrot.slane %v328_v11, 5  ;;  %v370_v45 = vshll.u32 %v8777_v31, 16 }
  0x23   :  { %7790 = vmatmul.mubr.bf16.vlgmr.msra.gmra.mxu1 %v6684_v3  ;;  %7806 = vmatpush3.bf16.msra.mxu0 %v8336_v60  ;;  %v289_v58 = vsel %vm8631_vm2, %v284_v51, %v288_v28  ;;  %v6686_v60 = vcombine.low %v8687_v13, %v8696_v20  ;;  %v8747_v3 = vld [vmem:[%s11353_s0 + $0x5c] sm:$0x1]  ;;  %v8758_v13 = vld [vmem:[%s11353_s0 + $0x60] sm:$0xf]  ;;  %v338_v28 = vrot.slane %v336_v19, 5  ;;  %v361_v38 = vshrl.u32 %v166_v21, 16 }
  0x24   :  { %7838 = vmatpush3.bf16.msra.mxu1 %v8337_v9  ;;  %7807 = vmatprep.subr.bf16.mxu0 %v8338_v22  ;;  %v6669_v0 = vcombine.low %v275_v55, %v289_v58  ;;  %v8344_v9 = vld [vmem:[%s11352_s1 + $0xa0] sm:$0xff]   ;;  %v317_v16 = vsel %vm8631_vm2, %v312_v1, %v316_v53  ;;  %v342_v20 = vshll.u32 %v8747_v3, 16  ;;  %v350_v35 = vshll.u32 %v8758_v13, 16  ;;  %v8350_v58 = vld [vmem:[%s11352_s1 + $0x90] sm:$0xff]  }
  0x25   :  { %7839 = vmatprep.subr.bf16.mxu1 %v8339_v34  ;;  %7793 = vmatprep.mubr.bf16.mxu1 %v6685_v7  ;;  %v6687_v7 = vcombine.low %v163_v61, %v164_v62  ;;  %v364_v39 = vshll.u32 %v166_v21, 16  ;;  %v339_v42 = vor.u32 %v338_v28, %v335_v25  ;;  %v358_v48 = vrot.slane %v356_v37, 5  ;;  %v167_v1 = vld [vmem:[%s11353_s0 + $0x70] sm:$0xf]  ;;  %v169_v19 = vld [vmem:[%s11353_s0 + $0x80] sm:$0xf] }
  0x26   :  { %7761 = vmatprep.mubr.bf16.mxu0 %v6669_v0  ;;  %v344_v30 = vrot.slane %v342_v20, 5  ;;  %v372_v55 = vrot.slane %v370_v45, 5  ;;  %v6688_v56 = vcombine.low %v8758_v13, %v166_v21  ;;  %v331_v59 = vsel %vm8631_vm2, %v326_v47, %v330_v24  ;;  %v8351_v0 = vld [vmem:[%s11352_s1 + $0xd0] sm:$0xff]   ;;  %v170_v24 = vld [vmem:[%s11353_s0 + $0x88] sm:$0xf] }
  0x27   :  { %7808 = vmatpush3.bf16.msra.mxu0 %v8338_v22  ;;  %v6670_v22 = vcombine.low %v303_v8, %v317_v16  ;;  %v366_v51 = vrot.slane %v364_v39, 5  ;;  %v340_v52 = vrot.slane %v339_v42, 4  ;;  %v375_v11 = vshrl.u32 %v167_v1, 16  ;;  %v8354_v25 = vld [vmem:[%s11352_s1 + $0x88] sm:$0xff]  }
  0x28   :  { %7840 = vmatpush3.bf16.msra.mxu1 %v8339_v34  ;;  %7809 = vmatprep.subr.bf16.mxu0 %v8342_v44  ;;  %v347_v34 = vshrl.u32 %v8758_v13, 16  ;;  %v6689_v12 = vcombine.low %v167_v1, %v168_v6  ;;  %v378_v16 = vshll.u32 %v167_v1, 16  ;;  %v8355_v37 = vld [vmem:[%s11352_s1 + $0xc8] sm:$0xff]   ;;  %v400_v39 = vrot.slane %v398_v23, 5  ;;  %v8358_v23 = vld [vmem:[%s11352_s1 + $0x138] sm:$0xff]  }
  0x29   :  { %7841 = vmatprep.subr.bf16.mxu1 %v8343_v49  ;;  %v345_v61 = vsel %vm8631_vm2, %v340_v52, %v344_v30  ;;  %v377_v21 = vrot.slane %v375_v11, 4  ;;  %v403_v42 = vshrl.u32 %v169_v19, 16  ;;  %v412_v45 = vshll.u32 %v8834_v36, 16 }
  0x2a   :  { %7762 = vmatmul.mubr.bf16.gmra.mxu0 %v6670_v22  ;;  %v349_v43 = vrot.slane %v347_v34, 4  ;;  %v392_v22 = vshll.u32 %v168_v6, 16  ;;  %v380_v30 = vrot.slane %v378_v16, 5  ;;  %v420_v47 = vshll.u32 %v170_v24, 16 }
  0x2b   :  { %7794 = vmatmul.mubr.bf16.gmra.mxu1 %v6686_v60  ;;  %7810 = vmatpush3.bf16.msra.mxu0 %v8342_v44  ;;  %v352_v44 = vrot.slane %v350_v35, 5  ;;  %v391_v35 = vrot.slane %v389_v18, 4  ;;  %v11370_v16 = vmov 0 }
  0x2c   :  { %7842 = vmatpush3.bf16.msra.mxu1 %v8343_v49  ;;  %7811 = vmatprep.subr.bf16.mxu0 %v8344_v9  ;;  %v363_v49 = vrot.slane %v361_v38, 4  ;;  %v394_v38 = vrot.slane %v392_v22, 5  ;;  %v11371_v16 = vsel %vm8864_vm5, 4294967295, %v11370_v16  ;;  %v819_v22 = vld [vmem:[%s11353_s0 + $0x10] sm:$0xe] }
  0x2d   :  { %7843 = vmatprep.subr.bf16.mxu1 %v8345_v17  ;;  %7797 = vmatprep.mubr.bf16.mxu1 %v6687_v7  ;;  %v353_v53 = vor.u32 %v352_v44, %v349_v43  ;;  %v6671_v7 = vcombine.low %v331_v59, %v345_v61  ;;  %v406_v43 = vshll.u32 %v169_v19, 16  ;;  %v381_v44 = vor.u32 %v380_v30, %v377_v21 }
  0x2e   :  { %v367_v60 = vor.u32 %v366_v51, %v363_v49  ;;  %v395_v49 = vor.u32 %v394_v38, %v391_v35  ;;  %v405_v51 = vrot.slane %v403_v42, 4  ;;  %v414_v59 = vrot.slane %v412_v45, 5  ;;  %11372 = vst [vmem:[#allocation4_spill] sm:$0xff] %v11371_v16  ;;  %v8361_v38 = vld [vmem:[%s11352_s1 + $0x178] sm:$0xff]  }
  0x2f   :  { %7812 = vmatpush3.bf16.msra.mxu0 %v8344_v9  ;;  %v354_v62 = vrot.slane %v353_v53, 4  ;;  %v8809_v9 = vld [vmem:[%s11353_s0 + $0x74] sm:$0x1]  ;;  %7765 = vmatprep.mubr.bf16.mxu0 %v6671_v7  ;;  %v408_v52 = vrot.slane %v406_v43, 5  ;;  %v422_v61 = vrot.slane %v420_v47, 5  ;;  %v894_v47 = vrot.slane %v8704_v26, 5 }
  0x30   :  { %7844 = vmatpush3.bf16.msra.mxu1 %v8345_v17  ;;  %7813 = vmatprep.subr.bf16.mxu0 %v8348_v41  ;;  %v368_v8 = vrot.slane %v367_v60, 4  ;;  %v384_v17 = vshll.u32 %v8809_v9, 16  ;;  %v821_v43 = vld [vmem:[%s11353_s0 + $0x20] sm:$0xe]  ;;  %v8365_v26 = vld [vmem:[%s11353_s0 + $0x28] ss:$8 sps:$4 sm:$0xff]  }
  0x31   :  { %7845 = vmatprep.subr.bf16.mxu1 %v8349_v46  ;;  %v359_v13 = vsel %vm8631_vm2, %v354_v62, %v358_v48  ;;  %v8356_v48 = vld [vmem:[%s11352_s1 + $0x80] sm:$0xff]   ;;  %v396_v62 = vrot.slane %v395_v49, 4  ;;  %v409_v1 = vor.u32 %v408_v52, %v405_v51  ;;  %v6703_v45 = vrot.slane %v821_v43, 9  ;;  %v8362_v51 = vld [vmem:[%s11352_s1 + $0x130] sm:$0xff]  }
  0x32   :  { %v373_v20 = vsel %vm8631_vm2, %v368_v8, %v372_v55  ;;  %v386_v34 = vrot.slane %v384_v17, 5  ;;  %v8357_v55 = vld [vmem:[%s11352_s1 + $0xc0] sm:$0xff]   ;;  %v886_v17 = vrot.slane %v8666_v4, 5  ;;  %v820_v4 = vld [vmem:[%s11353_s0 + $0x18] sm:$0xe] }
  0x33   :  { %7798 = vmatmul.mubr.bf16.gmra.mxu1 %v6688_v56  ;;  %7814 = vmatpush3.bf16.msra.mxu0 %v8348_v41  ;;  %v6672_v28 = vcombine.low %v359_v13, %v373_v20  ;;  %v8842_v41 = vld [vmem:[%s11353_s0 + $0x8c] sm:$0x1]  ;;  %v382_v56 = vrot.slane %v381_v44, 4  ;;  %v401_v8 = vsel %vm8631_vm2, %v396_v62, %v400_v39  ;;  %v410_v11 = vrot.slane %v409_v1, 4  ;;  %v818_v13 = vld [vmem:[%s11353_s0 + $0x8] sm:$0xe] }
  0x34   :  { %7846 = vmatpush3.bf16.msra.mxu1 %v8349_v46  ;;  %7815 = vmatprep.subr.bf16.mxu0 %v8350_v58  ;;  %v417_v46 = vshrl.u32 %v170_v24, 16  ;;  %v426_v53 = vshll.u32 %v8842_v41, 16  ;;  %v6700_v21 = vrot.slane %v818_v13, 9  ;;  %v822_v44 = vld [vmem:[%s11353_s0 + $0x28] sm:$0xe]  ;;  %v887_v52 = vsel %vm8864_vm5, %v6703_v45, %v886_v17 }
  0x35   :  { %7847 = vmatprep.subr.bf16.mxu1 %v8351_v0  ;;  %7801 = vmatprep.mubr.bf16.mxu1 %v6689_v12  ;;  %v817_v12 = vld [vmem:[%s11353_s0] sm:$0xe]  ;;  %v8364_v62 = vld [vmem:[%s11352_s1 + $0x128] sm:$0xff]   ;;  %v825_v1 = vld [vmem:[%s11353_s0 + $0x50] sm:$0xe]  ;;  %v910_v13 = vrot.slane %v8772_v27, 5 }
  0x36   :  { %7766 = vmatmul.mubr.bf16.gmra.mxu0 %v6672_v28  ;;  %v419_v60 = vrot.slane %v417_v46, 4  ;;  %v428_v6 = vrot.slane %v426_v53, 5  ;;  %v6699_v20 = vrot.slane %v817_v12, 9  ;;  %v890_v28 = vrot.slane %v8671_v5, 5  ;;  %v8371_v27 = vld [vmem:[%s11353_s0 + $0x58] ss:$8 sps:$4 sm:$0xff]  }
  0x37   :  { %7816 = vmatpush3.bf16.msra.mxu0 %v8350_v58  ;;  %v6690_v58 = vcombine.low %v169_v19, %v170_v24  ;;  %v415_v24 = vsel %vm8631_vm2, %v410_v11, %v414_v59  ;;  %v875_v35 = vsel %vm8864_vm5, %v6700_v21, %v874_v54  ;;  %v6705_v46 = vrot.slane %v823_v32, 9  ;;  %v8366_v59 = vld [vmem:[%s11353_s0 + $0x38] ss:$8 sps:$4 sm:$0xff]   ;;  %v828_v11 = vld [vmem:[%s11353_s0 + $0x68] sm:$0xe] }
  0x38   :  { %7848 = vmatpush3.bf16.msra.mxu1 %v8351_v0  ;;  %7817 = vmatprep.subr.bf16.mxu0 %v8354_v25  ;;  %v387_v0 = vsel %vm8631_vm2, %v382_v56, %v386_v34  ;;  %v423_v7 = vor.u32 %v422_v61, %v419_v60  ;;  %v871_v34 = vsel %vm8864_vm5, %v6699_v20, %v870_v50  ;;  %v8363_v50 = vld [vmem:[%s11352_s1 + $0x170] sm:$0xff]   ;;  %v8369_v60 = vld [vmem:[%s11352_s1 + $0x160] sm:$0xff]   ;;  %v6710_v17 = vrot.slane %v828_v11, 9  ;;  %v8379_v32 = vld [vmem:[%s11352_s1 + $0x148] sm:$0xff]  }
  0x39   :  { %7849 = vmatprep.subr.bf16.mxu1 %v8355_v37  ;;  %v6673_v18 = vcombine.low %v387_v0, %v401_v8  ;;  %v6731_v39 = vcombine.low %v871_v34, %v875_v35  ;;  %v6707_v0 = vrot.slane %v825_v1, 9  ;;  %v827_v8 = vld [vmem:[%s11353_s0 + $0x60] sm:$0xe]  ;;  %v8375_v34 = vld [vmem:[%s11352_s1 + $0x150] sm:$0xff]  }
  0x3a   :  { %v424_v19 = vrot.slane %v423_v7, 4  ;;  %v6709_v12 = vrot.slane %v827_v8, 9  ;;  %v829_v35 = vld [vmem:[%s11353_s0 + $0x70] sm:$0xe]  ;;  %v6801_v1 = vld [vmem:[%s11353_s0 + $0x20] sm:$0xf] }
  0x3b   :  { %7802 = vmatmul.mubr.bf16.gmra.mxu1 %v6690_v58  ;;  %7818 = vmatpush3.bf16.msra.mxu0 %v8354_v25  ;;  %v6701_v25 = vrot.slane %v819_v22, 9  ;;  %v906_v58 = vrot.slane %v8747_v3, 5  ;;  %v9067_v8 = vld [vmem:[%s11353_s0 + $0x24] sm:$0x1] }
  0x3c   :  { %7850 = vmatpush3.bf16.msra.mxu1 %v8355_v37  ;;  %7819 = vmatprep.subr.bf16.mxu0 %v8356_v48  ;;  %v429_v30 = vsel %vm8631_vm2, %v424_v19, %v428_v6  ;;  %v6702_v37 = vrot.slane %v820_v4, 9  ;;  %v826_v6 = vld [vmem:[%s11353_s0 + $0x58] sm:$0xe]  ;;  %v8368_v19 = vld [vmem:[%s11352_s1 + $0x120] sm:$0xff]   ;;  %v918_v4 = vrot.slane %v8809_v9, 5 }
  0x3d   :  { %7851 = vmatprep.subr.bf16.mxu1 %v8357_v55  ;;  %7769 = vmatprep.mubr.bf16.mxu0 %v6673_v18  ;;  %v6674_v5 = vcombine.low %v415_v24, %v429_v30  ;;  %v879_v54 = vsel %vm8864_vm5, %v6701_v25, %v878_v63  ;;  %v6704_v63 = vrot.slane %v822_v44, 9  ;;  %v6708_v7 = vrot.slane %v826_v6, 9  ;;  %v8370_v24 = vld [vmem:[%s11352_s1 + $0x118] sm:$0xff]   ;;  %v8380_v11 = vld [vmem:[%s11352_s1 + $0x100] sm:$0xff]  }
  0x3e   :  { %7853 = vmatprep.mubr.bf16.mxu1 %v8359_v14  ;;  %v883_v42 = vsel %vm8864_vm5, %v6702_v37, %v882_v57  ;;  %v824_v57 = vld [vmem:[%s11353_s0 + $0x38] sm:$0xe]  ;;  %v914_v18 = vrot.slane %v8777_v31, 5  ;;  %v8372_v31 = vld [vmem:[%s11353_s0 + $0x68] ss:$8 sps:$4 sm:$0xff]   ;;  %v922_v25 = vrot.slane %v8814_v10, 5 }
  0x3f   :  { %7820 = vmatpush3.bf16.msra.mxu0 %v8356_v48  ;;  %v898_v48 = vrot.slane %v8709_v29, 5  ;;  %v6732_v49 = vcombine.low %v879_v54, %v883_v42  ;;  %v6706_v53 = vrot.slane %v824_v57, 9  ;;  %v891_v56 = vsel %vm8864_vm5, %v6704_v63, %v890_v28  ;;  %v830_v9 = vld [vmem:[%s11353_s0 + $0x78] sm:$0xe]  ;;  %v8374_v42 = vld [vmem:[%s11352_s1 + $0x110] sm:$0xff]  }
  0x40   :  { %7852 = vmatpush3.bf16.msra.mxu1 %v8357_v55  ;;  %7869 = vmatprep.subr.bf16.mxu0 %v8358_v23  ;;  %v902_v55 = vrot.slane %v8742_v2, 5  ;;  %v6733_v29 = vcombine.low %v887_v52, %v891_v56  ;;  %v895_v2 = vsel %vm8864_vm5, %v6705_v46, %v894_v47  ;;  %v907_v21 = vsel %vm8864_vm5, %v6708_v7, %v906_v58  ;;  %v8381_v46 = vld [vmem:[%s11352_s1 + $0x140] sm:$0xff]   ;;  %v6795_v47 = vld [vmem:[%s11353_s0 + $0x8] sm:$0xf] }
  0x41   :  { %7770 = vmatmul.mubr.bf16.gmra.mxu0 %v6674_v5  ;;  %7901 = vmatprep.subr.bf16.mxu1 %v8361_v38  ;;  %v899_v61 = vsel %vm8864_vm5, %v6706_v53, %v898_v48  ;;  %v911_v28 = vsel %vm8864_vm5, %v6709_v12, %v910_v13  ;;  %v915_v30 = vsel %vm8864_vm5, %v6710_v17, %v914_v18  ;;  %v6711_v10 = vrot.slane %v829_v35, 9  ;;  %v832_v5 = vld [vmem:[%s11353_s0 + $0x88] sm:$0xe]  ;;  %v9041_v48 = vld [vmem:[%s11353_s0 + $0xc] sm:$0x1] }
  0x42   :  { %7821 = vmatprep.mubr.bf16.mxu0 %v6731_v39  ;;  %v6734_v3 = vcombine.low %v895_v2, %v899_v61  ;;  %v903_v20 = vsel %vm8864_vm5, %v6707_v0, %v902_v55  ;;  %v6712_v37 = vrot.slane %v830_v9, 9  ;;  %v926_v14 = vrot.slane %v8834_v36, 5  ;;  %v8377_v36 = vld [vmem:[%s11353_s0 + $0x78] ss:$8 sps:$4 sm:$0xff]   ;;  %v6860_v9 = vld [vmem:[%s11353_s0 + $0x10] sm:$0xe] }
  0x43   :  { %7854 = vmatmul.mubr.bf16.vlgmr.msra.gmra.mxu1 %v8360_v15  ;;  %v6735_v22 = vcombine.low %v903_v20, %v907_v21  ;;  %v930_v15 = vrot.slane %v8842_v41, 5  ;;  %v6736_v54 = vcombine.low %v911_v28, %v915_v30  ;;  %v919_v43 = vsel %vm8864_vm5, %v6711_v10, %v918_v4  ;;  %v8378_v41 = vld [vmem:[%s11353_s0 + $0x88] ss:$8 sps:$4 sm:$0xff]   ;;  %v8382_v4 = vld [vmem:[%s11352_s1 + $0x1b8] sm:$0xff]  }
  0x44   :  { %7902 = vmatpush3.bf16.msra.mxu1 %v8361_v38  ;;  %7857 = vmatprep.mubr.bf16.mxu1 %v8365_v26  ;;  %v831_v38 = vld [vmem:[%s11353_s0 + $0x80] sm:$0xe]  ;;  %v923_v44 = vsel %vm8864_vm5, %v6712_v37, %v922_v25  ;;  %v1418_v52 = vshrl.u32 %v6795_v47, 16  ;;  %v1421_v53 = vshll.u32 %v6795_v47, 16  ;;  %v1427_v55 = vshll.u32 %v9041_v48, 16 }
  0x45   :  { %7903 = vmatprep.subr.bf16.mxu1 %v8363_v50  ;;  %v6713_v39 = vrot.slane %v831_v38, 9  ;;  %v6737_v45 = vcombine.low %v919_v43, %v923_v44  ;;  %v1463_v20 = vshll.u32 %v6801_v1, 16  ;;  %v1469_v21 = vshll.u32 %v9067_v8, 16  ;;  %v6859_v25 = vld [vmem:[%s11353_s0 + $0x8] sm:$0xe] }
  0x46   :  { %v1420_v2 = vrot.slane %v1418_v52, 4  ;;  %v1423_v61 = vrot.slane %v1421_v53, 5  ;;  %v1429_v6 = vrot.slane %v1427_v55, 5  ;;  %v6875_v38 = vrot.slane %v6859_v25, 9  ;;  %v9122_v53 = vld [vmem:[%s11353_s0 + $0x2c] sm:$0x1] }
  0x47   :  { %v927_v63 = vsel %vm8864_vm5, %v6713_v39, %v926_v14  ;;  %v1471_v35 = vrot.slane %v1469_v21, 5  ;;  %v6861_v39 = vld [vmem:[%s11353_s0 + $0x18] sm:$0xe]  ;;  %v6862_v14 = vld [vmem:[%s11353_s0 + $0x20] sm:$0xe]  ;;  %v1913_v47 = vrot.slane %v9067_v8, 5 }
  0x48   :  { %7904 = vmatpush3.bf16.msra.mxu1 %v8363_v50  ;;  %v6714_v50 = vrot.slane %v832_v5, 9  ;;  %v1424_v12 = vor.u32 %v1423_v61, %v1420_v2  ;;  %v1901_v5 = vrot.slane %v9041_v48, 5  ;;  %v8384_v48 = vld [vmem:[%s11352_s1 + $0x1b0] sm:$0xff]   ;;  %v6807_v2 = vld [vmem:[%s11353_s0 + $0x38] sm:$0xf] }
  0x49   :  { %7822 = vmatmul.mubr.bf16.vlgmr.msra.gmra.mxu0 %v6732_v49  ;;  %7905 = vmatprep.subr.bf16.mxu1 %v8367_v33  ;;  %v6797_v49 = vld [vmem:[%s11353_s0 + $0x10] sm:$0xf]  ;;  %v9140_v61 = vld [vmem:[%s11353_s0 + $0x3c] sm:$0x1] }
  0x4a   :  { %7870 = vmatpush3.bf16.msra.mxu0 %v8358_v23  ;;  %7825 = vmatprep.mubr.bf16.mxu0 %v6733_v29  ;;  %v8373_v23 = vld [vmem:[%s11352_s1 + $0x158] sm:$0xff]   ;;  %v931_v57 = vsel %vm8864_vm5, %v6714_v50, %v930_v15  ;;  %v1432_v56 = vshrl.u32 %v6797_v49, 16  ;;  %v1435_v26 = vshll.u32 %v6797_v49, 16  ;;  %v6803_v49 = vld [vmem:[%s11353_s0 + $0x28] sm:$0xf] }
  0x4b   :  { %7871 = vmatprep.subr.bf16.mxu0 %v8362_v51  ;;  %7858 = vmatmul.mubr.bf16.gmra.mxu1 %v8366_v59  ;;  %v6799_v59 = vld [vmem:[%s11353_s0 + $0x18] sm:$0xf]  ;;  %v6805_v55 = vld [vmem:[%s11353_s0 + $0x30] sm:$0xf] }
  0x4c   :  { %7906 = vmatpush3.bf16.msra.mxu1 %v8367_v33  ;;  %7861 = vmatprep.mubr.bf16.mxu1 %v8371_v27  ;;  %v8376_v33 = vld [vmem:[%s11352_s1 + $0x108] sm:$0xff]   ;;  %v1434_v58 = vrot.slane %v1432_v56, 4  ;;  %v1437_v0 = vrot.slane %v1435_v26, 5  ;;  %v1446_v13 = vshrl.u32 %v6799_v59, 16  ;;  %v1449_v17 = vshll.u32 %v6799_v59, 16 }
  0x4d   :  { %7907 = vmatprep.subr.bf16.mxu1 %v8369_v60  ;;  %v1425_v27 = vrot.slane %v1424_v12, 4  ;;  %v9130_v56 = vld [vmem:[%s11353_s0 + $0x34] sm:$0x1]  ;;  %v1474_v59 = vshrl.u32 %v6803_v49, 16 }
  0x4e   :  { %7872 = vmatpush3.bf16.msra.mxu0 %v8362_v51  ;;  %v9049_v51 = vld [vmem:[%s11353_s0 + $0x14] sm:$0x1]  ;;  %v1497_v12 = vshll.u32 %v9130_v56, 16 }
  0x4f   :  { %7873 = vmatprep.subr.bf16.mxu0 %v8364_v62  ;;  %v1441_v29 = vshll.u32 %v9049_v51, 16  ;;  %v1430_v10 = vsel %vm8631_vm2, %v1425_v27, %v1429_v6  ;;  %v1483_v6 = vshll.u32 %v9122_v53, 16  ;;  %v1476_v8 = vrot.slane %v1474_v59, 4 }
  0x50   :  { %7908 = vmatpush3.bf16.msra.mxu1 %v8369_v60  ;;  %v6738_v60 = vcombine.low %v927_v63, %v931_v57  ;;  %v6878_v63 = vrot.slane %v6862_v14, 9  ;;  %v1499_v27 = vrot.slane %v1497_v12, 5 }
  0x51   :  { %7826 = vmatmul.mubr.bf16.gmra.mxu0 %v6734_v3  ;;  %7909 = vmatprep.subr.bf16.mxu1 %v8373_v23  ;;  %v1443_v7 = vrot.slane %v1441_v29, 5  ;;  %v1438_v3 = vor.u32 %v1437_v0, %v1434_v58  ;;  %v1488_v58 = vshrl.u32 %v6805_v55, 16  ;;  %v1491_v0 = vshll.u32 %v6805_v55, 16 }
  0x52   :  { %7874 = vmatpush3.bf16.msra.mxu0 %v8364_v62  ;;  %7829 = vmatprep.mubr.bf16.mxu0 %v6735_v22  ;;  %v9059_v62 = vld [vmem:[%s11353_s0 + $0x1c] sm:$0x1]  ;;  %v1914_v29 = vsel %vm8864_vm5, %v6878_v63, %v1913_v47 }
  0x53   :  { %7875 = vmatprep.subr.bf16.mxu0 %v8368_v19  ;;  %7862 = vmatmul.mubr.bf16.gmra.mxu1 %v8372_v31  ;;  %v1455_v18 = vshll.u32 %v9059_v62, 16  ;;  %v9077_v22 = vld [vmem:[%s11352_s1 + $0x1f8] sm:$0xff]   ;;  %v1448_v31 = vrot.slane %v1446_v13, 4  ;;  %v1439_v28 = vrot.slane %v1438_v3, 4  ;;  %v9153_v13 = vld [vmem:[%s11353_s0 + $0x44] sm:$0x1] }
  0x54   :  { %7910 = vmatpush3.bf16.msra.mxu1 %v8373_v23  ;;  %7865 = vmatprep.mubr.bf16.mxu1 %v8377_v36  ;;  %v1451_v23 = vrot.slane %v1449_v17, 5  ;;  %v6877_v36 = vrot.slane %v6861_v39, 9  ;;  %v1502_v17 = vshrl.u32 %v6807_v2, 16  ;;  %v1490_v3 = vrot.slane %v1488_v58, 4 }
  0x55   :  { %7911 = vmatprep.subr.bf16.mxu1 %v8375_v34  ;;  %v1444_v50 = vsel %vm8631_vm2, %v1439_v28, %v1443_v7  ;;  %v6809_v7 = vld [vmem:[%s11353_s0 + $0x40] sm:$0xf]  ;;  %v1929_v59 = vrot.slane %v9153_v13, 5 }
  0x56   :  { %7876 = vmatpush3.bf16.msra.mxu0 %v8368_v19  ;;  %v1460_v19 = vshrl.u32 %v6801_v1, 16  ;;  %v1452_v37 = vor.u32 %v1451_v23, %v1448_v31  ;;  %v6843_v43 = vcombine.low %v1430_v10, %v1444_v50  ;;  %v8385_v1 = vld [vmem:[%s11352_s1 + $0x1f0] sm:$0xff]   ;;  %v1504_v31 = vrot.slane %v1502_v17, 4  ;;  %v9231_v17 = vld [vmem:[%s11353_s0 + $0x6c] sm:$0x1] }
  0x57   :  { %7877 = vmatprep.subr.bf16.mxu0 %v8370_v24  ;;  %v1511_v23 = vshll.u32 %v9140_v61, 16  ;;  %v1516_v28 = vshrl.u32 %v6809_v7, 16  ;;  %v1525_v10 = vshll.u32 %v9153_v13, 16  ;;  %v6815_v13 = vld [vmem:[%s11353_s0 + $0x68] sm:$0xf] }
  0x58   :  { %7912 = vmatpush3.bf16.msra.mxu1 %v8375_v34  ;;  %v1462_v30 = vrot.slane %v1460_v19, 4  ;;  %v1465_v34 = vrot.slane %v1463_v20, 5  ;;  %v1453_v44 = vrot.slane %v1452_v37, 4  ;;  %v1493_v19 = vrot.slane %v1491_v0, 5  ;;  %v6864_v37 = vld [vmem:[%s11353_s0 + $0x30] sm:$0xe] }
  0x59   :  { %7830 = vmatmul.mubr.bf16.gmra.mxu0 %v6736_v54  ;;  %7913 = vmatprep.subr.bf16.mxu1 %v8379_v32  ;;  %v6876_v54 = vrot.slane %v6860_v9, 9  ;;  %v1505_v20 = vshll.u32 %v6807_v2, 16  ;;  %v1513_v9 = vrot.slane %v1511_v23, 5  ;;  %v1518_v14 = vrot.slane %v1516_v28, 4  ;;  %v9207_v2 = vld [vmem:[%s11353_s0 + $0x5c] sm:$0x1] }
  0x5a   :  { %7878 = vmatpush3.bf16.msra.mxu0 %v8370_v24  ;;  %7833 = vmatprep.mubr.bf16.mxu0 %v6737_v45  ;;  %v1457_v24 = vrot.slane %v1455_v18, 5  ;;  %v1466_v15 = vor.u32 %v1465_v34, %v1462_v30  ;;  %v1902_v45 = vsel %vm8864_vm5, %v6875_v38, %v1901_v5  ;;  %v1485_v18 = vrot.slane %v1483_v6, 5  ;;  %v6863_v34 = vld [vmem:[%s11353_s0 + $0x28] sm:$0xe]  ;;  %v9220_v6 = vld [vmem:[%s11353_s0 + $0x64] sm:$0x1] }
  0x5b   :  { %7879 = vmatprep.subr.bf16.mxu0 %v8374_v42  ;;  %7866 = vmatmul.mubr.bf16.gmra.mxu1 %v8378_v41  ;;  %v1494_v25 = vor.u32 %v1493_v19, %v1490_v3  ;;  %v1519_v30 = vshll.u32 %v6809_v7, 16  ;;  %v6879_v38 = vrot.slane %v6863_v34, 9  ;;  %v1561_v34 = vshll.u32 %v6815_v13, 16 }
  0x5c   :  { %7914 = vmatpush3.bf16.msra.mxu1 %v8379_v32  ;;  %v1467_v41 = vrot.slane %v1466_v15, 4  ;;  %v1458_v57 = vsel %vm8631_vm2, %v1453_v44, %v1457_v24  ;;  %v8386_v24 = vld [vmem:[%s11352_s1 + $0x1a8] sm:$0xff]   ;;  %v6865_v15 = vld [vmem:[%s11353_s0 + $0x38] sm:$0xe]  ;;  %v1917_v44 = vrot.slane %v9122_v53, 5 }
  0x5d   :  { %7915 = vmatprep.subr.bf16.mxu1 %v8381_v46  ;;  %v1495_v5 = vrot.slane %v1494_v25, 4  ;;  %v1521_v50 = vrot.slane %v1519_v30, 5  ;;  %v9243_v25 = vld [vmem:[%s11353_s0 + $0x74] sm:$0x1] }
  0x5e   :  { %7880 = vmatpush3.bf16.msra.mxu0 %v8374_v42  ;;  %v1905_v42 = vrot.slane %v9049_v51, 5  ;;  %v1472_v51 = vsel %vm8631_vm2, %v1467_v41, %v1471_v35  ;;  %v8389_v41 = vld [vmem:[%s11352_s1 + $0x1e0] sm:$0xff]   ;;  %v1918_v47 = vsel %vm8864_vm5, %v6879_v38, %v1917_v44  ;;  %v1581_v44 = vshll.u32 %v9243_v25, 16 }
  0x5f   :  { %7881 = vmatprep.subr.bf16.mxu0 %v8376_v33  ;;  %v6844_v26 = vcombine.low %v1458_v57, %v1472_v51  ;;  %v1522_v63 = vor.u32 %v1521_v50, %v1518_v14  ;;  %v1921_v57 = vrot.slane %v9130_v56, 5  ;;  %v8390_v56 = vld [vmem:[%s11352_s1 + $0x198] sm:$0xff]   ;;  %v1563_v14 = vrot.slane %v1561_v34, 5  ;;  %v6826_v34 = vld [vmem:[%s11353_s0 + $0x94] sm:$0x1] }
  0x60   :  { %7916 = vmatpush3.bf16.msra.mxu1 %v8381_v46  ;;  %v1906_v32 = vsel %vm8864_vm5, %v6876_v54, %v1905_v42  ;;  %v8388_v54 = vld [vmem:[%s11352_s1 + $0x1a0] sm:$0xff]  }
  0x61   :  { %7834 = vmatmul.mubr.bf16.gmra.mxu0 %v6738_v60  ;;  %7965 = vmatprep.subr.bf16.mxu1 %v9077_v22  ;;  %v6907_v46 = vcombine.low %v1902_v45, %v1906_v32  ;;  %v1477_v60 = vshll.u32 %v6803_v49, 16  ;;  %v6880_v45 = vrot.slane %v6864_v37, 9  ;;  %v1500_v32 = vsel %vm8631_vm2, %v1495_v5, %v1499_v27  ;;  %v8392_v27 = vld [vmem:[%s11352_s1 + $0x190] sm:$0xff]  }
  0x62   :  { %7882 = vmatpush3.bf16.msra.mxu0 %v8376_v33  ;;  %v1909_v33 = vrot.slane %v9059_v62, 5  ;;  %7885 = vmatprep.mubr.bf16.mxu0 %v6843_v43  ;;  %v1527_v43 = vrot.slane %v1525_v10, 5  ;;  %v1925_v49 = vrot.slane %v9140_v61, 5  ;;  %v8391_v61 = vld [vmem:[%s11352_s1 + $0x1d8] sm:$0xff]  }
  0x63   :  { %7883 = vmatprep.subr.bf16.mxu0 %v8380_v11  ;;  %7917 = vmatprep.mubr.bf16.mxu1 %v6907_v46  ;;  %v1922_v53 = vsel %vm8864_vm5, %v6880_v45, %v1921_v57  ;;  %v6868_v45 = vld [vmem:[%s11353_s0 + $0x60] sm:$0xe]  ;;  %v6869_v57 = vld [vmem:[%s11353_s0 + $0x68] sm:$0xe] }
  0x64   :  { %v1910_v52 = vsel %vm8864_vm5, %v6877_v36, %v1909_v33  ;;  %v6866_v36 = vld [vmem:[%s11353_s0 + $0x40] sm:$0xe] }
  0x65   :  { %v6908_v62 = vcombine.low %v1910_v52, %v1914_v29  ;;  %v1523_v52 = vrot.slane %v1522_v63, 4  ;;  %v6882_v55 = vrot.slane %v6866_v36, 9  ;;  %v1933_v63 = vrot.slane %v9207_v2, 5 }
  0x66   :  { %7884 = vmatpush3.bf16.msra.mxu0 %v8380_v11  ;;  %v1479_v11 = vrot.slane %v1477_v60, 5  ;;  %v6811_v60 = vld [vmem:[%s11353_s0 + $0x58] sm:$0xf] }
  0x67   :  { %7933 = vmatprep.subr.bf16.mxu0 %v8382_v4  ;;  %7918 = vmatmul.mubr.bf16.vlgmr.msra.gmra.mxu1 %v6908_v62  ;;  %v1528_v62 = vsel %vm8631_vm2, %v1523_v52, %v1527_v43  ;;  %v1530_v58 = vshrl.u32 %v6811_v60, 16  ;;  %v1533_v0 = vshll.u32 %v6811_v60, 16  ;;  %v8395_v52 = vld [vmem:[%s11352_s1 + $0x1c8] sm:$0xff]  }
  0x68   :  { %7966 = vmatpush3.bf16.msra.mxu1 %v9077_v22  ;;  %v1480_v21 = vor.u32 %v1479_v11, %v1476_v8  ;;  %v8387_v22 = vld [vmem:[%s11352_s1 + $0x1e8] sm:$0xff]   ;;  %v1930_v8 = vsel %vm8864_vm5, %v6882_v55, %v1929_v59  ;;  %v1539_v11 = vshll.u32 %v9207_v2, 16  ;;  %v1941_v2 = vrot.slane %v9231_v17, 5 }
  0x69   :  { %7886 = vmatmul.mubr.bf16.vlgmr.msra.gmra.mxu0 %v6844_v26  ;;  %7967 = vmatprep.subr.bf16.mxu1 %v8385_v1  ;;  %v6909_v26 = vcombine.low %v1918_v47, %v1922_v53  ;;  %v1532_v3 = vrot.slane %v1530_v58, 4  ;;  %v1535_v19 = vrot.slane %v1533_v0, 5  ;;  %v6819_v58 = vld [vmem:[%s11353_s0 + $0x78] sm:$0xf] }
  0x6a   :  { %7934 = vmatpush3.bf16.msra.mxu0 %v8382_v4  ;;  %v1507_v4 = vrot.slane %v1505_v20, 5  ;;  %v1481_v35 = vrot.slane %v1480_v21, 4  ;;  %v6817_v21 = vld [vmem:[%s11353_s0 + $0x70] sm:$0xf] }
  0x6b   :  { %7935 = vmatprep.subr.bf16.mxu0 %v8384_v48  ;;  %7921 = vmatprep.mubr.bf16.mxu1 %v6909_v26  ;;  %v1536_v28 = vor.u32 %v1535_v19, %v1532_v3  ;;  %v1572_v37 = vshrl.u32 %v6817_v21, 16  ;;  %v1575_v38 = vshll.u32 %v6817_v21, 16  ;;  %v6885_v26 = vrot.slane %v6869_v57, 9  ;;  %v6823_v19 = vld [vmem:[%s11353_s0 + $0x88] sm:$0xf] }
  0x6c   :  { %v1508_v39 = vor.u32 %v1507_v4, %v1504_v31  ;;  %v1486_v42 = vsel %vm8631_vm2, %v1481_v35, %v1485_v18  ;;  %7968 = vmatpush3.bf16.msra.mxu1 %v8385_v1  ;;  %v6813_v1 = vld [vmem:[%s11353_s0 + $0x60] sm:$0xf]  ;;  %v1541_v31 = vrot.slane %v1539_v11, 5  ;;  %v1558_v4 = vshrl.u32 %v6815_v13, 16  ;;  %v8393_v35 = vld [vmem:[%s11352_s1 + $0x1d0] sm:$0xff]  }
  0x6d   :  { %7969 = vmatprep.subr.bf16.mxu1 %v8387_v22  ;;  %v6845_v46 = vcombine.low %v1486_v42, %v1500_v32  ;;  %v1544_v12 = vshrl.u32 %v6813_v1, 16  ;;  %v1547_v20 = vshll.u32 %v6813_v1, 16  ;;  %v1537_v5 = vrot.slane %v1536_v28, 4  ;;  %v6821_v11 = vld [vmem:[%s11353_s0 + $0x80] sm:$0xf] }
  0x6e   :  { %7936 = vmatpush3.bf16.msra.mxu0 %v8384_v48  ;;  %v1509_v33 = vrot.slane %v1508_v39, 4  ;;  %v6881_v48 = vrot.slane %v6865_v15, 9  ;;  %v1560_v10 = vrot.slane %v1558_v4, 4  ;;  %v6867_v15 = vld [vmem:[%s11353_s0 + $0x58] sm:$0xe]  ;;  %v1574_v42 = vrot.slane %v1572_v37, 4 }
  0x6f   :  { %7937 = vmatprep.subr.bf16.mxu0 %v8386_v24  ;;  %7889 = vmatprep.mubr.bf16.mxu0 %v6845_v46  ;;  %v1546_v23 = vrot.slane %v1544_v12, 4  ;;  %v1549_v30 = vrot.slane %v1547_v20, 5  ;;  %v1577_v43 = vrot.slane %v1575_v38, 5  ;;  %v6883_v36 = vrot.slane %v6867_v15, 9  ;;  %v6870_v46 = vld [vmem:[%s11353_s0 + $0x70] sm:$0xe] }
  0x70   :  { %v1514_v51 = vsel %vm8631_vm2, %v1509_v33, %v1513_v9  ;;  %v1926_v29 = vsel %vm8864_vm5, %v6881_v48, %v1925_v49  ;;  %7970 = vmatpush3.bf16.msra.mxu1 %v8387_v22  ;;  %v1567_v22 = vshll.u32 %v9231_v17, 16  ;;  %v1564_v33 = vor.u32 %v1563_v14, %v1560_v10  ;;  %v9300_v12 = vld [vmem:[%s11353_s0 + $0x84] sm:$0x1]  ;;  %v9310_v20 = vld [vmem:[%s11353_s0 + $0x8c] sm:$0x1] }
  0x71   :  { %7971 = vmatprep.subr.bf16.mxu1 %v8389_v41  ;;  %v6846_v7 = vcombine.low %v1514_v51, %v1528_v62  ;;  %v6910_v18 = vcombine.low %v1926_v29, %v1930_v8  ;;  %v1550_v39 = vor.u32 %v1549_v30, %v1546_v23  ;;  %v1578_v47 = vor.u32 %v1577_v43, %v1574_v42  ;;  %v9292_v8 = vld [vmem:[%s11353_s0 + $0x7c] sm:$0x1] }
  0x72   :  { %7938 = vmatpush3.bf16.msra.mxu0 %v8386_v24  ;;  %v1553_v24 = vshll.u32 %v9220_v6, 16  ;;  %v1569_v50 = vrot.slane %v1567_v22, 5  ;;  %v1583_v48 = vrot.slane %v1581_v44, 5  ;;  %v6884_v49 = vrot.slane %v6868_v45, 9  ;;  %v6871_v44 = vld [vmem:[%s11353_s0 + $0x78] sm:$0xe] }
  0x73   :  { %7939 = vmatprep.subr.bf16.mxu0 %v8388_v54  ;;  %7890 = vmatmul.mubr.bf16.gmra.mxu0 %v6846_v7  ;;  %v1551_v32 = vrot.slane %v1550_v39, 4  ;;  %v1937_v51 = vrot.slane %v9220_v6, 5  ;;  %v1565_v55 = vrot.slane %v1564_v33, 4  ;;  %v1579_v59 = vrot.slane %v1578_v47, 4  ;;  %v9333_v45 = vld [vmem:[%s11352_s1 + $0x238] sm:$0xff]  }
  0x74   :  { %7972 = vmatpush3.bf16.msra.mxu1 %v8389_v41  ;;  %v1555_v9 = vrot.slane %v1553_v24, 5  ;;  %v1542_v41 = vsel %vm8631_vm2, %v1537_v5, %v1541_v31  ;;  %v6886_v1 = vrot.slane %v6870_v46, 9  ;;  %v1945_v6 = vrot.slane %v9243_v25, 5  ;;  %v6825_v24 = vld [vmem:[%s11353_s0 + $0x90] sm:$0xf]  ;;  %v8396_v25 = vld [vmem:[%s11352_s1 + $0x180] sm:$0xff]  }
  0x75   :  { %7922 = vmatmul.mubr.bf16.gmra.mxu1 %v6910_v18  ;;  %7973 = vmatprep.subr.bf16.mxu1 %v8391_v61  ;;  %v1938_v60 = vsel %vm8864_vm5, %v6884_v49, %v1937_v51  ;;  %v1584_v0 = vsel %vm8631_vm2, %v1579_v59, %v1583_v48  ;;  %v1942_v7 = vsel %vm8864_vm5, %v6885_v26, %v1941_v2  ;;  %v1586_v18 = vshrl.u32 %v6819_v58, 16  ;;  %v6872_v33 = vld [vmem:[%s11353_s0 + $0x80] sm:$0xe]  ;;  %v6873_v49 = vld [vmem:[%s11353_s0 + $0x88] sm:$0xe] }
  0x76   :  { %7940 = vmatpush3.bf16.msra.mxu0 %v8388_v54  ;;  %v8394_v54 = vld [vmem:[%s11352_s1 + $0x188] sm:$0xff]   ;;  %v1556_v53 = vsel %vm8631_vm2, %v1551_v32, %v1555_v9  ;;  %v1946_v17 = vsel %vm8864_vm5, %v6886_v1, %v1945_v6  ;;  %v1589_v3 = vshll.u32 %v6819_v58, 16  ;;  %v1600_v31 = vshrl.u32 %v6821_v11, 16 }
  0x77   :  { %7941 = vmatprep.subr.bf16.mxu0 %v8390_v56  ;;  %v6847_v29 = vcombine.low %v1542_v41, %v1556_v53  ;;  %v6912_v21 = vcombine.low %v1942_v7, %v1946_v17  ;;  %v1603_v23 = vshll.u32 %v6821_v11, 16  ;;  %v1588_v4 = vrot.slane %v1586_v18, 4  ;;  %v8398_v17 = vld [vmem:[%s11353_s0 + $0x10] ss:$8 sps:$4 sm:$0xff]  }
  0x78   :  { %7974 = vmatpush3.bf16.msra.mxu1 %v8391_v61  ;;  %v1570_v61 = vsel %vm8631_vm2, %v1565_v55, %v1569_v50  ;;  %v1591_v28 = vrot.slane %v1589_v3, 5  ;;  %v1609_v30 = vshll.u32 %v9300_v12, 16  ;;  %v1614_v22 = vshrl.u32 %v6823_v19, 16  ;;  %v8397_v50 = vld [vmem:[%s11352_s1 + $0x1c0] sm:$0xff]  }
  0x79   :  { %7975 = vmatprep.subr.bf16.mxu1 %v8393_v35  ;;  %7893 = vmatprep.mubr.bf16.mxu0 %v6847_v29  ;;  %v6848_v13 = vcombine.low %v1570_v61, %v1584_v0  ;;  %v1602_v9 = vrot.slane %v1600_v31, 4  ;;  %v1605_v10 = vrot.slane %v1603_v23, 5  ;;  %v1617_v37 = vshll.u32 %v6823_v19, 16  ;;  %v9381_v31 = vld [vmem:[%s11353_s0 + $0x1c] sm:$0x1] }
  0x7a   :  { %7942 = vmatpush3.bf16.msra.mxu0 %v8390_v56  ;;  %v1934_v56 = vsel %vm8864_vm5, %v6883_v36, %v1933_v63  ;;  %v1592_v38 = vor.u32 %v1591_v28, %v1588_v4  ;;  %v1611_v5 = vrot.slane %v1609_v30, 5  ;;  %v1616_v39 = vrot.slane %v1614_v22, 4  ;;  %v9391_v22 = vld [vmem:[%s11353_s0 + $0x24] sm:$0x1] }
  0x7b   :  { %7943 = vmatprep.subr.bf16.mxu0 %v8392_v27  ;;  %v6911_v62 = vcombine.low %v1934_v56, %v1938_v60  ;;  %7894 = vmatmul.mubr.bf16.gmra.mxu0 %v6848_v13  ;;  %v1623_v14 = vshll.u32 %v9310_v20, 16  ;;  %v1606_v15 = vor.u32 %v1605_v10, %v1602_v9  ;;  %v1628_v42 = vshrl.u32 %v6825_v24, 16  ;;  %v6874_v56 = vld [vmem:[%s11353_s0 + $0x90] sm:$0xe] }
  0x7c   :  { %7976 = vmatpush3.bf16.msra.mxu1 %v8393_v35  ;;  %v1631_v43 = vshll.u32 %v6825_v24, 16  ;;  %v1593_v36 = vrot.slane %v1592_v38, 4  ;;  %v1637_v32 = vshll.u32 %v6826_v34, 16  ;;  %v6887_v63 = vrot.slane %v6871_v44, 9 }
  0x7d   :  { %7977 = vmatprep.subr.bf16.mxu1 %v8395_v52  ;;  %7925 = vmatprep.mubr.bf16.mxu1 %v6911_v62  ;;  %v1625_v41 = vrot.slane %v1623_v14, 5  ;;  %v1607_v57 = vrot.slane %v1606_v15, 4  ;;  %v1630_v47 = vrot.slane %v1628_v42, 4  ;;  %v1949_v53 = vrot.slane %v9292_v8, 5 }
  0x7e   :  { %7944 = vmatpush3.bf16.msra.mxu0 %v8392_v27  ;;  %v1595_v27 = vshll.u32 %v9292_v8, 16  ;;  %7926 = vmatmul.mubr.bf16.gmra.mxu1 %v6912_v21  ;;  %v1633_v48 = vrot.slane %v1631_v43, 5  ;;  %v6888_v55 = vrot.slane %v6872_v33, 9  ;;  %v1953_v60 = vrot.slane %v9300_v12, 5  ;;  %v9373_v21 = vld [vmem:[%s11353_s0 + $0x14] sm:$0x1] }
  0x7f   :  { %7945 = vmatprep.subr.bf16.mxu0 %v8394_v54  ;;  %v1612_v26 = vsel %vm8631_vm2, %v1607_v57, %v1611_v5  ;;  %v1950_v61 = vsel %vm8864_vm5, %v6887_v63, %v1949_v53  ;;  %v6889_v62 = vrot.slane %v6873_v49, 9  ;;  %v1957_v1 = vrot.slane %v9310_v20, 5  ;;  %v6971_v20 = vld [vmem:[%s11353_s0 + $0x10] sm:$0xf]  ;;  %v6977_v5 = vld [vmem:[%s11353_s0 + $0x28] sm:$0xf] }
  0x80   :  { %7978 = vmatpush3.bf16.msra.mxu1 %v8395_v52  ;;  %v1597_v35 = vrot.slane %v1595_v27, 5  ;;  %v1639_v52 = vrot.slane %v1637_v32, 5  ;;  %v1634_v59 = vor.u32 %v1633_v48, %v1630_v47  ;;  %v1954_v0 = vsel %vm8864_vm5, %v6888_v55, %v1953_v60  ;;  %v6973_v27 = vld [vmem:[%s11353_s0 + $0x18] sm:$0xf]  ;;  %v8401_v48 = vld [vmem:[%s11352_s1 + $0x230] sm:$0xff]  }
  0x81   :  { %7979 = vmatprep.subr.bf16.mxu1 %v8397_v50  ;;  %v6890_v7 = vrot.slane %v6874_v56, 9  ;;  %v6913_v8 = vcombine.low %v1950_v61, %v1954_v0  ;;  %v1958_v11 = vsel %vm8864_vm5, %v6889_v62, %v1957_v1  ;;  %v1961_v12 = vrot.slane %v6826_v34, 5  ;;  %v6975_v34 = vld [vmem:[%s11353_s0 + $0x20] sm:$0xf]  ;;  %v8402_v53 = vld [vmem:[%s11353_s0 + $0x30] ss:$8 sps:$4 sm:$0xff]  }
  0x82   :  { %7946 = vmatpush3.bf16.msra.mxu0 %v8394_v54  ;;  %v1619_v54 = vrot.slane %v1617_v37, 5  ;;  %v1598_v51 = vsel %vm8631_vm2, %v1593_v36, %v1597_v35  ;;  %v1635_v58 = vrot.slane %v1634_v59, 4  ;;  %v2449_v23 = vshrl.u32 %v6971_v20, 16  ;;  %v8399_v35 = vld [vmem:[%s11353_s0 + $0x20] ss:$8 sps:$4 sm:$0xff]  }
  0x83   :  { %7947 = vmatprep.subr.bf16.mxu0 %v8396_v25  ;;  %v6849_v2 = vcombine.low %v1598_v51, %v1612_v26  ;;  %7929 = vmatprep.mubr.bf16.mxu1 %v6913_v8  ;;  %v1962_v3 = vsel %vm8864_vm5, %v6890_v7, %v1961_v12  ;;  %v2452_v24 = vshll.u32 %v6971_v20, 16  ;;  %v2463_v4 = vshrl.u32 %v6973_v27, 16  ;;  %v8403_v61 = vld [vmem:[%s11353_s0 + $0x40] ss:$8 sps:$4 sm:$0xff]   ;;  %v6979_v1 = vld [vmem:[%s11353_s0 + $0x30] sm:$0xf] }
  0x84   :  { %v1620_v46 = vor.u32 %v1619_v54, %v1616_v39  ;;  %7980 = vmatpush3.bf16.msra.mxu1 %v8397_v50  ;;  %v1640_v13 = vsel %vm8631_vm2, %v1635_v58, %v1639_v52  ;;  %v6914_v19 = vcombine.low %v1958_v11, %v1962_v3  ;;  %v2466_v28 = vshll.u32 %v6973_v27, 16  ;;  %v9402_v50 = vld [vmem:[%s11353_s0 + $0x2c] sm:$0x1]  ;;  %v6981_v58 = vld [vmem:[%s11353_s0 + $0x38] sm:$0xf] }
  0x85   :  { %7897 = vmatprep.mubr.bf16.mxu0 %v6849_v2  ;;  %v2472_v30 = vshll.u32 %v9381_v31, 16  ;;  %v2451_v9 = vrot.slane %v2449_v23, 4  ;;  %v2454_v10 = vrot.slane %v2452_v24, 5  ;;  %v2465_v38 = vrot.slane %v2463_v4, 4  ;;  %v8404_v62 = vld [vmem:[%s11352_s1 + $0x228] sm:$0xff]   ;;  %v8405_v24 = vld [vmem:[%s11352_s1 + $0x220] sm:$0xff]  }
  0x86   :  { %7948 = vmatpush3.bf16.msra.mxu0 %v8396_v25  ;;  %v1621_v29 = vrot.slane %v1620_v46, 4  ;;  %v2458_v25 = vshll.u32 %v9373_v21, 16  ;;  %7930 = vmatmul.mubr.bf16.gmra.mxu1 %v6914_v19  ;;  %v2468_v39 = vrot.slane %v2466_v28, 5  ;;  %v2477_v15 = vshrl.u32 %v6975_v34, 16  ;;  %v9439_v0 = vld [vmem:[%s11353_s0 + $0x3c] sm:$0x1] }
  0x87   :  { %7997 = vmatprep.subr.bf16.mxu0 %v9333_v45  ;;  %v2474_v14 = vrot.slane %v2472_v30, 5  ;;  %v2480_v54 = vshll.u32 %v6975_v34, 16  ;;  %v2455_v42 = vor.u32 %v2454_v10, %v2451_v9  ;;  %v2486_v43 = vshll.u32 %v9391_v22, 16  ;;  %v9451_v23 = vld [vmem:[%s11353_s0 + $0x44] sm:$0x1] }
  0x88   :  { %v1626_v6 = vsel %vm8631_vm2, %v1621_v29, %v1625_v41  ;;  %v2460_v37 = vrot.slane %v2458_v25, 5  ;;  %v2491_v44 = vshrl.u32 %v6977_v5, 16  ;;  %v2494_v36 = vshll.u32 %v6977_v5, 16  ;;  %v6985_v30 = vld [vmem:[%s11353_s0 + $0x48] sm:$0xf] }
  0x89   :  { %v6850_v18 = vcombine.low %v1626_v6, %v1640_v13  ;;  %v2469_v41 = vor.u32 %v2468_v39, %v2465_v38  ;;  %v2479_v32 = vrot.slane %v2477_v15, 4  ;;  %v2482_v33 = vrot.slane %v2480_v54, 5  ;;  %v9462_v10 = vld [vmem:[%s11353_s0 + $0x4c] sm:$0x1]  ;;  %v8408_v54 = vld [vmem:[%s11352_s1 + $0x218] sm:$0xff]  }
  0x8a   :  { %v2500_v63 = vshll.u32 %v9402_v50, 16  ;;  %v2456_v57 = vrot.slane %v2455_v42, 4  ;;  %v2493_v46 = vrot.slane %v2491_v44, 4  ;;  %v2496_v47 = vrot.slane %v2494_v36, 5 }
  0x8b   :  { %7898 = vmatmul.mubr.bf16.gmra.mxu0 %v6850_v18  ;;  %v2470_v49 = vrot.slane %v2469_v41, 4  ;;  %v2483_v51 = vor.u32 %v2482_v33, %v2479_v32  ;;  %v2488_v52 = vrot.slane %v2486_v43, 5  ;;  %v2505_v7 = vshrl.u32 %v6979_v1, 16  ;;  %v6983_v18 = vld [vmem:[%s11353_s0 + $0x40] sm:$0xf] }
  0x8c   :  { %7949 = vmatprep.mubr.bf16.mxu0 %v8398_v17  ;;  %v2461_v55 = vsel %vm8631_vm2, %v2456_v57, %v2460_v37  ;;  %v2497_v56 = vor.u32 %v2496_v47, %v2493_v46  ;;  %v2502_v26 = vrot.slane %v2500_v63, 5  ;;  %v2508_v8 = vshll.u32 %v6979_v1, 16  ;;  %v6989_v1 = vld [vmem:[%s11353_s0 + $0x68] sm:$0xf] }
  0x8d   :  { %v2475_v29 = vsel %vm8631_vm2, %v2470_v49, %v2474_v14  ;;  %v2484_v59 = vrot.slane %v2483_v51, 4  ;;  %v2519_v13 = vshrl.u32 %v6981_v58, 16  ;;  %v2522_v17 = vshll.u32 %v6981_v58, 16 }
  0x8e   :  { %v7019_v60 = vcombine.low %v2461_v55, %v2475_v29  ;;  %v2498_v2 = vrot.slane %v2497_v56, 4  ;;  %v2507_v19 = vrot.slane %v2505_v7, 4  ;;  %v2510_v20 = vrot.slane %v2508_v8, 5  ;;  %v8409_v55 = vld [vmem:[%s11352_s1 + $0x210] sm:$0xff]  }
  0x8f   :  { %v2489_v6 = vsel %vm8631_vm2, %v2484_v59, %v2488_v52  ;;  %v2528_v27 = vshll.u32 %v9439_v0, 16  ;;  %v2521_v4 = vrot.slane %v2519_v13, 4  ;;  %v2524_v28 = vrot.slane %v2522_v17, 5  ;;  %v6991_v17 = vld [vmem:[%s11353_s0 + $0x70] sm:$0xf] }
  0x90   :  { %7981 = vmatprep.mubr.bf16.mxu1 %v7019_v60  ;;  %v2503_v11 = vsel %vm8631_vm2, %v2498_v2, %v2502_v26  ;;  %v2533_v34 = vshrl.u32 %v6983_v18, 16  ;;  %v2536_v37 = vshll.u32 %v6983_v18, 16  ;;  %v2542_v38 = vshll.u32 %v9451_v23, 16  ;;  %v6987_v60 = vld [vmem:[%s11353_s0 + $0x60] sm:$0xf] }
  0x91   :  { %v7020_v3 = vcombine.low %v2489_v6, %v2503_v11  ;;  %v2530_v9 = vrot.slane %v2528_v27, 5  ;;  %v2525_v5 = vor.u32 %v2524_v28, %v2521_v4  ;;  %v2547_v14 = vshrl.u32 %v6985_v30, 16  ;;  %v9491_v2 = vld [vmem:[%s11353_s0 + $0x64] sm:$0x1]  ;;  %v9502_v6 = vld [vmem:[%s11353_s0 + $0x6c] sm:$0x1] }
  0x92   :  { %v2535_v39 = vrot.slane %v2533_v34, 4  ;;  %v2550_v15 = vshll.u32 %v6985_v30, 16  ;;  %v2538_v43 = vrot.slane %v2536_v37, 5  ;;  %v2544_v44 = vrot.slane %v2542_v38, 5  ;;  %v9514_v27 = vld [vmem:[%s11353_s0 + $0x74] sm:$0x1] }
  0x93   :  { %7950 = vmatmul.mubr.bf16.vlgmr.msra.gmra.mxu0 %v8399_v35  ;;  %7982 = vmatmul.mubr.bf16.vlgmr.msra.gmra.mxu1 %v7020_v3  ;;  %v2511_v35 = vor.u32 %v2510_v20, %v2507_v19  ;;  %v2556_v36 = vshll.u32 %v9462_v10, 16  ;;  %v2526_v41 = vrot.slane %v2525_v5, 4  ;;  %v2549_v32 = vrot.slane %v2547_v14, 4  ;;  %v6993_v30 = vld [vmem:[%s11353_s0 + $0x78] sm:$0xf] }
  0x94   :  { %7998 = vmatpush3.bf16.msra.mxu0 %v9333_v45  ;;  %7953 = vmatprep.mubr.bf16.mxu0 %v8402_v53  ;;  %v9429_v45 = vld [vmem:[%s11353_s0 + $0x34] sm:$0x1]  ;;  %v2552_v33 = vrot.slane %v2550_v15, 5  ;;  %v2932_v63 = vrot.slane %v9373_v21, 5  ;;  %v2539_v46 = vor.u32 %v2538_v43, %v2535_v39  ;;  %v2936_v49 = vrot.slane %v9381_v31, 5 }
  0x95   :  { %7999 = vmatprep.subr.bf16.mxu0 %v8401_v48  ;;  %v2514_v12 = vshll.u32 %v9429_v45, 16  ;;  %v2512_v42 = vrot.slane %v2511_v35, 4  ;;  %v2558_v47 = vrot.slane %v2556_v36, 5  ;;  %v2531_v51 = vsel %vm8631_vm2, %v2526_v41, %v2530_v9  ;;  %v8407_v53 = vld [vmem:[%s11353_s0 + $0x70] ss:$8 sps:$4 sm:$0xff]  }
  0x96   :  { %v2553_v52 = vor.u32 %v2552_v33, %v2549_v32  ;;  %v2540_v26 = vrot.slane %v2539_v46, 4  ;;  %v2940_v29 = vrot.slane %v9391_v22, 5  ;;  %v2561_v58 = vshrl.u32 %v6987_v60, 16  ;;  %v9525_v37 = vld [vmem:[%s11353_s0 + $0x7c] sm:$0x1] }
  0x97   :  { %v2516_v25 = vrot.slane %v2514_v12, 5  ;;  %v2564_v7 = vshll.u32 %v6987_v60, 16  ;;  %v2570_v11 = vshll.u32 %v9491_v2, 16  ;;  %v2575_v12 = vshrl.u32 %v6989_v1, 16 }
  0x98   :  { %8000 = vmatpush3.bf16.msra.mxu0 %v8401_v48  ;;  %v8406_v48 = vld [vmem:[%s11353_s0 + $0x60] ss:$8 sps:$4 sm:$0xff]   ;;  %v2554_v59 = vrot.slane %v2553_v52, 4  ;;  %v2578_v13 = vshll.u32 %v6989_v1, 16  ;;  %v2563_v3 = vrot.slane %v2561_v58, 4  ;;  %v2584_v20 = vshll.u32 %v9502_v6, 16 }
  0x99   :  { %8001 = vmatprep.subr.bf16.mxu0 %v8404_v62  ;;  %v2517_v57 = vsel %vm8631_vm2, %v2512_v42, %v2516_v25  ;;  %v2566_v19 = vrot.slane %v2564_v7, 5  ;;  %v2572_v25 = vrot.slane %v2570_v11, 5  ;;  %v2577_v4 = vrot.slane %v2575_v12, 4  ;;  %v8413_v42 = vld [vmem:[%s11352_s1 + $0x200] sm:$0xff]   ;;  %v6997_v12 = vld [vmem:[%s11353_s0 + $0x88] sm:$0xf] }
  0x9a   :  { %v7021_v56 = vcombine.low %v2517_v57, %v2531_v51  ;;  %v2559_v8 = vsel %vm8631_vm2, %v2554_v59, %v2558_v47  ;;  %v2580_v28 = vrot.slane %v2578_v13, 5  ;;  %v2589_v34 = vshrl.u32 %v6991_v17, 16  ;;  %v8410_v52 = vld [vmem:[%s11353_s0 + $0x80] ss:$8 sps:$4 sm:$0xff]   ;;  %v9551_v7 = vld [vmem:[%s11353_s0 + $0x84] sm:$0x1] }
  0x9b   :  { %7954 = vmatmul.mubr.bf16.gmra.mxu0 %v8403_v61  ;;  %v2944_v61 = vrot.slane %v9402_v50, 5  ;;  %v2567_v35 = vor.u32 %v2566_v19, %v2563_v3  ;;  %v2586_v9 = vrot.slane %v2584_v20, 5  ;;  %v2592_v38 = vshll.u32 %v6991_v17, 16  ;;  %v6995_v58 = vld [vmem:[%s11353_s0 + $0x80] sm:$0xf] }
  0x9c   :  { %8002 = vmatpush3.bf16.msra.mxu0 %v8404_v62  ;;  %7957 = vmatprep.mubr.bf16.mxu0 %v8406_v48  ;;  %v2545_v62 = vsel %vm8631_vm2, %v2540_v26, %v2544_v44  ;;  %v2598_v5 = vshll.u32 %v9514_v27, 16  ;;  %v2581_v39 = vor.u32 %v2580_v28, %v2577_v4  ;;  %v2591_v14 = vrot.slane %v2589_v34, 4  ;;  %v8411_v26 = vld [vmem:[%s11353_s0 + $0x90] ss:$8 sps:$4 sm:$0xff]   ;;  %v9562_v13 = vld [vmem:[%s11353_s0 + $0x8c] sm:$0x1] }
  0x9d   :  { %8003 = vmatprep.subr.bf16.mxu0 %v8405_v24  ;;  %7985 = vmatprep.mubr.bf16.mxu1 %v7021_v56  ;;  %v7022_v18 = vcombine.low %v2545_v62, %v2559_v8  ;;  %v2603_v15 = vshrl.u32 %v6993_v30, 16  ;;  %v2568_v43 = vrot.slane %v2567_v35, 4  ;;  %v2594_v44 = vrot.slane %v2592_v38, 5  ;;  %v9574_v35 = vld [vmem:[%s11353_s0 + $0x94] sm:$0x1] }
  0x9e   :  { %v2600_v36 = vrot.slane %v2598_v5, 5  ;;  %v2612_v41 = vshll.u32 %v9525_v37, 16  ;;  %v2582_v32 = vrot.slane %v2581_v39, 4  ;;  %v2948_v46 = vrot.slane %v9429_v45, 5  ;;  %v7001_v39 = vld [vmem:[%s11353_s0 + $0x98] sm:$0xf] }
  0x9f   :  { %7986 = vmatmul.mubr.bf16.gmra.mxu1 %v7022_v18  ;;  %v2605_v33 = vrot.slane %v2603_v15, 4  ;;  %v2573_v47 = vsel %vm8631_vm2, %v2568_v43, %v2572_v25  ;;  %v2595_v48 = vor.u32 %v2594_v44, %v2591_v14  ;;  %v2956_v62 = vrot.slane %v9451_v23, 5  ;;  %v6999_v25 = vld [vmem:[%s11353_s0 + $0x90] sm:$0xf]  ;;  %v9582_v43 = vld [vmem:[%s11353_s0 + $0x9c] sm:$0x1] }
  0xa0   :  { %8004 = vmatpush3.bf16.msra.mxu0 %v8405_v24  ;;  %v8412_v24 = vld [vmem:[%s11352_s1 + $0x208] sm:$0xff]   ;;  %v2614_v51 = vrot.slane %v2612_v41, 5  ;;  %v2960_v8 = vrot.slane %v9462_v10, 5  ;;  %v2617_v17 = vshrl.u32 %v6995_v58, 16  ;;  %v2620_v18 = vshll.u32 %v6995_v58, 16 }
  0xa1   :  { %8005 = vmatprep.subr.bf16.mxu0 %v8408_v54  ;;  %v2596_v60 = vrot.slane %v2595_v48, 4  ;;  %v2626_v19 = vshll.u32 %v9551_v7, 16  ;;  %v2631_v20 = vshrl.u32 %v6997_v12, 16  ;;  %v2640_v34 = vshll.u32 %v9562_v13, 16  ;;  %v7046_v23 = vld [vmem:[%s11353_s0 + $0x78] sm:$0xe] }
  0xa2   :  { %v2619_v28 = vrot.slane %v2617_v17, 4  ;;  %v2645_v14 = vshrl.u32 %v6999_v25, 16  ;;  %v2648_v44 = vshll.u32 %v6999_v25, 16  ;;  %v7037_v17 = vld [vmem:[%s11353_s0 + $0x20] sm:$0xe] }
  0xa3   :  { %7958 = vmatmul.mubr.bf16.gmra.mxu0 %v8407_v53  ;;  %v2952_v53 = vrot.slane %v9439_v0, 5  ;;  %v2601_v11 = vsel %vm8631_vm2, %v2596_v60, %v2600_v36  ;;  %v2633_v38 = vrot.slane %v2631_v20, 4  ;;  %v2654_v36 = vshll.u32 %v9574_v35, 16  ;;  %v7047_v10 = vld [vmem:[%s11353_s0 + $0x80] sm:$0xe] }
  0xa4   :  { %8006 = vmatpush3.bf16.msra.mxu0 %v8408_v54  ;;  %v2606_v54 = vshll.u32 %v6993_v30, 16  ;;  %7961 = vmatprep.mubr.bf16.mxu0 %v8410_v52  ;;  %v2622_v30 = vrot.slane %v2620_v18, 5  ;;  %v2647_v41 = vrot.slane %v2645_v14, 4  ;;  %v7053_v20 = vrot.slane %v7037_v17, 9  ;;  %v7043_v14 = vld [vmem:[%s11353_s0 + $0x60] sm:$0xe] }
  0xa5   :  { %8007 = vmatprep.subr.bf16.mxu0 %v8409_v55  ;;  %v2656_v48 = vrot.slane %v2654_v36, 5 }
  0xa6   :  { %v2608_v57 = vrot.slane %v2606_v54, 5  ;;  %v2623_v15 = vor.u32 %v2622_v30, %v2619_v28  ;;  %v2642_v54 = vrot.slane %v2640_v34, 5  ;;  %v7040_v34 = vld [vmem:[%s11353_s0 + $0x38] sm:$0xe]  ;;  %v2941_v21 = vsel %vm8864_vm5, %v7053_v20, %v2940_v29  ;;  %v7044_v29 = vld [vmem:[%s11353_s0 + $0x68] sm:$0xe] }
  0xa8   :  { %8008 = vmatpush3.bf16.msra.mxu0 %v8409_v55  ;;  %v2587_v55 = vsel %vm8631_vm2, %v2582_v32, %v2586_v9  ;;  %v2609_v56 = vor.u32 %v2608_v57, %v2605_v33  ;;  %v2628_v9 = vrot.slane %v2626_v19, 5  ;;  %v2659_v32 = vshrl.u32 %v7001_v39, 16 }
  0xa9   :  { %8009 = vmatprep.subr.bf16.mxu0 %v8412_v24  ;;  %v7023_v59 = vcombine.low %v2573_v47, %v2587_v55  ;;  %v2662_v33 = vshll.u32 %v7001_v39, 16  ;;  %v2624_v57 = vrot.slane %v2623_v15, 4  ;;  %v2650_v47 = vrot.slane %v2648_v44, 5  ;;  %v7042_v39 = vld [vmem:[%s11353_s0 + $0x48] sm:$0xe] }
  0xaa   :  { %v2610_v1 = vrot.slane %v2609_v56, 4  ;;  %v2661_v55 = vrot.slane %v2659_v32, 4  ;;  %v7059_v32 = vrot.slane %v7043_v14, 9 }
  0xab   :  { %7962 = vmatmul.mubr.bf16.gmra.mxu0 %v8411_v26  ;;  %7989 = vmatprep.mubr.bf16.mxu1 %v7023_v59  ;;  %v2664_v56 = vrot.slane %v2662_v33, 5  ;;  %v7035_v26 = vld [vmem:[%s11353_s0 + $0x10] sm:$0xe]  ;;  %v2964_v59 = vrot.slane %v9491_v2, 5  ;;  %v2629_v60 = vsel %vm8631_vm2, %v2624_v57, %v2628_v9  ;;  %v7038_v2 = vld [vmem:[%s11353_s0 + $0x28] sm:$0xe] }
  0xac   :  { %8010 = vmatpush3.bf16.msra.mxu0 %v8412_v24  ;;  %v2615_v3 = vsel %vm8631_vm2, %v2610_v1, %v2614_v51  ;;  %v2634_v24 = vshll.u32 %v6997_v12, 16  ;;  %v2668_v51 = vshll.u32 %v9582_v43, 16  ;;  %v2651_v1 = vor.u32 %v2650_v47, %v2647_v41  ;;  %v7041_v9 = vld [vmem:[%s11353_s0 + $0x40] sm:$0xe] }
  0xad   :  { %8011 = vmatprep.subr.bf16.mxu0 %v8413_v42  ;;  %v7024_v4 = vcombine.low %v2601_v11, %v2615_v3  ;;  %v7036_v11 = vld [vmem:[%s11353_s0 + $0x18] sm:$0xe]  ;;  %v7051_v12 = vrot.slane %v7035_v26, 9  ;;  %v2665_v3 = vor.u32 %v2664_v56, %v2661_v55  ;;  %v7054_v30 = vrot.slane %v7038_v2, 9 }
  0xae   :  { %v2636_v5 = vrot.slane %v2634_v24, 5  ;;  %v2670_v58 = vrot.slane %v2668_v51, 5  ;;  %v7052_v19 = vrot.slane %v7036_v11, 9  ;;  %v7039_v24 = vld [vmem:[%s11353_s0 + $0x30] sm:$0xe]  ;;  %v7060_v57 = vrot.slane %v7044_v29, 9 }
  0xaf   :  { %7990 = vmatmul.mubr.bf16.gmra.mxu1 %v7024_v4  ;;  %v2652_v4 = vrot.slane %v2651_v1, 4  ;;  %v2933_v28 = vsel %vm8864_vm5, %v7051_v12, %v2932_v63  ;;  %v7055_v63 = vrot.slane %v7039_v24, 9  ;;  %v2945_v22 = vsel %vm8864_vm5, %v7054_v30, %v2944_v61 }
  0xb0   :  { %8012 = vmatpush3.bf16.msra.mxu0 %v8413_v42  ;;  %v2637_v42 = vor.u32 %v2636_v5, %v2633_v38  ;;  %v2666_v38 = vrot.slane %v2665_v3, 4  ;;  %v2937_v5 = vsel %vm8864_vm5, %v7052_v19, %v2936_v49  ;;  %v7056_v49 = vrot.slane %v7040_v34, 9 }
  0xb1   :  { %v2657_v31 = vsel %vm8631_vm2, %v2652_v4, %v2656_v48  ;;  %v7083_v15 = vcombine.low %v2933_v28, %v2937_v5  ;;  %v7084_v44 = vcombine.low %v2941_v21, %v2945_v22  ;;  %v2949_v36 = vsel %vm8864_vm5, %v7055_v63, %v2948_v46  ;;  %v7045_v46 = vld [vmem:[%s11353_s0 + $0x70] sm:$0xe] }
  0xb2   :  { %v2638_v52 = vrot.slane %v2637_v42, 4  ;;  %v7057_v42 = vrot.slane %v7041_v9, 9  ;;  %v2953_v50 = vsel %vm8864_vm5, %v7056_v49, %v2952_v53  ;;  %v7058_v61 = vrot.slane %v7042_v39, 9 }
  0xb3   :  { %8013 = vmatprep.mubr.bf16.mxu0 %v7083_v15  ;;  %v7085_v33 = vcombine.low %v2949_v36, %v2953_v50  ;;  %v2968_v47 = vrot.slane %v9502_v6, 5  ;;  %v2965_v53 = vsel %vm8864_vm5, %v7059_v32, %v2964_v59  ;;  %v7061_v48 = vrot.slane %v7045_v46, 9 }
  0xb4   :  { %v2643_v18 = vsel %vm8631_vm2, %v2638_v52, %v2642_v54  ;;  %v2671_v54 = vsel %vm8631_vm2, %v2666_v38, %v2670_v58  ;;  %8014 = vmatmul.mubr.bf16.vlgmr.msra.gmra.mxu0 %v7084_v44  ;;  %v2957_v45 = vsel %vm8864_vm5, %v7057_v42, %v2956_v62  ;;  %v2961_v0 = vsel %vm8864_vm5, %v7058_v61, %v2960_v8  ;;  %v7048_v62 = vld [vmem:[%s11353_s0 + $0x88] sm:$0xe] }
  0xb5   :  { %v7025_v25 = vcombine.low %v2629_v60, %v2643_v18  ;;  %v7026_v41 = vcombine.low %v2657_v31, %v2671_v54  ;;  %8017 = vmatprep.mubr.bf16.mxu0 %v7085_v33  ;;  %v2969_v6 = vsel %vm8864_vm5, %v7060_v57, %v2968_v47  ;;  %v7086_v8 = vcombine.low %v2957_v45, %v2961_v0 }
  0xb6   :  { %v7087_v51 = vcombine.low %v2965_v53, %v2969_v6  ;;  %v2972_v52 = vrot.slane %v9514_v27, 5  ;;  %v7062_v55 = vrot.slane %v7046_v23, 9  ;;  %v2976_v56 = vrot.slane %v9525_v37, 5  ;;  %v7049_v27 = vld [vmem:[%s11353_s0 + $0x90] sm:$0xe] }
  0xb7   :  { %7993 = vmatprep.mubr.bf16.mxu1 %v7025_v25  ;;  %v7063_v26 = vrot.slane %v7047_v10, 9  ;;  %v2980_v59 = vrot.slane %v9551_v7, 5  ;;  %v7064_v60 = vrot.slane %v7048_v62, 9  ;;  %v2984_v1 = vrot.slane %v9562_v13, 5  ;;  %v7050_v13 = vld [vmem:[%s11353_s0 + $0x98] sm:$0xe] }
  0xb8   :  { %7994 = vmatmul.mubr.bf16.gmra.mxu1 %v7026_v41  ;;  %v2973_v58 = vsel %vm8864_vm5, %v7061_v48, %v2972_v52  ;;  %v2977_v11 = vsel %vm8864_vm5, %v7062_v55, %v2976_v56  ;;  %v7065_v17 = vrot.slane %v7049_v27, 9  ;;  %v2988_v3 = vrot.slane %v9574_v35, 5 }
  0xb9   :  { %v2981_v37 = vsel %vm8864_vm5, %v7063_v26, %v2980_v59  ;;  %v2985_v7 = vsel %vm8864_vm5, %v7064_v60, %v2984_v1  ;;  %v7088_v12 = vcombine.low %v2973_v58, %v2977_v11  ;;  %v7066_v19 = vrot.slane %v7050_v13, 9  ;;  %v8414_v13 = vld [vmem:[%s11354_s3 + $0x38] sm:$0xff]  }
  0xba   :  { %v7089_v18 = vcombine.low %v2981_v37, %v2985_v7  ;;  %v2992_v2 = vrot.slane %v9582_v43, 5  ;;  %v2989_v20 = vsel %vm8864_vm5, %v7065_v17, %v2988_v3  ;;  %8061 = vmatprep.subr.bf16.mxu0 %v8414_v13 }
  0xbb   :  { %8062 = vmatpush3.bf16.msra.mxu0 %v8414_v13  ;;  %v8419_v13 = vld [vmem:[%s11354_s3 + $0x70] sm:$0xff]  }
  0xbc   :  { %8018 = vmatmul.mubr.bf16.gmra.mxu0 %v7086_v8  ;;  %v2993_v24 = vsel %vm8864_vm5, %v7066_v19, %v2992_v2  ;;  %v42_v19 = vld [vmem:[#allocation2 + $0x18] sm:$0x1] }
  0xbd   :  { %8021 = vmatprep.mubr.bf16.mxu0 %v7087_v51  ;;  %v7090_v25 = vcombine.low %v2989_v20, %v2993_v24  ;;  %v11373_v24 = vmov 0 }
  0xbe   :  { %v11374_v24 = vsel %vm9755_vm8, 4294967295, %v11373_v24 }
  0xbf   :  { %11375 = vst [vmem:[#allocation5_spill] sm:$0xff] %v11374_v24 }
  0xc4   :  { %8022 = vmatmul.mubr.bf16.gmra.mxu0 %v7088_v12 }
  0xc5   :  { %8025 = vmatprep.mubr.bf16.mxu0 %v7089_v18 }
  0xcc   :  { %8026 = vmatmul.mubr.bf16.gmra.mxu0 %v7090_v25  ;;  %v104_v25 = vld [vmem:[#allocation2 + $0x1c] sm:$0x1] }
  0xe2   :  { %v7759_v4 = vpop.f32.mrf.mxu0 }
  0xe3   :  { %v7791_v28 = vpop.f32.mrf.mxu1 }
  0xe4   :  { %v763_v30 = vadd.f32 %v7791_v28, %v7759_v4  ;;  %v561_v34 = vpop.f32.mrf.mxu0  ;;  %v43_v4 = vsel %vm9755_vm8, 0, %v42_v19  ;;  %v11376_v28 = vmov 0  ;;  %v54_v19 = vld [vmem:[#allocation2 + $0x38] sm:$0x1] }
  0xe5   :  { %v754_v9 = vpop.f32.mrf.mxu1  ;;  %v11377_v28 = vsel %vm9762_vm10, 4294967295, %v11376_v28  ;;  %44 = vst [vmem:[#allocation2 + $0x18] sm:$0x1] %v43_v4  ;;  %v8512_v4 = vmov 0  }
  0xe6   :  { %v755_v38 = vadd.f32 %v754_v9, %v561_v34  ;;  %v7760_v35 = vpop.f32.mrf.mxu0  ;;  %11378 = vst [vmem:[#allocation6_spill] sm:$0xff] %v11377_v28  ;;  %21 = vst [vmem:[#allocation2] sm:$0xf] %v8512_v4 }
  0xe7   :  { %v7792_v5 = vpop.f32.mrf.mxu1  ;;  %22 = vst [vmem:[#allocation2 + $0x4] sm:$0x1] %v8512_v4  ;;  %23 = vst [vmem:[#allocation2 + $0x50] sm:$0xf] %v8512_v4 }
  0xe8   :  { %v766_v21 = vadd.f32 %v7792_v5, %v7760_v35  ;;  %v9698_v43 = vpop.f32.mrf.mxu0  ;;  %24 = vst [vmem:[#allocation2 + $0x54] sm:$0x1] %v8512_v4  ;;  %26 = vst [vmem:[#allocation2 + $0x48] sm:$0xf] %v8512_v4 }
  0xe9   :  { %v9700_v63 = vpop.f32.mrf.mxu1  ;;  %27 = vst [vmem:[#allocation2 + $0x4c] sm:$0x1] %v8512_v4  ;;  %28 = vst [vmem:[#allocation2 + $0x98] sm:$0xf] %v8512_v4 }
  0xea   :  { %v7763_v14 = vpop.f32.mrf.mxu0  ;;  %29 = vst [vmem:[#allocation2 + $0x9c] sm:$0x1] %v8512_v4  ;;  %v134_v4 = vld [vmem:[#allocation2 + $0x6c] sm:$0x1] }
  0xeb   :  { %v7795_v39 = vpop.f32.mrf.mxu1 }
  0xec   :  { %v779_v31 = vadd.f32 %v7795_v39, %v7763_v14  ;;  %v577_v22 = vpop.f32.mrf.mxu0  ;;  %v8416_v39 = vld [vmem:[%s11354_s3 + $0x28] sm:$0xff]  }
  0xed   :  { %v770_v15 = vpop.f32.mrf.mxu1 }
  0xee   :  { %v9702_v49 = vadd.f32 %v770_v15, %v577_v22  ;;  %v7764_v54 = vpop.f32.mrf.mxu0  ;;  %v36_v15 = vld [vmem:[#allocation2 + $0x8] sm:$0x1]  ;;  %v98_v22 = vld [vmem:[#allocation2 + $0xc] sm:$0x1]  ;;  %v63_v16 = vld [vmem:[#allocation2 + $0x50] sm:$0x1] }
  0xef   :  { %v7796_v29 = vpop.f32.mrf.mxu1  ;;  %v64_v40 = vsel %vm9755_vm8, 0, %v63_v16 }
  0xf0   :  { %v9704_v44 = vadd.f32 %v7796_v29, %v7764_v54  ;;  %v9708_v42 = vpop.f32.mrf.mxu0  ;;  %65 = vst [vmem:[#allocation2 + $0x50] sm:$0x1] %v64_v40 }
  0xf1   :  { %v9706_v36 = vpop.f32.mrf.mxu1 }
  0xf3   :  { %v7799_v41 = vpop.f32.mrf.mxu1 }
  0xf5   :  { %v786_v50 = vpop.f32.mrf.mxu1 }
  0xf6   :  { %v7767_v61 = vpop.f32.mrf.mxu0 }
  0xf7   :  { %v7800_v32 = vpop.f32.mrf.mxu1  ;;  %v9710_v33 = vadd.f32 %v7799_v41, %v7767_v61  ;;  %v99_v41 = vsel %vm9762_vm10, 0, %v98_v22  ;;  %v110_v22 = vld [vmem:[#allocation2 + $0x2c] sm:$0x1] }
  0xf8   :  { %v593_v57 = vpop.f32.mrf.mxu0  ;;  %100 = vst [vmem:[#allocation2 + $0xc] sm:$0x1] %v99_v41 }
  0xf9   :  { %v9712_v47 = vpop.f32.mrf.mxu1  ;;  %v9714_v45 = vadd.f32 %v786_v50, %v593_v57  ;;  %v8417_v50 = vld [vmem:[%s11354_s3 + $0x78] sm:$0xff]  }
  0xfa   :  { %v7768_v0 = vpop.f32.mrf.mxu0  ;;  %8029 = vmatprep.subr.bf16.mxu1 %v8417_v50 }
  0xfb   :  { %v9716_v46 = vadd.f32 %v7800_v32, %v7768_v0  ;;  %v7803_v53 = vpop.f32.mrf.mxu1  ;;  %v107_v32 = vld [vmem:[#allocation2 + $0x24] sm:$0x1]  ;;  %8030 = vmatpush3.bf16.msra.mxu1 %v8417_v50  ;;  %v111_v50 = vsel %vm9762_vm10, 0, %v110_v22 }
  0xfc   :  { %v9718_v6 = vpop.f32.mrf.mxu0  ;;  %8031 = vmatprep.subr.bf16.mxu1 %v8419_v13  ;;  %112 = vst [vmem:[#allocation2 + $0x2c] sm:$0x1] %v111_v50 }
  0xfd   :  { %v802_v23 = vpop.f32.mrf.mxu1 }
  0xff   :  { %v7804_v10 = vpop.f32.mrf.mxu1  ;;  %8032 = vmatpush3.bf16.msra.mxu1 %v8419_v13 }
 0x101   :  { %v7771_v62 = vpop.f32.mrf.mxu0  ;;  %v9720_v8 = vpop.f32.mrf.mxu1 }
 0x102   :  { %v9722_v48 = vadd.f32 %v7803_v53, %v7771_v62  ;;  %v101_v62 = vld [vmem:[#allocation2 + $0x14] sm:$0x1] }
 0x103   :  { %v609_v51 = vpop.f32.mrf.mxu0  ;;  %v9724_v52 = vpop.f32.mrf.mxu1 }
 0x104   :  { %v9726_v55 = vadd.f32 %v802_v23, %v609_v51  ;;  %v108_v23 = vsel %vm9762_vm10, 0, %v107_v32  ;;  %v119_v32 = vld [vmem:[#allocation2 + $0x44] sm:$0x1] }
 0x105   :  { %v7772_v56 = vpop.f32.mrf.mxu0  ;;  %v9728_v26 = vpop.f32.mrf.mxu1  ;;  %109 = vst [vmem:[#allocation2 + $0x24] sm:$0x1] %v108_v23 }
 0x106   :  { %v9730_v59 = vadd.f32 %v7804_v10, %v7772_v56  ;;  %v39_v10 = vld [vmem:[#allocation2 + $0x10] sm:$0x1] }
 0x107   :  { %v9732_v60 = vpop.f32.mrf.mxu0  ;;  %v9734_v1 = vpop.f32.mrf.mxu1 }
 0x109   :  { %v7823_v58 = vpop.f32.mrf.mxu0  ;;  %v9736_v11 = vpop.f32.mrf.mxu1 }
 0x10a   :  { %v9738_v27 = vadd.f32 %v7823_v58, %v763_v30  ;;  %v8415_v30 = vld [vmem:[%s11354_s3 + $0x30] sm:$0xff]   ;;  %v40_v58 = vsel %vm9755_vm8, 0, %v39_v10 }
 0x10b   :  { %v1063_v37 = vpop.f32.mrf.mxu0  ;;  %v9740_v7 = vpop.f32.mrf.mxu1  ;;  %8063 = vmatprep.subr.bf16.mxu0 %v8415_v30  ;;  %41 = vst [vmem:[#allocation2 + $0x10] sm:$0x1] %v40_v58 }
 0x10c   :  { %v9745_v12 = vadd.f32 %v1063_v37, %v755_v38  ;;  %v105_v38 = vsel %vm9762_vm10, 0, %v104_v25  ;;  %8064 = vmatpush3.bf16.msra.mxu0 %v8415_v30  ;;  %v102_v37 = vsel %vm9762_vm10, 0, %v101_v62  ;;  %v116_v25 = vld [vmem:[#allocation2 + $0x3c] sm:$0x1]  ;;  %v51_v62 = vld [vmem:[#allocation2 + $0x30] sm:$0x1] }
 0x10d   :  { %v7824_v17 = vpop.f32.mrf.mxu0  ;;  %v9747_v18 = vpop.f32.mrf.mxu1  ;;  %106 = vst [vmem:[#allocation2 + $0x1c] sm:$0x1] %v105_v38  ;;  %8065 = vmatprep.subr.bf16.mxu0 %v8416_v39  ;;  %103 = vst [vmem:[#allocation2 + $0x14] sm:$0x1] %v102_v37  ;;  %v8420_v38 = vld [vmem:[%s11354_s3 + $0x18] sm:$0xff]   ;;  %v52_v37 = vsel %vm9755_vm8, 0, %v51_v62 }
 0x10e   :  { %v9749_v3 = vadd.f32 %v7824_v17, %v766_v21  ;;  %53 = vst [vmem:[#allocation2 + $0x30] sm:$0x1] %v52_v37  ;;  %v131_v37 = vld [vmem:[#allocation2 + $0x64] sm:$0x1] }
 0x10f   :  { %v9751_v2 = vpop.f32.mrf.mxu0  ;;  %v9753_v20 = vpop.f32.mrf.mxu1 }
 0x110   :  { %8066 = vmatpush3.bf16.msra.mxu0 %v8416_v39 }
 0x111   :  { %v7827_v34 = vpop.f32.mrf.mxu0  ;;  %v9769_v9 = vpop.f32.mrf.mxu1 }
 0x112   :  { %v9773_v35 = vadd.f32 %v7827_v34, %v779_v31  ;;  %v37_v31 = vsel %vm9755_vm8, 0, %v36_v15  ;;  %v55_v34 = vsel %vm9755_vm8, 0, %v54_v19  ;;  %v48_v15 = vld [vmem:[#allocation2 + $0x28] sm:$0x1] }
 0x113   :  { %v1079_v5 = vpop.f32.mrf.mxu0  ;;  %v9775_v21 = vpop.f32.mrf.mxu1  ;;  %38 = vst [vmem:[#allocation2 + $0x8] sm:$0x1] %v37_v31  ;;  %56 = vst [vmem:[#allocation2 + $0x38] sm:$0x1] %v55_v34  ;;  %v49_v41 = vsel %vm9755_vm8, 0, %v48_v15 }
 0x114   :  { %v9781_v14 = vadd.f32 %v1079_v5, %v9702_v49  ;;  %v45_v49 = vld [vmem:[#allocation2 + $0x20] sm:$0x1]  ;;  %50 = vst [vmem:[#allocation2 + $0x28] sm:$0x1] %v49_v41 }
 0x115   :  { %v7828_v29 = vpop.f32.mrf.mxu0  ;;  %v9783_v54 = vpop.f32.mrf.mxu1  ;;  %v46_v53 = vsel %vm9755_vm8, 0, %v45_v49  ;;  %v57_v49 = vld [vmem:[#allocation2 + $0x40] sm:$0x1] }
 0x116   :  { %v9793_v61 = vadd.f32 %v7828_v29, %v9704_v44  ;;  %v8418_v44 = vld [vmem:[%s11354_s3 + $0x20] sm:$0xff]   ;;  %47 = vst [vmem:[#allocation2 + $0x20] sm:$0x1] %v46_v53  ;;  %v8421_v29 = vld [vmem:[%s11354_s3 + $0x68] sm:$0xff]   ;;  %v58_v23 = vsel %vm9755_vm8, 0, %v57_v49 }
 0x117   :  { %v9795_v57 = vpop.f32.mrf.mxu0  ;;  %v9797_v0 = vpop.f32.mrf.mxu1  ;;  %8067 = vmatprep.subr.bf16.mxu0 %v8418_v44  ;;  %8033 = vmatprep.subr.bf16.mxu1 %v8421_v29  ;;  %59 = vst [vmem:[#allocation2 + $0x40] sm:$0x1] %v58_v23 }
 0x118   :  { %8068 = vmatpush3.bf16.msra.mxu0 %v8418_v44  ;;  %v120_v44 = vsel %vm9762_vm10, 0, %v119_v32  ;;  %8034 = vmatpush3.bf16.msra.mxu1 %v8421_v29  ;;  %v66_v29 = vld [vmem:[#allocation2 + $0x58] sm:$0x1] }
 0x119   :  { %v7831_v51 = vpop.f32.mrf.mxu0  ;;  %v9806_v56 = vpop.f32.mrf.mxu1  ;;  %8069 = vmatprep.subr.bf16.mxu0 %v8420_v38  ;;  %121 = vst [vmem:[#allocation2 + $0x44] sm:$0x1] %v120_v44  ;;  %v67_v50 = vsel %vm9755_vm8, 0, %v66_v29  ;;  %v8424_v44 = vld [vmem:[%s11354_s3 + $0x8] sm:$0xff]  }
 0x11a   :  { %v9816_v17 = vadd.f32 %v7831_v51, %v9710_v33  ;;  %v117_v33 = vsel %vm9762_vm10, 0, %v116_v25  ;;  %v8422_v51 = vld [vmem:[%s11354_s3 + $0x10] sm:$0xff]   ;;  %v72_v25 = vld [vmem:[#allocation2 + $0x68] sm:$0x1]  ;;  %68 = vst [vmem:[#allocation2 + $0x58] sm:$0x1] %v67_v50 }
 0x11b   :  { %v1095_v30 = vpop.f32.mrf.mxu0  ;;  %v7867_v39 = vpop.f32.mrf.mxu1  ;;  %118 = vst [vmem:[#allocation2 + $0x3c] sm:$0x1] %v117_v33  ;;  %v73_v33 = vsel %vm9755_vm8, 0, %v72_v25  ;;  %v84_v25 = vld [vmem:[#allocation2 + $0x88] sm:$0x1] }
 0x11c   :  { %v9826_v5 = vadd.f32 %v1095_v30, %v9714_v45  ;;  %8070 = vmatpush3.bf16.msra.mxu0 %v8420_v38  ;;  %v8423_v30 = vld [vmem:[%s11354_s3 + $0x60] sm:$0xff]   ;;  %v135_v38 = vsel %vm9762_vm10, 0, %v134_v4  ;;  %74 = vst [vmem:[#allocation2 + $0x68] sm:$0x1] %v73_v33  ;;  %v146_v4 = vld [vmem:[#allocation2 + $0x8c] sm:$0x1] }
 0x11d   :  { %v7832_v31 = vpop.f32.mrf.mxu0  ;;  %v1354_v10 = vpop.f32.mrf.mxu1  ;;  %8071 = vmatprep.subr.bf16.mxu0 %v8422_v51  ;;  %136 = vst [vmem:[#allocation2 + $0x6c] sm:$0x1] %v135_v38  ;;  %8035 = vmatprep.subr.bf16.mxu1 %v8423_v30  ;;  %v85_v33 = vsel %vm9755_vm8, 0, %v84_v25  ;;  %v147_v38 = vsel %vm9762_vm10, 0, %v146_v4  ;;  %v95_v4 = vld [vmem:[#allocation2 + $0x4] sm:$0x1] }
 0x11e   :  { %v9836_v45 = vadd.f32 %v7832_v31, %v9716_v46  ;;  %v113_v46 = vld [vmem:[#allocation2 + $0x34] sm:$0x1]  ;;  %v128_v31 = vld [vmem:[#allocation2 + $0x5c] sm:$0x1]  ;;  %8036 = vmatpush3.bf16.msra.mxu1 %v8423_v30  ;;  %86 = vst [vmem:[#allocation2 + $0x88] sm:$0x1] %v85_v33 }
 0x11f   :  { %v9838_v53 = vpop.f32.mrf.mxu0  ;;  %v114_v13 = vsel %vm9762_vm10, 0, %v113_v46  ;;  %v7868_v22 = vpop.f32.mrf.mxu1  ;;  %v129_v49 = vsel %vm9762_vm10, 0, %v128_v31  ;;  %v8425_v30 = vld [vmem:[%s11354_s3 + $0x58] sm:$0xff]   ;;  %148 = vst [vmem:[#allocation2 + $0x8c] sm:$0x1] %v147_v38  ;;  %v96_v33 = vsel %vm9762_vm10, 0, %v95_v4 }
 0x120   :  { %115 = vst [vmem:[#allocation2 + $0x34] sm:$0x1] %v114_v13  ;;  %8072 = vmatpush3.bf16.msra.mxu0 %v8422_v51  ;;  %130 = vst [vmem:[#allocation2 + $0x5c] sm:$0x1] %v129_v49  ;;  %8037 = vmatprep.subr.bf16.mxu1 %v8425_v30  ;;  %v33_v31 = vld [vmem:[#allocation2] sm:$0x1] }
 0x121   :  { %v7835_v58 = vpop.f32.mrf.mxu0  ;;  %8073 = vmatprep.subr.bf16.mxu0 %v8424_v44  ;;  %v34_v50 = vsel %vm9755_vm8, 0, %v33_v31  ;;  %v78_v49 = vld [vmem:[#allocation2 + $0x78] sm:$0x1]  ;;  %97 = vst [vmem:[#allocation2 + $0x4] sm:$0x1] %v96_v33  ;;  %v8434_v33 = vld [vmem:[%s11354_s3 + $0x40] sm:$0xff]  }
 0x122   :  { %v1140_v19 = vadd.f32 %v7835_v58, %v9722_v48  ;;  %8038 = vmatpush3.bf16.msra.mxu1 %v8425_v30  ;;  %35 = vst [vmem:[#allocation2] sm:$0x1] %v34_v50 }
 0x123   :  { %v1111_v34 = vpop.f32.mrf.mxu0 }
 0x124   :  { %v1138_v15 = vadd.f32 %v1111_v34, %v9726_v55  ;;  %v9860_v48 = vadd.f32 %v7867_v39, %v1140_v19  ;;  %v75_v55 = vld [vmem:[#allocation2 + $0x70] sm:$0x1]  ;;  %v137_v39 = vld [vmem:[#allocation2 + $0x74] sm:$0x1]  ;;  %v132_v19 = vsel %vm9762_vm10, 0, %v131_v37  ;;  %8074 = vmatpush3.bf16.msra.mxu0 %v8424_v44 }
 0x125   :  { %v7836_v41 = vpop.f32.mrf.mxu0  ;;  %v76_v46 = vsel %vm9755_vm8, 0, %v75_v55  ;;  %v138_v51 = vsel %vm9762_vm10, 0, %v137_v39  ;;  %133 = vst [vmem:[#allocation2 + $0x64] sm:$0x1] %v132_v19  ;;  %v140_v55 = vld [vmem:[#allocation2 + $0x7c] sm:$0x1] }
 0x126   :  { %v1141_v32 = vadd.f32 %v7836_v41, %v9730_v59  ;;  %v9867_v23 = vadd.f32 %v1354_v10, %v1138_v15  ;;  %v9880_v59 = vpop.f32.mrf.mxu1  ;;  %77 = vst [vmem:[#allocation2 + $0x70] sm:$0x1] %v76_v46  ;;  %139 = vst [vmem:[#allocation2 + $0x74] sm:$0x1] %v138_v51  ;;  %v69_v10 = vld [vmem:[#allocation2 + $0x60] sm:$0x1] }
 0x127   :  { %v9872_v62 = vpop.f32.mrf.mxu0  ;;  %v70_v13 = vsel %vm9755_vm8, 0, %v69_v10  ;;  %v141_v44 = vsel %vm9762_vm10, 0, %v140_v55  ;;  %v8428_v46 = vld [vmem:[%s11354_s3 + $0x50] sm:$0xff]  }
 0x128   :  { %v9878_v58 = vadd.f32 %v7868_v22, %v1141_v32  ;;  %71 = vst [vmem:[#allocation2 + $0x60] sm:$0x1] %v70_v13  ;;  %v9895_v15 = vpop.f32.mrf.mxu1  ;;  %v8426_v22 = vld [vmem:[%s11354_s3] sm:$0xff]   ;;  %v79_v32 = vsel %vm9755_vm8, 0, %v78_v49  ;;  %142 = vst [vmem:[#allocation2 + $0x7c] sm:$0x1] %v141_v44  ;;  %8039 = vmatprep.subr.bf16.mxu1 %v8428_v46 }
 0x129   :  { %v9889_v34 = vpop.f32.mrf.mxu0  ;;  %8075 = vmatprep.subr.bf16.mxu0 %v8426_v22  ;;  %80 = vst [vmem:[#allocation2 + $0x78] sm:$0x1] %v79_v32  ;;  %v87_v10 = vld [vmem:[#allocation2 + $0x90] sm:$0x1]  ;;  %v149_v37 = vld [vmem:[#allocation2 + $0x94] sm:$0x1]  ;;  %8040 = vmatpush3.bf16.msra.mxu1 %v8428_v46 }
 0x12a   :  { %v9902_v41 = vpop.f32.mrf.mxu1  ;;  %8076 = vmatpush3.bf16.msra.mxu0 %v8426_v22  ;;  %v88_v13 = vsel %vm9755_vm8, 0, %v87_v10  ;;  %v150_v19 = vsel %vm9762_vm10, 0, %v149_v37  ;;  %v81_v22 = vld [vmem:[#allocation2 + $0x80] sm:$0x1]  ;;  %v143_v49 = vld [vmem:[#allocation2 + $0x84] sm:$0x1] }
 0x12b   :  { %v9900_v29 = vpop.f32.mrf.mxu0  ;;  %89 = vst [vmem:[#allocation2 + $0x90] sm:$0x1] %v88_v13  ;;  %151 = vst [vmem:[#allocation2 + $0x94] sm:$0x1] %v150_v19  ;;  %v82_v50 = vsel %vm9755_vm8, 0, %v81_v22  ;;  %v144_v55 = vsel %vm9762_vm10, 0, %v143_v49 }
 0x12c   :  { %v9915_v51 = vpop.f32.mrf.mxu1  ;;  %83 = vst [vmem:[#allocation2 + $0x80] sm:$0x1] %v82_v50  ;;  %145 = vst [vmem:[#allocation2 + $0x84] sm:$0x1] %v144_v55  ;;  %v8430_v37 = vld [vmem:[%s11354_s3 + $0xf8] sm:$0xff]   ;;  %v8431_v13 = vld [vmem:[%s11354_s3 + $0x48] sm:$0xff]  }
 0x12d   :  { %v9908_v39 = vpop.f32.mrf.mxu0  ;;  %8125 = vmatprep.subr.bf16.mxu0 %v8430_v37  ;;  %8041 = vmatprep.subr.bf16.mxu1 %v8431_v13  ;;  %v8437_v37 = vld [vmem:[%s11354_s3 + $0xb8] sm:$0xff]  }
 0x12e   :  { %v9923_v30 = vpop.f32.mrf.mxu1  ;;  %8042 = vmatpush3.bf16.msra.mxu1 %v8431_v13 }
 0x12f   :  { %v9921_v25 = vpop.f32.mrf.mxu0  ;;  %8043 = vmatprep.subr.bf16.mxu1 %v8434_v33 }
 0x132   :  { %8044 = vmatpush3.bf16.msra.mxu1 %v8434_v33 }
 0x133   :  { %v9927_v38 = vpop.f32.mrf.mxu0  ;;  %8093 = vmatprep.subr.bf16.mxu1 %v8437_v37 }
 0x135   :  { %v9929_v31 = vpop.f32.mrf.mxu1  ;;  %v9933_v32 = vpop.f32.mrf.mxu0 }
 0x137   :  { %v9937_v44 = vpop.f32.mrf.mxu1  ;;  %v9939_v46 = vpop.f32.mrf.mxu0 }
 0x138   :  { %11379 = vst [vmem:[#allocation7_spill] sm:$0xff] %v9937_v44 }
 0x139   :  { %v9941_v10 = vpop.f32.mrf.mxu1  ;;  %v9949_v19 = vpop.f32.mrf.mxu0 }
 0x13a   :  { %11380 = vst [vmem:[#allocation8_spill] sm:$0xff] %v9941_v10 }
 0x13b   :  { %v9951_v4 = vpop.f32.mrf.mxu1  ;;  %v9956_v22 = vpop.f32.mrf.mxu0 }
 0x13c   :  { %11381 = vst [vmem:[#allocation9_spill] sm:$0xff] %v9951_v4  ;;  %v125_v4 = vld [vmem:[#allocation2 + $0x54] sm:$0x1] }
 0x13d   :  { %v9960_v49 = vpop.f32.mrf.mxu0  ;;  %v126_v33 = vsel %vm9762_vm10, 0, %v125_v4 }
 0x13e   :  { %v9958_v50 = vpop.f32.mrf.mxu1  ;;  %11383 = vst [vmem:[#allocation11_spill] sm:$0xff] %v9960_v49  ;;  %127 = vst [vmem:[#allocation2 + $0x54] sm:$0x1] %v126_v33 }
 0x13f   :  { %11382 = vst [vmem:[#allocation10_spill] sm:$0xff] %v9958_v50  ;;  %v9967_v13 = vpop.f32.mrf.mxu0 }
 0x140   :  { %v9962_v55 = vpop.f32.mrf.mxu1 }
 0x141   :  { %11384 = vst [vmem:[#allocation12_spill] sm:$0xff] %v9962_v55  ;;  %v9975_v55 = vpop.f32.mrf.mxu0 }
 0x142   :  { %v9971_v10 = vpop.f32.mrf.mxu1 }
 0x143   :  { %11385 = vst [vmem:[#allocation13_spill] sm:$0xff] %v9971_v10 }
 0x144   :  { %v9977_v50 = vpop.f32.mrf.mxu1 }
 0x145   :  { %11386 = vst [vmem:[#allocation14_spill] sm:$0xff] %v9977_v50 }
 0x146   :  { %v9982_v37 = vpop.f32.mrf.mxu1 }
 0x147   :  { %11388 = vst [vmem:[#allocation16_spill] sm:$0xff] %v9982_v37 }
 0x148   :  { %v9987_v10 = vpop.f32.mrf.mxu1 }
 0x149   :  { %11390 = vst [vmem:[#allocation18_spill] sm:$0xff] %v9987_v10 }
 0x14a   :  { %v9994_v28 = vpop.f32.mrf.mxu1 }
 0x14b   :  { %v7899_v44 = vpop.f32.mrf.mxu0  ;;  %11392 = vst [vmem:[#allocation20_spill] sm:$0xff] %v9994_v28 }
 0x14c   :  { %v9980_v49 = vadd.f32 %v7899_v44, %v9860_v48  ;;  %v10000_v44 = vpop.f32.mrf.mxu1 }
 0x14d   :  { %v1820_v24 = vpop.f32.mrf.mxu0  ;;  %11393 = vst [vmem:[#allocation21_spill] sm:$0xff] %v10000_v44 }
 0x14e   :  { %11387 = vst [vmem:[#allocation15_spill] sm:$0xff] %v9980_v49  ;;  %v9985_v16 = vadd.f32 %v1820_v24, %v9867_v23 }
 0x14f   :  { %v7900_v40 = vpop.f32.mrf.mxu0 }
 0x150   :  { %11389 = vst [vmem:[#allocation17_spill] sm:$0xff] %v9985_v16  ;;  %v9990_v4 = vadd.f32 %v7900_v40, %v9878_v58 }
 0x151   :  { %v9992_v33 = vpop.f32.mrf.mxu0 }
 0x152   :  { %11391 = vst [vmem:[#allocation19_spill] sm:$0xff] %v9990_v4 }
 0x153   :  { %v9996_v50 = vpop.f32.mrf.mxu0  ;;  %v10006_v23 = vpop.f32.mrf.mxu1 }
 0x154   :  { %11396 = vst [vmem:[#allocation24_spill] sm:$0xff] %v10006_v23 }
 0x155   :  { %v9998_v48 = vpop.f32.mrf.mxu0  ;;  %v10010_v58 = vpop.f32.mrf.mxu1 }
 0x156   :  { %11398 = vst [vmem:[#allocation26_spill] sm:$0xff] %v10010_v58  ;;  %v758_v58 = vadd.f32 %v9700_v63, %v9698_v43  ;;  %v790_v43 = vadd.f32 %v9712_v47, %v9718_v6  ;;  %v806_v63 = vadd.f32 %v9720_v8, %v9732_v60  ;;  %v1375_v8 = vadd.f32 %v9740_v7, %v9773_v35 }
 0x157   :  { %v10002_v37 = vpop.f32.mrf.mxu0  ;;  %v10014_v4 = vpop.f32.mrf.mxu1  ;;  %v1379_v7 = vadd.f32 %v9775_v21, %v9816_v17 }
 0x158   :  { %11394 = vst [vmem:[#allocation22_spill] sm:$0xff] %v10002_v37  ;;  %11400 = vst [vmem:[#allocation28_spill] sm:$0xff] %v10014_v4  ;;  %v1139_v60 = vadd.f32 %v9872_v62, %v806_v63  ;;  %v1380_v62 = vadd.f32 %v9797_v0, %v9836_v45  ;;  %v1841_v17 = vadd.f32 %v9927_v38, %v1375_v8  ;;  %v10103_v38 = vld [vmem:[#allocation2 + $0x54] sm:$0x1]  ;;  %v11412_v63 = vld [vmem:[#allocation7_spill] sm:$0xff] }
 0x159   :  { %v10004_v24 = vpop.f32.mrf.mxu0  ;;  %v10020_v49 = vpop.f32.mrf.mxu1 }
 0x15a   :  { %11395 = vst [vmem:[#allocation23_spill] sm:$0xff] %v10004_v24  ;;  %11403 = vst [vmem:[#allocation31_spill] sm:$0xff] %v10020_v49  ;;  %v10026_v24 = vld [vmem:[#allocation2] sm:$0xf]  ;;  %v1382_v21 = vadd.f32 %v9880_v59, %v1139_v60 }
 0x15b   :  { %v10008_v10 = vpop.f32.mrf.mxu0  ;;  %11406 = vst [vmem:[#allocation34_spill] sm:$0xff] %v10026_v24 }
 0x15c   :  { %11397 = vst [vmem:[#allocation25_spill] sm:$0xff] %v10008_v10 }
 0x15d   :  { %v10012_v40 = vpop.f32.mrf.mxu0 }
 0x15e   :  { %11399 = vst [vmem:[#allocation27_spill] sm:$0xff] %v10012_v40 }
 0x15f   :  { %v10016_v28 = vpop.f32.mrf.mxu0  ;;  %v10028_v23 = vpop.f32.mrf.mxu1 }
 0x160   :  { %11401 = vst [vmem:[#allocation29_spill] sm:$0xff] %v10016_v28  ;;  %11407 = vst [vmem:[#allocation35_spill] sm:$0xff] %v10028_v23  ;;  %v3599_v28 = vshrl.u32 %v10026_v24, 16  ;;  %v10045_v23 = vld [vmem:[#allocation2 + $0x50] sm:$0xf] }
 0x161   :  { %v10018_v16 = vpop.f32.mrf.mxu0  ;;  %v10034_v4 = vpop.f32.mrf.mxu1  ;;  %v3711_v47 = vshrl.u32 %v10045_v23, 16  ;;  %v3714_v6 = vshll.u32 %v10045_v23, 16 }
 0x162   :  { %11402 = vst [vmem:[#allocation30_spill] sm:$0xff] %v10018_v16  ;;  %11408 = vst [vmem:[#allocation36_spill] sm:$0xff] %v10034_v4  ;;  %v3602_v16 = vshll.u32 %v10026_v24, 16  ;;  %v1371_v24 = vadd.f32 %v9724_v52, %v9738_v27  ;;  %v1373_v52 = vadd.f32 %v9747_v18, %v9781_v14 }
 0x163   :  { %v10022_v44 = vpop.f32.mrf.mxu0  ;;  %v10043_v10 = vpop.f32.mrf.mxu1 }
 0x164   :  { %11404 = vst [vmem:[#allocation32_spill] sm:$0xff] %v10022_v44  ;;  %v774_v44 = vadd.f32 %v9706_v36, %v9708_v42  ;;  %11410 = vst [vmem:[#allocation38_spill] sm:$0xff] %v10043_v10  ;;  %v1369_v36 = vadd.f32 %v9728_v26, %v9745_v12  ;;  %v3601_v42 = vrot.slane %v3599_v28, 4  ;;  %v1135_v26 = vadd.f32 %v9838_v53, %v790_v43  ;;  %v3582_v28 = vld [vmem:[#allocation2 + $0x4] sm:$0x1] }
 0x165   :  { %v10024_v37 = vpop.f32.mrf.mxu0  ;;  %v10069_v27 = vpop.f32.mrf.mxu1  ;;  %v1837_v12 = vadd.f32 %v9889_v34, %v1371_v24  ;;  %v3608_v14 = vshll.u32 %v3582_v28, 16  ;;  %v4259_v43 = vrot.slane %v3582_v28, 5  ;;  %v11418_v28 = vld [vmem:[#allocation22_spill] sm:$0xff] }
 0x166   :  { %11405 = vst [vmem:[#allocation33_spill] sm:$0xff] %v10024_v37  ;;  %v1127_v37 = vadd.f32 %v9751_v2, %v758_v58  ;;  %v1131_v4 = vadd.f32 %v9795_v57, %v774_v44  ;;  %v3604_v2 = vrot.slane %v3602_v16, 5  ;;  %v1372_v58 = vadd.f32 %v9734_v1, %v9749_v3 }
 0x167   :  { %v10032_v40 = vpop.f32.mrf.mxu0  ;;  %v1376_v1 = vadd.f32 %v9753_v20, %v9793_v61  ;;  %v1835_v3 = vadd.f32 %v9900_v29, %v1369_v36  ;;  %v1377_v57 = vadd.f32 %v9783_v54, %v9826_v5  ;;  %v3716_v61 = vrot.slane %v3714_v6, 5 }
 0x168   :  { %v1838_v18 = vadd.f32 %v9908_v39, %v1372_v58  ;;  %v3605_v35 = vor.u32 %v3604_v2, %v3601_v42  ;;  %v1378_v34 = vadd.f32 %v9806_v56, %v1135_v26  ;;  %v2159_v39 = vadd.f32 %v9895_v15, %v1837_v12  ;;  %v11413_v42 = vld [vmem:[#allocation8_spill] sm:$0xff]  ;;  %v11414_v58 = vld [vmem:[#allocation9_spill] sm:$0xff]  ;;  %v11416_v26 = vld [vmem:[#allocation10_spill] sm:$0xff] }
 0x169   :  { %v10041_v49 = vpop.f32.mrf.mxu0  ;;  %v2157_v54 = vadd.f32 %v9902_v41, %v1835_v3  ;;  %v1839_v5 = vadd.f32 %v9933_v32, %v1373_v52  ;;  %v10101_v59 = vrot.slane %v3608_v14, 5  ;;  %v1845_v41 = vadd.f32 %v9956_v22, %v1379_v7  ;;  %v11419_v7 = vld [vmem:[#allocation23_spill] sm:$0xff] }
 0x16a   :  { %11409 = vst [vmem:[#allocation37_spill] sm:$0xff] %v10041_v49  ;;  %v1370_v49 = vadd.f32 %v9736_v11, %v1127_v37  ;;  %v1374_v11 = vadd.f32 %v9769_v9, %v1131_v4  ;;  %v3713_v9 = vrot.slane %v3711_v47, 4  ;;  %v2160_v37 = vadd.f32 %v9915_v51, %v1838_v18 }
 0x16b   :  { %v10059_v10 = vpop.f32.mrf.mxu0  ;;  %v10099_v45 = vrot.slane %v3605_v35, 4  ;;  %v3720_v16 = vshll.u32 %v10103_v38, 16  ;;  %v2163_v51 = vadd.f32 %v9929_v31, %v1841_v17  ;;  %v2161_v36 = vadd.f32 %v11412_v63, %v1839_v5  ;;  %v11426_v17 = vld [vmem:[#allocation18_spill] sm:$0xff]  ;;  %v11428_v5 = vld [vmem:[#allocation20_spill] sm:$0xff]  ;;  %v11434_v63 = vld [vmem:[#allocation29_spill] sm:$0xff] }
 0x16c   :  { %v1836_v53 = vadd.f32 %v9921_v25, %v1370_v49  ;;  %v1842_v25 = vadd.f32 %v9939_v46, %v1376_v1  ;;  %v4209_v49 = vld [vmem:[#allocation2] sm:$0xe]  ;;  %v1840_v0 = vadd.f32 %v9949_v19, %v1374_v11  ;;  %v3717_v46 = vor.u32 %v3716_v61, %v3713_v9  ;;  %v11422_v9 = vld [vmem:[#allocation14_spill] sm:$0xff] }
 0x16d   :  { %v10082_v20 = vpop.f32.mrf.mxu0  ;;  %v11411_v19 = vld [vmem:[#allocation11_spill] sm:$0xff]  ;;  %v7164_v24 = vrot.slane %v4209_v49, 9  ;;  %v1844_v22 = vadd.f32 %v9975_v55, %v1378_v34  ;;  %v1848_v6 = vadd.f32 %v9992_v33, %v1382_v21  ;;  %v2402_v31 = vadd.f32 %v9996_v50, %v2159_v39  ;;  %v11417_v55 = vld [vmem:[#allocation12_spill] sm:$0xff]  ;;  %v11425_v21 = vld [vmem:[#allocation17_spill] sm:$0xff] }
 0x16e   :  { %v2158_v15 = vadd.f32 %v9923_v30, %v1836_v53  ;;  %v1843_v4 = vadd.f32 %v11411_v19, %v1377_v57  ;;  %v2164_v2 = vadd.f32 %v11413_v42, %v1842_v25  ;;  %v1846_v30 = vadd.f32 %v9967_v13, %v1380_v62  ;;  %v11421_v57 = vld [vmem:[#allocation13_spill] sm:$0xff]  ;;  %v11423_v61 = vld [vmem:[#allocation15_spill] sm:$0xff]  ;;  %v11424_v62 = vld [vmem:[#allocation16_spill] sm:$0xff] }
 0x16f   :  { %v10089_v29 = vpop.f32.mrf.mxu1  ;;  %v10107_v32 = vpop.f32.mrf.mxu0  ;;  %v2162_v47 = vadd.f32 %v11414_v58, %v1840_v0  ;;  %v3611_v52 = vsel %vm8631_vm2, %v10099_v45, %v10101_v59  ;;  %v2167_v60 = vadd.f32 %v11416_v26, %v1845_v41  ;;  %v2400_v1 = vadd.f32 %v9998_v48, %v2157_v54  ;;  %v11427_v54 = vld [vmem:[#allocation19_spill] sm:$0xff]  ;;  %v11429_v49 = vld [vmem:[#allocation21_spill] sm:$0xff]  ;;  %v11430_v0 = vld [vmem:[#allocation24_spill] sm:$0xff] }
 0x170   :  { %v10127_v12 = vrot.slane %v3717_v46, 4  ;;  %v10129_v13 = vrot.slane %v3720_v16, 5  ;;  %v2165_v3 = vadd.f32 %v11417_v55, %v1843_v4  ;;  %v2403_v33 = vadd.f32 %v11418_v28, %v2160_v37  ;;  %v11431_v41 = vld [vmem:[#allocation25_spill] sm:$0xff]  ;;  %v11432_v19 = vld [vmem:[#allocation26_spill] sm:$0xff] }
 0x171   :  { %v10097_v56 = vpop.f32.mrf.mxu1  ;;  %v2388_v11 = vpop.f32.mrf.mxu0  ;;  %v2401_v50 = vadd.f32 %v11419_v7, %v2158_v15  ;;  %v10136_v14 = vsel %vm8864_vm5, %v7164_v24, %v4259_v43  ;;  %v2168_v53 = vadd.f32 %v11421_v57, %v1846_v30  ;;  %v2166_v48 = vadd.f32 %v11422_v9, %v1844_v22  ;;  %v10149_v16 = vld [vmem:[#allocation2 + $0x50] sm:$0xe]  ;;  %v11433_v24 = vld [vmem:[#allocation27_spill] sm:$0xff] }
 0x172   :  { %v2171_v34 = vadd.f32 %v11424_v62, %v11423_v61  ;;  %v2169_v39 = vadd.f32 %v11426_v17, %v11425_v21  ;;  %v2172_v25 = vadd.f32 %v11428_v5, %v11427_v54  ;;  %v2170_v37 = vadd.f32 %v11429_v49, %v1848_v6  ;;  %v10157_v22 = vld [vmem:[%s11355_s2] ss:$0 sm:$0xff]  ;;  %v11439_v57 = vld [vmem:[#allocation33_spill] sm:$0xff]  ;;  %v11441_v49 = vld [vmem:[#allocation36_spill] sm:$0xff] }
 0x173   :  { %v10112_v44 = vpop.f32.mrf.mxu1  ;;  %v2868_v15 = vadd.f32 %v11430_v0, %v2402_v31  ;;  %v2406_v46 = vadd.f32 %v11431_v41, %v2163_v51  ;;  %v2866_v4 = vadd.f32 %v11432_v19, %v2400_v1  ;;  %v2404_v43 = vadd.f32 %v11433_v24, %v2161_v36  ;;  %v11435_v51 = vld [vmem:[#allocation28_spill] sm:$0xff]  ;;  %v11436_v31 = vld [vmem:[#allocation31_spill] sm:$0xff]  ;;  %v11437_v1 = vld [vmem:[#allocation30_spill] sm:$0xff] }
 0x174   :  { %v2407_v42 = vadd.f32 %v11434_v63, %v2164_v2  ;;  %v8015_v30 = vpop.f32.mrf.mxu0  ;;  %v3723_v58 = vsel %vm8631_vm2, %v10127_v12, %v10129_v13  ;;  %v2869_v6 = vadd.f32 %v11435_v51, %v2403_v33  ;;  %v2867_v26 = vadd.f32 %v11436_v31, %v2401_v50  ;;  %v11438_v2 = vld [vmem:[#allocation32_spill] sm:$0xff]  ;;  %v11440_v17 = vld [vmem:[#allocation35_spill] sm:$0xff]  ;;  %v8454_v13 = vld [vmem:[%s11354_s3 + $0x178] sm:$0xff]  }
 0x175   :  { %v2838_v18 = vpop.f32.mrf.mxu1  ;;  %v2405_v55 = vadd.f32 %v11437_v1, %v2162_v47  ;;  %v3190_v28 = vadd.f32 %v8015_v30, %v2868_v15  ;;  %v2410_v7 = vadd.f32 %v11438_v2, %v2167_v60  ;;  %v2408_v9 = vadd.f32 %v11439_v57, %v2165_v3  ;;  %v11442_v15 = vld [vmem:[#allocation38_spill] sm:$0xff]  ;;  %v11443_v60 = vld [vmem:[#allocation37_spill] sm:$0xff] }
 0x176   :  { %v3125_v61 = vpop.f32.mrf.mxu0  ;;  %v7172_v62 = vrot.slane %v10149_v16, 9  ;;  %v4291_v21 = vrot.slane %v10103_v38, 5  ;;  %v2872_v54 = vadd.f32 %v11440_v17, %v2406_v46  ;;  %v2411_v33 = vadd.f32 %v10032_v40, %v2168_v53  ;;  %v3469_v17 = vld [vmem:[#allocation2 + $0x1c] sm:$0x1]  ;;  %v10515_v38 = vld [vmem:[%s11354_s3 + $0x80] sm:$0xff]  }
 0x177   :  { %v3213_v50 = vadd.f32 %v10157_v22, %v3190_v28  ;;  %v3188_v47 = vadd.f32 %v3125_v61, %v2866_v4  ;;  %v2870_v0 = vadd.f32 %v11441_v49, %v2404_v43  ;;  %v10175_v41 = vadd.f32 %v11442_v15, %v2407_v42  ;;  %v3466_v61 = vld [vmem:[#allocation2 + $0x18] sm:$0xf] }
 0x178   :  { %v7995_v36 = vpop.f32.mrf.mxu1  ;;  %v2409_v3 = vadd.f32 %v11443_v60, %v2166_v48  ;;  %v2414_v19 = vadd.f32 %v10059_v10, %v2171_v34  ;;  %v8016_v24 = vpop.f32.mrf.mxu0  ;;  %v2412_v63 = vadd.f32 %v10082_v20, %v2169_v39  ;;  %v10182_v51 = vadd.f32 %v10069_v27, %v2405_v55 }
 0x179   :  { %v3229_v46 = vmax.f32 %v3213_v50, 0.0  ;;  %v3211_v40 = vadd.f32 %v10157_v22, %v3188_v47  ;;  %v3191_v53 = vadd.f32 %v8016_v24, %v2869_v6  ;;  %v10185_v4 = vadd.f32 %v10089_v29, %v2410_v7  ;;  %v3457_v24 = vld [vmem:[#allocation2 + $0xc] sm:$0x1] }
 0x17a   :  { %v2851_v5 = vpop.f32.mrf.mxu1  ;;  %v2415_v43 = vadd.f32 %v10107_v32, %v2172_v25  ;;  %v2413_v42 = vadd.f32 %v2388_v11, %v2170_v37  ;;  %v3128_v48 = vpop.f32.mrf.mxu0  ;;  %v10190_v1 = vadd.f32 %v10097_v56, %v2408_v9  ;;  %v10193_v6 = vadd.f32 %v10112_v44, %v2411_v33 }
 0x17b   :  { %v7439_v10 = vpack.c.bf16 %v3229_v46, %v3229_v46  ;;  %v3227_v34 = vmax.f32 %v3211_v40, 0.0  ;;  %v3214_v20 = vadd.f32 %v10157_v22, %v3191_v53  ;;  %v3189_v39 = vadd.f32 %v3128_v48, %v2867_v26 }
 0x17c   :  { %v7996_v30 = vpop.f32.mrf.mxu1  ;;  %v10195_v27 = vadd.f32 %v2838_v18, %v2409_v3  ;;  %v10197_v29 = vadd.f32 %v7995_v36, %v2414_v19  ;;  %v8019_v55 = vpop.f32.mrf.mxu0  ;;  %v10199_v32 = vadd.f32 %v2851_v5, %v2412_v63  ;;  %v3454_v19 = vld [vmem:[#allocation2 + $0x8] sm:$0xf] }
 0x17d   :  { %v3308_v11 = vshrl.u32 %v7439_v10, 16  ;;  %v7437_v25 = vpack.c.bf16 %v3227_v34, %v3227_v34  ;;  %v3230_v37 = vmax.f32 %v3214_v20, 0.0  ;;  %v10201_v28 = vadd.f32 %v7996_v30, %v2415_v43 }
 0x17e   :  { %v2854_v31 = vpop.f32.mrf.mxu1  ;;  %v3212_v56 = vadd.f32 %v10157_v22, %v3189_v39  ;;  %v3194_v26 = vadd.f32 %v8019_v55, %v2872_v54  ;;  %v3141_v7 = vpop.f32.mrf.mxu0  ;;  %v3311_v57 = vshll.u32 %v7439_v10, 16 }
 0x17f   :  { %v10203_v2 = vadd.f32 %v2854_v31, %v2413_v42  ;;  %v3310_v44 = vrot.slane %v3308_v11, 7  ;;  %v3292_v18 = vshrl.u32 %v7437_v25, 16  ;;  %v7440_v9 = vpack.c.bf16 %v3230_v37, %v3230_v37  ;;  %v3472_v37 = vld [vmem:[#allocation2 + $0x20] sm:$0xf] }
 0x180   :  { %v3295_v33 = vshll.u32 %v7437_v25, 16  ;;  %v3228_v5 = vmax.f32 %v3212_v56, 0.0  ;;  %v3217_v50 = vadd.f32 %v10157_v22, %v3194_v26  ;;  %v3192_v47 = vadd.f32 %v3141_v7, %v2870_v0  ;;  %v8020_v49 = vpop.f32.mrf.mxu0  ;;  %v3475_v56 = vld [vmem:[#allocation2 + $0x24] sm:$0x1] }
 0x181   :  { %v3313_v54 = vor.u32 %v3311_v57, %v3310_v44  ;;  %v3314_v15 = vrot.slane %v3310_v44, 4  ;;  %v3294_v60 = vrot.slane %v3292_v18, 7  ;;  %v3316_v3 = vshrl.u32 %v7440_v9, 16 }
 0x182   :  { %v3319_v63 = vshll.u32 %v7440_v9, 16  ;;  %v7438_v30 = vpack.c.bf16 %v3228_v5, %v3228_v5  ;;  %v3233_v46 = vmax.f32 %v3217_v50, 0.0  ;;  %v3215_v40 = vadd.f32 %v10157_v22, %v3192_v47  ;;  %v3144_v53 = vpop.f32.mrf.mxu0 }
 0x183   :  { %v3467_v43 = vsel %vm10208_vm12, %v3313_v54, %v3466_v61  ;;  %v3470_v48 = vsel %vm9755_vm8, %v3314_v15, %v3469_v17  ;;  %v3297_v0 = vor.u32 %v3295_v33, %v3294_v60  ;;  %v3298_v31 = vrot.slane %v3294_v60, 4  ;;  %v3460_v17 = vld [vmem:[#allocation2 + $0x10] sm:$0xf]  ;;  %v3463_v33 = vld [vmem:[#allocation2 + $0x14] sm:$0x1] }
 0x184   :  { %3468 = vst [vmem:[#allocation2 + $0x18] sm:$0xf] %v3467_v43  ;;  %3471 = vst [vmem:[#allocation2 + $0x1c] sm:$0x1] %v3470_v48  ;;  %v3318_v10 = vrot.slane %v3316_v3, 7  ;;  %v3300_v34 = vshrl.u32 %v7438_v30, 16  ;;  %v7443_v39 = vpack.c.bf16 %v3233_v46, %v3233_v46  ;;  %v8023_v55 = vpop.f32.mrf.mxu0  ;;  %v3195_v7 = vadd.f32 %v8020_v49, %v10175_v41 }
 0x185   :  { %v3303_v20 = vshll.u32 %v7438_v30, 16  ;;  %v3455_v11 = vsel %vm10208_vm12, %v3297_v0, %v3454_v19  ;;  %v3458_v25 = vsel %vm9755_vm8, %v3298_v31, %v3457_v24  ;;  %v3231_v26 = vmax.f32 %v3215_v40, 0.0  ;;  %v3490_v40 = vld [vmem:[#allocation2 + $0x38] sm:$0xf] }
 0x186   :  { %3456 = vst [vmem:[#allocation2 + $0x8] sm:$0xf] %v3455_v11  ;;  %3459 = vst [vmem:[#allocation2 + $0xc] sm:$0x1] %v3458_v25  ;;  %v3321_v44 = vor.u32 %v3319_v63, %v3318_v10  ;;  %v3322_v57 = vrot.slane %v3318_v10, 4  ;;  %v3302_v18 = vrot.slane %v3300_v34, 7  ;;  %v3157_v61 = vpop.f32.mrf.mxu0  ;;  %v3218_v47 = vadd.f32 %v10157_v22, %v3195_v7 }
 0x187   :  { %v3340_v9 = vshrl.u32 %v7443_v39, 16  ;;  %v3343_v5 = vshll.u32 %v7443_v39, 16  ;;  %v7441_v50 = vpack.c.bf16 %v3231_v26, %v3231_v26  ;;  %v3193_v54 = vadd.f32 %v3144_v53, %v10182_v51  ;;  %v3493_v53 = vld [vmem:[#allocation2 + $0x3c] sm:$0x1]  ;;  %v3481_v11 = vld [vmem:[#allocation2 + $0x2c] sm:$0x1] }
 0x188   :  { %v3473_v15 = vsel %vm10208_vm12, %v3321_v44, %v3472_v37  ;;  %v3476_v41 = vsel %vm9755_vm8, %v3322_v57, %v3475_v56  ;;  %v3305_v49 = vor.u32 %v3303_v20, %v3302_v18  ;;  %v3306_v60 = vrot.slane %v3302_v18, 4  ;;  %v8024_v3 = vpop.f32.mrf.mxu0  ;;  %v3478_v20 = vld [vmem:[#allocation2 + $0x28] sm:$0xf] }
 0x189   :  { %3474 = vst [vmem:[#allocation2 + $0x20] sm:$0xf] %v3473_v15  ;;  %3477 = vst [vmem:[#allocation2 + $0x24] sm:$0x1] %v3476_v41  ;;  %v3342_v19 = vrot.slane %v3340_v9, 7  ;;  %v3324_v24 = vshrl.u32 %v7441_v50, 16  ;;  %v3216_v43 = vadd.f32 %v10157_v22, %v3193_v54  ;;  %v3198_v48 = vadd.f32 %v8023_v55, %v10185_v4 }
 0x18a   :  { %v3327_v63 = vshll.u32 %v7441_v50, 16  ;;  %v3234_v30 = vmax.f32 %v3218_v47, 0.0  ;;  %v3461_v46 = vsel %vm10208_vm12, %v3305_v49, %v3460_v17  ;;  %v3464_v51 = vsel %vm9755_vm8, %v3306_v60, %v3463_v33  ;;  %v3160_v0 = vpop.f32.mrf.mxu0  ;;  %v3496_v47 = vld [vmem:[#allocation2 + $0x40] sm:$0xf]  ;;  %v3499_v49 = vld [vmem:[#allocation2 + $0x44] sm:$0x1] }
 0x18b   :  { %3462 = vst [vmem:[#allocation2 + $0x10] sm:$0xf] %v3461_v46  ;;  %3465 = vst [vmem:[#allocation2 + $0x14] sm:$0x1] %v3464_v51  ;;  %v3345_v31 = vor.u32 %v3343_v5, %v3342_v19  ;;  %v3346_v10 = vrot.slane %v3342_v19, 4  ;;  %v3326_v34 = vrot.slane %v3324_v24, 7  ;;  %v3221_v37 = vadd.f32 %v10157_v22, %v3198_v48 }
 0x18c   :  { %v7444_v39 = vpack.c.bf16 %v3234_v30, %v3234_v30  ;;  %v3232_v25 = vmax.f32 %v3216_v43, 0.0  ;;  %v3196_v56 = vadd.f32 %v3157_v61, %v10190_v1  ;;  %v3199_v26 = vadd.f32 %v8024_v3, %v10193_v6  ;;  %v8027_v57 = vpop.f32.mrf.mxu0  ;;  %v3487_v43 = vld [vmem:[#allocation2 + $0x34] sm:$0x1] }
 0x18d   :  { %v3491_v7 = vsel %vm10208_vm12, %v3345_v31, %v3490_v40  ;;  %v3494_v4 = vsel %vm9755_vm8, %v3346_v10, %v3493_v53  ;;  %v3329_v55 = vor.u32 %v3327_v63, %v3326_v34  ;;  %v3330_v44 = vrot.slane %v3326_v34, 4  ;;  %v3484_v40 = vld [vmem:[#allocation2 + $0x30] sm:$0xf] }
 0x18e   :  { %3492 = vst [vmem:[#allocation2 + $0x38] sm:$0xf] %v3491_v7  ;;  %3495 = vst [vmem:[#allocation2 + $0x3c] sm:$0x1] %v3494_v4  ;;  %v3348_v18 = vshrl.u32 %v7444_v39, 16  ;;  %v3351_v9 = vshll.u32 %v7444_v39, 16  ;;  %v7442_v17 = vpack.c.bf16 %v3232_v25, %v3232_v25  ;;  %v3219_v61 = vadd.f32 %v10157_v22, %v3196_v56  ;;  %v3173_v63 = vpop.f32.mrf.mxu0 }
 0x18f   :  { %v3237_v33 = vmax.f32 %v3221_v37, 0.0  ;;  %v3479_v1 = vsel %vm10208_vm12, %v3329_v55, %v3478_v20  ;;  %v3482_v6 = vsel %vm9755_vm8, %v3330_v44, %v3481_v11  ;;  %v3222_v5 = vadd.f32 %v10157_v22, %v3199_v26  ;;  %v3514_v11 = vld [vmem:[#allocation2 + $0x68] sm:$0xf]  ;;  %v3517_v55 = vld [vmem:[#allocation2 + $0x6c] sm:$0x1] }
 0x190   :  { %3480 = vst [vmem:[#allocation2 + $0x28] sm:$0xf] %v3479_v1  ;;  %3483 = vst [vmem:[#allocation2 + $0x2c] sm:$0x1] %v3482_v6  ;;  %v3350_v50 = vrot.slane %v3348_v18, 7  ;;  %v3332_v54 = vshrl.u32 %v7442_v17, 16  ;;  %v3197_v19 = vadd.f32 %v3160_v0, %v10195_v27  ;;  %v3202_v24 = vadd.f32 %v8027_v57, %v10197_v29  ;;  %v8028_v26 = vpop.f32.mrf.mxu0 }
 0x191   :  { %v3335_v15 = vshll.u32 %v7442_v17, 16  ;;  %v7447_v41 = vpack.c.bf16 %v3237_v33, %v3237_v33  ;;  %v3235_v60 = vmax.f32 %v3219_v61, 0.0  ;;  %v3238_v3 = vmax.f32 %v3222_v5, 0.0  ;;  %v3502_v1 = vld [vmem:[#allocation2 + $0x58] sm:$0xf] }
 0x192   :  { %v3353_v30 = vor.u32 %v3351_v9, %v3350_v50  ;;  %v3354_v46 = vrot.slane %v3350_v50, 4  ;;  %v3334_v51 = vrot.slane %v3332_v54, 7  ;;  %v3220_v34 = vadd.f32 %v10157_v22, %v3197_v19  ;;  %v3505_v6 = vld [vmem:[#allocation2 + $0x5c] sm:$0x1] }
 0x193   :  { %v3372_v53 = vshrl.u32 %v7447_v41, 16  ;;  %v3375_v48 = vshll.u32 %v7447_v41, 16  ;;  %v7445_v31 = vpack.c.bf16 %v3235_v60, %v3235_v60  ;;  %v7448_v10 = vpack.c.bf16 %v3238_v3, %v3238_v3  ;;  %v3520_v60 = vld [vmem:[#allocation2 + $0x70] sm:$0xf]  ;;  %v3523_v3 = vld [vmem:[#allocation2 + $0x74] sm:$0x1] }
 0x194   :  { %v3497_v20 = vsel %vm10208_vm12, %v3353_v30, %v3496_v47  ;;  %v3500_v27 = vsel %vm9755_vm8, %v3354_v46, %v3499_v49  ;;  %v3337_v0 = vor.u32 %v3335_v15, %v3334_v51  ;;  %v3338_v29 = vrot.slane %v3334_v51, 4  ;;  %v3551_v51 = vld [vmem:[#allocation2 + $0x8] sm:$0xf] }
 0x195   :  { %3498 = vst [vmem:[#allocation2 + $0x40] sm:$0xf] %v3497_v20  ;;  %3501 = vst [vmem:[#allocation2 + $0x44] sm:$0x1] %v3500_v27  ;;  %v3374_v39 = vrot.slane %v3372_v53, 7  ;;  %v3356_v25 = vshrl.u32 %v7445_v31, 16  ;;  %v3225_v5 = vadd.f32 %v10157_v22, %v3202_v24  ;;  %v3200_v50 = vadd.f32 %v3173_v63, %v10199_v32 }
 0x196   :  { %v3359_v37 = vshll.u32 %v7445_v31, 16  ;;  %v3380_v56 = vshrl.u32 %v7448_v10, 16  ;;  %v3485_v7 = vsel %vm10208_vm12, %v3337_v0, %v3484_v40  ;;  %v3488_v4 = vsel %vm9755_vm8, %v3338_v29, %v3487_v43  ;;  %v3508_v31 = vld [vmem:[#allocation2 + $0x60] sm:$0xf] }
 0x197   :  { %v3383_v44 = vshll.u32 %v7448_v10, 16  ;;  %v3236_v57 = vmax.f32 %v3220_v34, 0.0  ;;  %3486 = vst [vmem:[#allocation2 + $0x30] sm:$0xf] %v3485_v7  ;;  %3489 = vst [vmem:[#allocation2 + $0x34] sm:$0x1] %v3488_v4  ;;  %v3377_v18 = vor.u32 %v3375_v48, %v3374_v39  ;;  %v3203_v47 = vadd.f32 %v8028_v26, %v10201_v28  ;;  %v3176_v26 = vpop.f32.mrf.mxu0 }
 0x198   :  { %v3378_v9 = vrot.slane %v3374_v39, 4  ;;  %v3358_v17 = vrot.slane %v3356_v25, 7  ;;  %v3382_v33 = vrot.slane %v3380_v56, 7  ;;  %v3241_v63 = vmax.f32 %v3225_v5, 0.0  ;;  %v3511_v34 = vld [vmem:[#allocation2 + $0x64] sm:$0x1] }
 0x199   :  { %v7446_v61 = vpack.c.bf16 %v3236_v57, %v3236_v57  ;;  %v3515_v54 = vsel %vm10208_vm12, %v3377_v18, %v3514_v11  ;;  %v3223_v40 = vadd.f32 %v10157_v22, %v3200_v50  ;;  %v3226_v10 = vadd.f32 %v10157_v22, %v3203_v47  ;;  %v10277_v7 = vld [vmem:[#allocation2 + $0x10] sm:$0xf] }
 0x19a   :  { %v3518_v15 = vsel %vm9755_vm8, %v3378_v9, %v3517_v55  ;;  %v3361_v41 = vor.u32 %v3359_v37, %v3358_v17  ;;  %v3362_v49 = vrot.slane %v3358_v17, 4  ;;  %3516 = vst [vmem:[#allocation2 + $0x68] sm:$0xf] %v3515_v54  ;;  %v3385_v19 = vor.u32 %v3383_v44, %v3382_v33  ;;  %v11447_v37 = vld [vmem:[#allocation34_spill] sm:$0xff]  ;;  %v3538_v17 = vld [vmem:[#allocation2 + $0x88] sm:$0xf] }
 0x19b   :  { %3519 = vst [vmem:[#allocation2 + $0x6c] sm:$0x1] %v3518_v15  ;;  %v3386_v30 = vrot.slane %v3382_v33, 4  ;;  %v3364_v46 = vshrl.u32 %v7446_v61, 16  ;;  %v3367_v24 = vshll.u32 %v7446_v61, 16  ;;  %v7451_v20 = vpack.c.bf16 %v3241_v63, %v3241_v63 }
 0x19c   :  { %v3503_v32 = vsel %vm10208_vm12, %v3361_v41, %v3502_v1  ;;  %v3506_v28 = vsel %vm9755_vm8, %v3362_v49, %v3505_v6  ;;  %v3521_v53 = vsel %vm10208_vm12, %v3385_v19, %v3520_v60  ;;  %v3239_v27 = vmax.f32 %v3223_v40, 0.0  ;;  %v3541_v33 = vld [vmem:[#allocation2 + $0x8c] sm:$0x1]  ;;  %v3553_v54 = vld [vmem:[#allocation2 + $0x18] sm:$0xf] }
 0x19d   :  { %3504 = vst [vmem:[#allocation2 + $0x58] sm:$0xf] %v3503_v32  ;;  %3507 = vst [vmem:[#allocation2 + $0x5c] sm:$0x1] %v3506_v28  ;;  %v3524_v43 = vsel %vm9755_vm8, %v3386_v30, %v3523_v3  ;;  %v3366_v48 = vrot.slane %v3364_v46, 7  ;;  %v3613_v0 = vshrl.u32 %v3551_v51, 16  ;;  %v7148_v56 = vcombine.low %v11447_v37, %v3551_v51 }
 0x19e   :  { %3522 = vst [vmem:[#allocation2 + $0x70] sm:$0xf] %v3521_v53  ;;  %3525 = vst [vmem:[#allocation2 + $0x74] sm:$0x1] %v3524_v43  ;;  %v3616_v29 = vshll.u32 %v3551_v51, 16  ;;  %v3242_v25 = vmax.f32 %v3226_v10, 0.0  ;;  %v7449_v44 = vpack.c.bf16 %v3239_v27, %v3239_v27  ;;  %v3201_v47 = vadd.f32 %v3176_v26, %v10203_v2 }
 0x19f   :  { %v3369_v39 = vor.u32 %v3367_v24, %v3366_v48  ;;  %v3370_v11 = vrot.slane %v3366_v48, 4  ;;  %v3404_v4 = vshrl.u32 %v7451_v20, 16  ;;  %v3407_v55 = vshll.u32 %v7451_v20, 16  ;;  %8077 = vmatprep.mubr.bf16.mxu0 %v7148_v56  ;;  %v3526_v15 = vld [vmem:[#allocation2 + $0x78] sm:$0xf]  ;;  %v8433_v56 = vld [vmem:[%s11354_s3 + $0xf0] sm:$0xff]  }
 0x1a0   :  { %v10279_v57 = vrot.slane %v3613_v0, 4  ;;  %v7452_v1 = vpack.c.bf16 %v3242_v25, %v3242_v25  ;;  %v10285_v6 = vrot.slane %v3616_v29, 5  ;;  %v3388_v5 = vshrl.u32 %v7449_v44, 16  ;;  %v3529_v41 = vld [vmem:[#allocation2 + $0x7c] sm:$0x1] }
 0x1a1   :  { %v3509_v18 = vsel %vm10208_vm12, %v3369_v39, %v3508_v31  ;;  %v3512_v9 = vsel %vm9755_vm8, %v3370_v11, %v3511_v34  ;;  %v3406_v61 = vrot.slane %v3404_v4, 7  ;;  %v3391_v50 = vshll.u32 %v7449_v44, 16  ;;  %v3544_v51 = vld [vmem:[#allocation2 + $0x90] sm:$0xf]  ;;  %v3547_v32 = vld [vmem:[#allocation2 + $0x94] sm:$0x1] }
 0x1a2   :  { %3510 = vst [vmem:[#allocation2 + $0x60] sm:$0xf] %v3509_v18  ;;  %3513 = vst [vmem:[#allocation2 + $0x64] sm:$0x1] %v3512_v9  ;;  %v3412_v49 = vshrl.u32 %v7452_v1, 16  ;;  %v3415_v60 = vshll.u32 %v7452_v1, 16  ;;  %v3224_v28 = vadd.f32 %v10157_v22, %v3201_v47  ;;  %v7149_v37 = vcombine.low %v10277_v7, %v3553_v54 }
 0x1a3   :  { %v3627_v3 = vshrl.u32 %v10277_v7, 16  ;;  %v3630_v19 = vshll.u32 %v10277_v7, 16  ;;  %v3409_v30 = vor.u32 %v3407_v55, %v3406_v61  ;;  %v3410_v46 = vrot.slane %v3406_v61, 4  ;;  %v3554_v43 = vld [vmem:[#allocation2 + $0x20] sm:$0xf] }
 0x1a4   :  { %v3390_v24 = vrot.slane %v3388_v5, 7  ;;  %v3414_v63 = vrot.slane %v3412_v49, 7  ;;  %v3641_v53 = vshrl.u32 %v3553_v54, 16  ;;  %v3555_v20 = vld [vmem:[#allocation2 + $0x28] sm:$0xf]  ;;  %v3240_v0 = vmax.f32 %v3224_v28, 0.0  ;;  %8078 = vmatmul.mubr.bf16.vlgmr.msra.gmra.mxu0 %v7149_v37 }
 0x1a5   :  { %v10291_v40 = vrot.slane %v3627_v3, 4  ;;  %v10293_v2 = vrot.slane %v3630_v19, 5  ;;  %v3539_v48 = vsel %vm10208_vm12, %v3409_v30, %v3538_v17  ;;  %v3542_v31 = vsel %vm9755_vm8, %v3410_v46, %v3541_v33  ;;  %v10313_v18 = vld [vmem:[#allocation2 + $0xc] sm:$0x1]  ;;  %v3556_v9 = vld [vmem:[#allocation2 + $0x30] sm:$0xf] }
 0x1a6   :  { %v3393_v10 = vor.u32 %v3391_v50, %v3390_v24  ;;  %v3394_v34 = vrot.slane %v3390_v24, 4  ;;  %3540 = vst [vmem:[#allocation2 + $0x88] sm:$0xf] %v3539_v48  ;;  %3543 = vst [vmem:[#allocation2 + $0x8c] sm:$0x1] %v3542_v31  ;;  %v3417_v27 = vor.u32 %v3415_v60, %v3414_v63  ;;  %v3418_v22 = vrot.slane %v3414_v63, 4 }
 0x1a7   :  { %v10299_v29 = vrot.slane %v3641_v53, 4  ;;  %v3644_v25 = vshll.u32 %v3553_v54, 16  ;;  %v7450_v55 = vpack.c.bf16 %v3240_v0, %v3240_v0  ;;  %v3655_v44 = vshrl.u32 %v3554_v43, 16  ;;  %v8510_v50 = vld [vmem:[%s11354_s3 + $0xf8] sm:$0xff]   ;;  %v8436_v30 = vld [vmem:[%s11354_s3 + $0xe8] sm:$0xff]  }
 0x1a8   :  { %v3527_v39 = vsel %vm10208_vm12, %v3393_v10, %v3526_v15  ;;  %v3530_v11 = vsel %vm9755_vm8, %v3394_v34, %v3529_v41  ;;  %v3545_v26 = vsel %vm10208_vm12, %v3417_v27, %v3544_v51  ;;  %v3548_v4 = vsel %vm9755_vm8, %v3418_v22, %v3547_v32  ;;  %8126 = vmatpush3.bf16.msra.mxu0 %v8510_v50  ;;  %v3557_v15 = vld [vmem:[#allocation2 + $0x38] sm:$0xf]  ;;  %v3532_v41 = vld [vmem:[#allocation2 + $0x80] sm:$0xf]  ;;  %v3535_v24 = vld [vmem:[#allocation2 + $0x84] sm:$0x1] }
 0x1a9   :  { %3528 = vst [vmem:[#allocation2 + $0x78] sm:$0xf] %v3527_v39  ;;  %3531 = vst [vmem:[#allocation2 + $0x7c] sm:$0x1] %v3530_v11  ;;  %v3646_v7 = vrot.slane %v3644_v25, 5  ;;  %v3658_v17 = vshll.u32 %v3554_v43, 16  ;;  %v7150_v54 = vcombine.low %v3554_v43, %v3555_v20  ;;  %8127 = vmatprep.subr.bf16.mxu0 %v8433_v56  ;;  %v3619_v19 = vor.u32 %v10285_v6, %v10279_v57 }
 0x1aa   :  { %3546 = vst [vmem:[#allocation2 + $0x90] sm:$0xf] %v3545_v26  ;;  %3549 = vst [vmem:[#allocation2 + $0x94] sm:$0x1] %v3548_v4  ;;  %v3669_v33 = vshrl.u32 %v3555_v20, 16  ;;  %v3672_v1 = vshll.u32 %v3555_v20, 16  ;;  %v7151_v48 = vcombine.low %v3556_v9, %v3557_v15  ;;  %v3633_v39 = vor.u32 %v10293_v2, %v10291_v40 }
 0x1ab   :  { %v3396_v61 = vshrl.u32 %v7450_v55, 16  ;;  %v3399_v5 = vshll.u32 %v7450_v55, 16  ;;  %v10318_v47 = vrot.slane %v3655_v44, 4  ;;  %v10320_v49 = vrot.slane %v3658_v17, 5  ;;  %8081 = vmatprep.mubr.bf16.mxu0 %v7150_v54  ;;  %v10332_v31 = vld [vmem:[#allocation2 + $0x14] sm:$0x1] }
 0x1ac   :  { %v10322_v60 = vrot.slane %v3669_v33, 4  ;;  %v10324_v3 = vrot.slane %v3672_v1, 5  ;;  %v3622_v51 = vshll.u32 %v10313_v18, 16  ;;  %v3683_v32 = vshrl.u32 %v3556_v9, 16  ;;  %8128 = vmatpush3.bf16.msra.mxu0 %v8433_v56  ;;  %v10336_v20 = vld [vmem:[#allocation2 + $0x1c] sm:$0x1] }
 0x1ad   :  { %v3398_v46 = vrot.slane %v3396_v61, 7  ;;  %v3686_v28 = vshll.u32 %v3556_v9, 16  ;;  %v3620_v63 = vrot.slane %v3619_v19, 4  ;;  %v3697_v53 = vshrl.u32 %v3557_v15, 16  ;;  %8129 = vmatprep.subr.bf16.mxu0 %v8436_v30  ;;  %v3559_v11 = vld [vmem:[#allocation2 + $0x58] sm:$0xf]  ;;  %8082 = vmatmul.mubr.bf16.gmra.mxu0 %v7151_v48 }
 0x1ae   :  { %v3700_v43 = vshll.u32 %v3557_v15, 16  ;;  %v3624_v57 = vrot.slane %v3622_v51, 5  ;;  %v10334_v6 = vrot.slane %v3683_v32, 4  ;;  %v8439_v25 = vld [vmem:[%s11354_s3 + $0xe0] sm:$0xff]   ;;  %v3636_v4 = vshll.u32 %v10332_v31, 16  ;;  %v8440_v51 = vld [vmem:[%s11354_s3 + $0xb0] sm:$0xff]  }
 0x1af   :  { %v3401_v10 = vor.u32 %v3399_v5, %v3398_v46  ;;  %v3402_v34 = vrot.slane %v3398_v46, 4  ;;  %v10338_v27 = vrot.slane %v3686_v28, 5  ;;  %v10340_v22 = vrot.slane %v3697_v53, 4  ;;  %v10356_v55 = vld [vmem:[#allocation2 + $0x24] sm:$0x1] }
 0x1b0   :  { %v10342_v0 = vrot.slane %v3700_v43, 5  ;;  %v3625_v26 = vsel %vm8631_vm2, %v3620_v63, %v3624_v57  ;;  %v3634_v36 = vrot.slane %v3633_v39, 4  ;;  %v3647_v2 = vor.u32 %v3646_v7, %v10299_v29  ;;  %8130 = vmatpush3.bf16.msra.mxu0 %v8436_v30  ;;  %v10366_v61 = vld [vmem:[#allocation2 + $0x2c] sm:$0x1]  ;;  %v8442_v29 = vld [vmem:[%s11354_s3 + $0xd8] sm:$0xff]  }
 0x1b1   :  { %v3533_v37 = vsel %vm10208_vm12, %v3401_v10, %v3532_v41  ;;  %v3536_v56 = vsel %vm9755_vm8, %v3402_v34, %v3535_v24  ;;  %v7132_v40 = vcombine.low %v3611_v52, %v3625_v26  ;;  %v3650_v44 = vshll.u32 %v10336_v20, 16  ;;  %8131 = vmatprep.subr.bf16.mxu0 %v8439_v25  ;;  %v3560_v52 = vld [vmem:[#allocation2 + $0x60] sm:$0xf]  ;;  %v3561_v41 = vld [vmem:[#allocation2 + $0x68] sm:$0xf]  ;;  %v8445_v10 = vld [vmem:[%s11354_s3 + $0xd0] sm:$0xff]  }
 0x1b2   :  { %3534 = vst [vmem:[#allocation2 + $0x80] sm:$0xf] %v3533_v37  ;;  %3537 = vst [vmem:[#allocation2 + $0x84] sm:$0x1] %v3536_v56  ;;  %v3638_v9 = vrot.slane %v3636_v4, 5  ;;  %v3725_v17 = vshrl.u32 %v3559_v11, 16  ;;  %v7152_v1 = vcombine.low %v10045_v23, %v3559_v11  ;;  %v3661_v45 = vor.u32 %v10320_v49, %v10318_v47 }
 0x1b3   :  { %v3728_v33 = vshll.u32 %v3559_v11, 16  ;;  %8045 = vmatprep.mubr.bf16.mxu1 %v7132_v40  ;;  %v3648_v5 = vrot.slane %v3647_v2, 4  ;;  %v3652_v50 = vrot.slane %v3650_v44, 5  ;;  %v3664_v59 = vshll.u32 %v10356_v55, 16  ;;  %v10388_v63 = vld [vmem:[#allocation2 + $0x34] sm:$0x1] }
 0x1b4   :  { %v3639_v7 = vsel %vm8631_vm2, %v3634_v36, %v3638_v9  ;;  %v10376_v23 = vrot.slane %v3725_v17, 4  ;;  %8085 = vmatprep.mubr.bf16.mxu0 %v7152_v1  ;;  %v3675_v15 = vor.u32 %v10324_v3, %v10322_v60  ;;  %v3662_v49 = vrot.slane %v3661_v45, 4  ;;  %8132 = vmatpush3.bf16.msra.mxu0 %v8439_v25  ;;  %v10392_v48 = vld [vmem:[#allocation2 + $0x3c] sm:$0x1]  ;;  %v3562_v25 = vld [vmem:[#allocation2 + $0x70] sm:$0xf] }
 0x1b5   :  { %v10378_v54 = vrot.slane %v3728_v33, 5  ;;  %v3653_v47 = vsel %vm8631_vm2, %v3648_v5, %v3652_v50  ;;  %v3666_v19 = vrot.slane %v3664_v59, 5  ;;  %v3678_v30 = vshll.u32 %v10366_v61, 16  ;;  %8133 = vmatprep.subr.bf16.mxu0 %v8442_v29  ;;  %v3563_v37 = vld [vmem:[#allocation2 + $0x78] sm:$0xf]  ;;  %v8443_v9 = vld [vmem:[%s11354_s3 + $0xa8] sm:$0xff]  }
 0x1b6   :  { %v7133_v46 = vcombine.low %v3639_v7, %v3653_v47  ;;  %v3676_v24 = vrot.slane %v3675_v15, 4  ;;  %v3739_v32 = vshrl.u32 %v3560_v52, 16  ;;  %v3742_v28 = vshll.u32 %v3560_v52, 16  ;;  %v8511_v56 = vld [vmem:[%s11354_s3 + $0xb8] sm:$0xff]   ;;  %v3565_v45 = vld [vmem:[#allocation2 + $0x88] sm:$0xf] }
 0x1b7   :  { %v3667_v60 = vsel %vm8631_vm2, %v3662_v49, %v3666_v19  ;;  %v3680_v3 = vrot.slane %v3678_v30, 5  ;;  %v3753_v53 = vshrl.u32 %v3561_v41, 16  ;;  %v3756_v43 = vshll.u32 %v3561_v41, 16  ;;  %v10419_v17 = vld [vmem:[#allocation2 + $0x5c] sm:$0x1] }
 0x1b8   :  { %8046 = vmatmul.mubr.bf16.vlgmr.msra.gmra.mxu1 %v7133_v46  ;;  %v10397_v34 = vrot.slane %v3739_v32, 4  ;;  %v10399_v57 = vrot.slane %v3742_v28, 5  ;;  %v7153_v39 = vcombine.low %v3560_v52, %v3561_v41  ;;  %v3689_v11 = vor.u32 %v10338_v27, %v10334_v6  ;;  %8134 = vmatpush3.bf16.msra.mxu0 %v8442_v29 }
 0x1b9   :  { %8094 = vmatpush3.bf16.msra.mxu1 %v8511_v56  ;;  %v3681_v26 = vsel %vm8631_vm2, %v3676_v24, %v3680_v3  ;;  %v10408_v4 = vrot.slane %v3753_v53, 4  ;;  %v10410_v40 = vrot.slane %v3756_v43, 5  ;;  %v3692_v36 = vshll.u32 %v10388_v63, 16  ;;  %8135 = vmatprep.subr.bf16.mxu0 %v8445_v10  ;;  %v10434_v53 = vld [vmem:[#allocation2 + $0x64] sm:$0x1] }
 0x1ba   :  { %v7134_v2 = vcombine.low %v3667_v60, %v3681_v26  ;;  %8095 = vmatprep.subr.bf16.mxu1 %v8440_v51  ;;  %8086 = vmatmul.mubr.bf16.gmra.mxu0 %v7153_v39  ;;  %v3690_v6 = vrot.slane %v3689_v11, 4  ;;  %v3703_v27 = vor.u32 %v10342_v0, %v10340_v22  ;;  %v3706_v44 = vshll.u32 %v10392_v48, 16  ;;  %v3564_v22 = vld [vmem:[#allocation2 + $0x80] sm:$0xf]  ;;  %v8448_v0 = vld [vmem:[%s11354_s3 + $0xc8] sm:$0xff]  }
 0x1bb   :  { %v3694_v33 = vrot.slane %v3692_v36, 5  ;;  %v3767_v1 = vshrl.u32 %v3562_v25, 16  ;;  %v3770_v5 = vshll.u32 %v3562_v25, 16  ;;  %v3781_v50 = vshrl.u32 %v3563_v37, 16  ;;  %v10443_v36 = vld [vmem:[#allocation2 + $0x74] sm:$0x1] }
 0x1bc   :  { %8049 = vmatprep.mubr.bf16.mxu1 %v7134_v2  ;;  %v3704_v59 = vrot.slane %v3703_v27, 4  ;;  %v3708_v52 = vrot.slane %v3706_v44, 5  ;;  %v3784_v7 = vshll.u32 %v3563_v37, 16  ;;  %v7154_v15 = vcombine.low %v3562_v25, %v3563_v37  ;;  %8136 = vmatpush3.bf16.msra.mxu0 %v8445_v10  ;;  %v10436_v37 = vld [vmem:[#allocation2 + $0x6c] sm:$0x1] }
 0x1bd   :  { %8096 = vmatpush3.bf16.msra.mxu1 %v8440_v51  ;;  %v3695_v41 = vsel %vm8631_vm2, %v3690_v6, %v3694_v33  ;;  %v3769_v29 = vrot.slane %v3767_v1, 4  ;;  %v3772_v47 = vrot.slane %v3770_v5, 5  ;;  %v3783_v49 = vrot.slane %v3781_v50, 4  ;;  %v8446_v51 = vld [vmem:[%s11354_s3 + $0xa0] sm:$0xff]   ;;  %8137 = vmatprep.subr.bf16.mxu0 %v8448_v0  ;;  %v8450_v33 = vld [vmem:[#allocation2 + $0x8] ss:$8 sps:$4 sm:$0xff]  }
 0x1be   :  { %v3709_v19 = vsel %vm8631_vm2, %v3704_v59, %v3708_v52  ;;  %8097 = vmatprep.subr.bf16.mxu1 %v8443_v9  ;;  %v3786_v30 = vrot.slane %v3784_v7, 5  ;;  %8089 = vmatprep.mubr.bf16.mxu0 %v7154_v15  ;;  %v3731_v46 = vor.u32 %v10378_v54, %v10376_v23  ;;  %v3734_v24 = vshll.u32 %v10419_v17, 16  ;;  %v8451_v23 = vld [vmem:[%s11354_s3 + $0xc0] sm:$0xff]   ;;  %v10450_v1 = vld [vmem:[#allocation2 + $0x7c] sm:$0x1] }
 0x1bf   :  { %v7135_v32 = vcombine.low %v3695_v41, %v3709_v19  ;;  %v3795_v28 = vshrl.u32 %v3564_v22, 16  ;;  %v3798_v60 = vshll.u32 %v3564_v22, 16  ;;  %v3809_v3 = vshrl.u32 %v3565_v45, 16  ;;  %v8449_v5 = vld [vmem:[%s11354_s3 + $0x98] sm:$0xff]   ;;  %v10468_v15 = vld [vmem:[#allocation2 + $0x8c] sm:$0x1] }
 0x1c0   :  { %v3732_v43 = vrot.slane %v3731_v46, 4  ;;  %v3736_v39 = vrot.slane %v3734_v24, 5  ;;  %v3812_v11 = vshll.u32 %v3565_v45, 16  ;;  %v7155_v25 = vcombine.low %v3564_v22, %v3565_v45  ;;  %8138 = vmatpush3.bf16.msra.mxu0 %v8448_v0  ;;  %v4210_v19 = vld [vmem:[#allocation2 + $0x8] sm:$0xe] }
 0x1c1   :  { %8050 = vmatmul.mubr.bf16.gmra.mxu1 %v7135_v32  ;;  %v3797_v54 = vrot.slane %v3795_v28, 4  ;;  %v3800_v56 = vrot.slane %v3798_v60, 5  ;;  %v3811_v10 = vrot.slane %v3809_v3, 4  ;;  %v3745_v26 = vor.u32 %v10399_v57, %v10397_v34  ;;  %8139 = vmatprep.subr.bf16.mxu0 %v8451_v23  ;;  %v4212_v28 = vld [vmem:[#allocation2 + $0x18] sm:$0xe] }
 0x1c2   :  { %8098 = vmatpush3.bf16.msra.mxu1 %v8443_v9  ;;  %v3737_v2 = vsel %vm8631_vm2, %v3732_v43, %v3736_v39  ;;  %v3814_v6 = vrot.slane %v3812_v11, 5  ;;  %8090 = vmatmul.mubr.bf16.gmra.mxu0 %v7155_v25  ;;  %v3748_v27 = vshll.u32 %v10434_v53, 16  ;;  %v3759_v44 = vor.u32 %v10410_v40, %v10408_v4  ;;  %v10461_v4 = vld [vmem:[#allocation2 + $0x84] sm:$0x1]  ;;  %v8453_v43 = vld [vmem:[#allocation2 + $0x18] ss:$8 sps:$4 sm:$0xff]  }
 0x1c3   :  { %v7136_v34 = vcombine.low %v3723_v58, %v3737_v2  ;;  %8099 = vmatprep.subr.bf16.mxu1 %v8446_v51  ;;  %v3746_v57 = vrot.slane %v3745_v26, 4  ;;  %v3762_v9 = vshll.u32 %v10436_v37, 16  ;;  %v3773_v50 = vor.u32 %v3772_v47, %v3769_v29  ;;  %8141 = vmatprep.mubr.bf16.mxu0 %v8450_v33  ;;  %v8452_v47 = vld [vmem:[%s11354_s3 + $0x90] sm:$0xff]   ;;  %v4213_v25 = vld [vmem:[#allocation2 + $0x20] sm:$0xe] }
 0x1c4   :  { %v3750_v40 = vrot.slane %v3748_v27, 5  ;;  %v3760_v45 = vrot.slane %v3759_v44, 4  ;;  %v3776_v59 = vshll.u32 %v10443_v36, 16  ;;  %v3787_v12 = vor.u32 %v3786_v30, %v3783_v49  ;;  %8140 = vmatpush3.bf16.msra.mxu0 %v8451_v23  ;;  %v8456_v26 = vld [vmem:[#allocation2 + $0x28] ss:$8 sps:$4 sm:$0xff]  }
 0x1c5   :  { %8053 = vmatprep.mubr.bf16.mxu1 %v7136_v34  ;;  %v3764_v58 = vrot.slane %v3762_v9, 5  ;;  %v3774_v52 = vrot.slane %v3773_v50, 4  ;;  %v3790_v7 = vshll.u32 %v10450_v1, 16  ;;  %v3801_v22 = vor.u32 %v3800_v56, %v3797_v54  ;;  %8189 = vmatprep.subr.bf16.mxu0 %v8454_v13  ;;  %v8457_v44 = vld [vmem:[%s11354_s3 + $0x170] sm:$0xff]   ;;  %v4214_v34 = vld [vmem:[#allocation2 + $0x28] sm:$0xe] }
 0x1c6   :  { %8100 = vmatpush3.bf16.msra.mxu1 %v8446_v51  ;;  %v3751_v0 = vsel %vm8631_vm2, %v3746_v57, %v3750_v40  ;;  %v3778_v41 = vrot.slane %v3776_v59, 5  ;;  %v3788_v29 = vrot.slane %v3787_v12, 4  ;;  %v3804_v49 = vshll.u32 %v10461_v4, 16  ;;  %v4211_v51 = vld [vmem:[#allocation2 + $0x10] sm:$0xe]  ;;  %v8455_v57 = vld [vmem:[%s11354_s3 + $0x88] sm:$0xff]  }
 0x1c7   :  { %v3765_v30 = vsel %vm8631_vm2, %v3760_v45, %v3764_v58  ;;  %8101 = vmatprep.subr.bf16.mxu1 %v8449_v5  ;;  %v3792_v46 = vrot.slane %v3790_v7, 5  ;;  %v3802_v24 = vrot.slane %v3801_v22, 4  ;;  %v3815_v32 = vor.u32 %v3814_v6, %v3811_v10  ;;  %v4215_v45 = vld [vmem:[#allocation2 + $0x30] sm:$0xe]  ;;  %v4216_v58 = vld [vmem:[#allocation2 + $0x38] sm:$0xe] }
 0x1c8   :  { %v7137_v60 = vcombine.low %v3751_v0, %v3765_v30  ;;  %v3779_v3 = vsel %vm8631_vm2, %v3774_v52, %v3778_v41  ;;  %v3806_v39 = vrot.slane %v3804_v49, 5  ;;  %v3818_v11 = vshll.u32 %v10468_v15, 16  ;;  %v4218_v52 = vld [vmem:[#allocation2 + $0x58] sm:$0xe]  ;;  %v10526_v41 = vld [vmem:[#allocation2 + $0xc] sm:$0x1] }
 0x1c9   :  { %v3793_v54 = vsel %vm8631_vm2, %v3788_v29, %v3792_v46  ;;  %v3816_v56 = vrot.slane %v3815_v32, 4  ;;  %v7165_v23 = vrot.slane %v4210_v19, 9  ;;  %v4263_v10 = vrot.slane %v10313_v18, 5  ;;  %v5239_v29 = vld [vmem:[#allocation2 + $0x8] sm:$0xe] }
 0x1ca   :  { %8054 = vmatmul.mubr.bf16.gmra.mxu1 %v7137_v60  ;;  %v7138_v2 = vcombine.low %v3779_v3, %v3793_v54  ;;  %8142 = vmatmul.mubr.bf16.vlgmr.msra.gmra.mxu0 %v8453_v43  ;;  %v3807_v6 = vsel %vm8631_vm2, %v3802_v24, %v3806_v39  ;;  %v3820_v27 = vrot.slane %v3818_v11, 5  ;;  %v7166_v33 = vrot.slane %v4211_v51, 9  ;;  %v10530_v24 = vld [vmem:[#allocation2 + $0x14] sm:$0x1]  ;;  %v5240_v32 = vld [vmem:[#allocation2 + $0x10] sm:$0xe] }
 0x1cb   :  { %8102 = vmatpush3.bf16.msra.mxu1 %v8449_v5  ;;  %8145 = vmatprep.mubr.bf16.mxu0 %v8456_v26  ;;  %v4264_v18 = vsel %vm8864_vm5, %v7165_v23, %v4263_v10  ;;  %v4267_v9 = vrot.slane %v10332_v31, 5  ;;  %v7167_v50 = vrot.slane %v4212_v28, 9  ;;  %v4271_v40 = vrot.slane %v10336_v20, 5  ;;  %v8459_v51 = vld [vmem:[#allocation2 + $0x38] ss:$8 sps:$4 sm:$0xff]  }
 0x1cc   :  { %8057 = vmatprep.mubr.bf16.mxu1 %v7138_v2  ;;  %8103 = vmatprep.subr.bf16.mxu1 %v8452_v47  ;;  %v3821_v59 = vsel %vm8631_vm2, %v3816_v56, %v3820_v27  ;;  %v7168_v5 = vrot.slane %v4213_v25, 9  ;;  %v4275_v12 = vrot.slane %v10356_v55, 5  ;;  %v10505_v31 = vsel %vm8864_vm5, %v7172_v62, %v4291_v21  ;;  %v4219_v55 = vld [vmem:[#allocation2 + $0x60] sm:$0xe]  ;;  %v4221_v25 = vld [vmem:[#allocation2 + $0x70] sm:$0xe] }
 0x1cd   :  { %v7139_v20 = vcombine.low %v3807_v6, %v3821_v59  ;;  %8190 = vmatpush3.bf16.msra.mxu0 %v8454_v13  ;;  %v7196_v7 = vcombine.low %v10136_v14, %v4264_v18  ;;  %v10510_v22 = vsel %vm8864_vm5, %v7166_v33, %v4267_v9  ;;  %v7169_v0 = vrot.slane %v4214_v34, 9  ;;  %v4220_v13 = vld [vmem:[#allocation2 + $0x68] sm:$0xe]  ;;  %v8461_v3 = vld [vmem:[#allocation2 + $0x58] ss:$8 sps:$4 sm:$0xff]  }
 0x1ce   :  { %8191 = vmatprep.subr.bf16.mxu0 %v8457_v44  ;;  %v10519_v16 = vsel %vm8864_vm5, %v7167_v50, %v4271_v40  ;;  %v10523_v62 = vsel %vm8864_vm5, %v7168_v5, %v4275_v12  ;;  %v4279_v14 = vrot.slane %v10366_v61, 5  ;;  %v7170_v21 = vrot.slane %v4215_v45, 9  ;;  %v8460_v61 = vld [vmem:[%s11354_s3 + $0x168] sm:$0xff]   ;;  %v10549_v54 = vld [vmem:[#allocation2 + $0x1c] sm:$0x1] }
 0x1cf   :  { %8104 = vmatpush3.bf16.msra.mxu1 %v8452_v47  ;;  %v4283_v49 = vrot.slane %v10388_v63, 5  ;;  %v7171_v19 = vrot.slane %v4216_v58, 9  ;;  %v4287_v30 = vrot.slane %v10392_v48, 5  ;;  %v7173_v46 = vrot.slane %v4218_v52, 9  ;;  %v4222_v10 = vld [vmem:[#allocation2 + $0x78] sm:$0xe] }
 0x1d0   :  { %8105 = vmatprep.subr.bf16.mxu1 %v8455_v57  ;;  %v10537_v28 = vsel %vm8864_vm5, %v7169_v0, %v4279_v14  ;;  %v4295_v47 = vrot.slane %v10419_v17, 5  ;;  %v7174_v63 = vrot.slane %v4219_v55, 9  ;;  %v4299_v60 = vrot.slane %v10434_v53, 5  ;;  %v8463_v17 = vld [vmem:[%s11354_s3 + $0x160] sm:$0xff]   ;;  %v5241_v34 = vld [vmem:[#allocation2 + $0x18] sm:$0xe] }
 0x1d1   :  { %8192 = vmatpush3.bf16.msra.mxu0 %v8457_v44  ;;  %v7197_v48 = vcombine.low %v10510_v22, %v10519_v16  ;;  %v7198_v43 = vcombine.low %v10523_v62, %v10537_v28  ;;  %v10547_v39 = vsel %vm8864_vm5, %v7170_v21, %v4283_v49  ;;  %v7175_v11 = vrot.slane %v4220_v13, 9  ;;  %v10567_v2 = vld [vmem:[#allocation2 + $0x24] sm:$0x1]  ;;  %v5242_v40 = vld [vmem:[#allocation2 + $0x20] sm:$0xe]  ;;  %v10590_v52 = vld [vmem:[%s11354_s3 + $0x130] sm:$0xff]  }
 0x1d2   :  { %8058 = vmatmul.mubr.bf16.gmra.mxu1 %v7139_v20  ;;  %8146 = vmatmul.mubr.bf16.gmra.mxu0 %v8459_v51  ;;  %v10556_v53 = vsel %vm8864_vm5, %v7171_v19, %v4287_v30  ;;  %v10560_v56 = vsel %vm8864_vm5, %v7173_v46, %v4295_v47  ;;  %v10564_v26 = vsel %vm8864_vm5, %v7174_v63, %v4299_v60  ;;  %v4303_v23 = vrot.slane %v10436_v37, 5  ;;  %v8462_v37 = vld [vmem:[%s11354_s3 + $0x138] sm:$0xff]   ;;  %v4223_v58 = vld [vmem:[#allocation2 + $0x80] sm:$0xe]  ;;  %v4224_v14 = vld [vmem:[#allocation2 + $0x88] sm:$0xe] }
 0x1d3   :  { %8106 = vmatpush3.bf16.msra.mxu1 %v8455_v57  ;;  %8109 = vmatprep.mubr.bf16.mxu1 %v7196_v7  ;;  %v7199_v6 = vcombine.low %v10547_v39, %v10556_v53  ;;  %v7276_v27 = vrot.slane %v5239_v29, 9  ;;  %v5289_v44 = vrot.slane %v10526_v41, 5  ;;  %v7277_v33 = vrot.slane %v5240_v32, 9  ;;  %v8466_v20 = vld [vmem:[%s11354_s3 + $0x158] sm:$0xff]   ;;  %v5243_v21 = vld [vmem:[#allocation2 + $0x28] sm:$0xe] }
 0x1d4   :  { %8107 = vmatprep.subr.bf16.mxu1 %v10515_v38  ;;  %8193 = vmatprep.subr.bf16.mxu0 %v8460_v61  ;;  %v10578_v18 = vsel %vm8864_vm5, %v7175_v11, %v4303_v23  ;;  %v5293_v57 = vrot.slane %v10530_v24, 5  ;;  %v7176_v9 = vrot.slane %v4221_v25, 9  ;;  %v4307_v50 = vrot.slane %v10443_v36, 5  ;;  %v8465_v36 = vld [vmem:[#allocation2 + $0x68] ss:$8 sps:$4 sm:$0xff]  }
 0x1d5   :  { %8149 = vmatprep.mubr.bf16.mxu0 %v8461_v3  ;;  %8194 = vmatpush3.bf16.msra.mxu0 %v8460_v61  ;;  %v7200_v45 = vcombine.low %v10505_v31, %v10560_v56  ;;  %v7201_v59 = vcombine.low %v10564_v26, %v10578_v18  ;;  %v7177_v5 = vrot.slane %v4222_v10, 9  ;;  %v4311_v12 = vrot.slane %v10450_v1, 5  ;;  %v10614_v30 = vld [vmem:[#allocation2 + $0x2c] sm:$0x1]  ;;  %v5244_v46 = vld [vmem:[#allocation2 + $0x30] sm:$0xe] }
 0x1d6   :  { %8195 = vmatprep.subr.bf16.mxu0 %v8463_v17  ;;  %v10597_v7 = vsel %vm8864_vm5, %v7276_v27, %v5289_v44  ;;  %v10601_v0 = vsel %vm8864_vm5, %v7277_v33, %v5293_v57  ;;  %v7278_v1 = vrot.slane %v5241_v34, 9  ;;  %v5297_v55 = vrot.slane %v10549_v54, 5  ;;  %v10623_v47 = vld [vmem:[#allocation2 + $0x34] sm:$0x1]  ;;  %v4773_v63 = vld [vmem:[#allocation2 + $0x8] sm:$0xf] }
 0x1d7   :  { %8108 = vmatpush3.bf16.msra.mxu1 %v10515_v38  ;;  %v10607_v13 = vsel %vm8864_vm5, %v7176_v9, %v4307_v50  ;;  %v10611_v29 = vsel %vm8864_vm5, %v7177_v5, %v4311_v12  ;;  %v7279_v49 = vrot.slane %v5242_v40, 9  ;;  %v5301_v19 = vrot.slane %v10567_v2, 5  ;;  %v8469_v60 = vld [vmem:[%s11354_s3 + $0x150] sm:$0xff]   ;;  %v10641_v34 = vld [vmem:[#allocation2 + $0x3c] sm:$0x1] }
 0x1d8   :  { %8157 = vmatprep.subr.bf16.mxu1 %v8462_v37  ;;  %v7308_v32 = vcombine.low %v10597_v7, %v10601_v0  ;;  %v10620_v38 = vsel %vm8864_vm5, %v7278_v1, %v5297_v55  ;;  %v7178_v51 = vrot.slane %v4223_v58, 9  ;;  %v4315_v61 = vrot.slane %v10461_v4, 5  ;;  %v4775_v10 = vld [vmem:[#allocation2 + $0x10] sm:$0xf]  ;;  %v8467_v4 = vld [vmem:[#allocation2 + $0x78] ss:$8 sps:$4 sm:$0xff]  }
 0x1d9   :  { %8196 = vmatpush3.bf16.msra.mxu0 %v8463_v17  ;;  %v10630_v3 = vsel %vm8864_vm5, %v7279_v49, %v5301_v19  ;;  %v7179_v11 = vrot.slane %v4224_v14, 9  ;;  %v4319_v25 = vrot.slane %v10468_v15, 5  ;;  %v7280_v23 = vrot.slane %v5243_v21, 9  ;;  %v8468_v15 = vld [vmem:[%s11354_s3 + $0x128] sm:$0xff]   ;;  %v10654_v9 = vld [vmem:[#allocation2 + $0x44] sm:$0x1] }
 0x1da   :  { %8110 = vmatmul.mubr.bf16.vlgmr.msra.gmra.mxu1 %v7197_v48  ;;  %8150 = vmatmul.mubr.bf16.gmra.mxu0 %v8465_v36  ;;  %v7202_v17 = vcombine.low %v10607_v13, %v10611_v29  ;;  %v7309_v27 = vcombine.low %v10620_v38, %v10630_v3  ;;  %v5305_v44 = vrot.slane %v10614_v30, 5  ;;  %v7281_v33 = vrot.slane %v5244_v46, 9  ;;  %v5245_v50 = vld [vmem:[#allocation2 + $0x38] sm:$0xe]  ;;  %v5246_v40 = vld [vmem:[#allocation2 + $0x40] sm:$0xe] }
 0x1db   :  { %8113 = vmatprep.mubr.bf16.mxu1 %v7198_v43  ;;  %8158 = vmatpush3.bf16.msra.mxu1 %v8462_v37  ;;  %v10651_v22 = vsel %vm8864_vm5, %v7178_v51, %v4315_v61  ;;  %v5309_v16 = vrot.slane %v10623_v47, 5  ;;  %v4806_v48 = vshrl.u32 %v4773_v63, 16  ;;  %v4809_v57 = vshll.u32 %v4773_v63, 16  ;;  %v4777_v1 = vld [vmem:[#allocation2 + $0x18] sm:$0xf]  ;;  %v8470_v55 = vld [vmem:[%s11354_s3 + $0x120] sm:$0xff]  }
 0x1dc   :  { %8159 = vmatprep.subr.bf16.mxu1 %v10590_v52  ;;  %8197 = vmatprep.subr.bf16.mxu0 %v8466_v20  ;;  %v10659_v62 = vsel %vm8864_vm5, %v7179_v11, %v4319_v25  ;;  %v10663_v28 = vsel %vm8864_vm5, %v7280_v23, %v5305_v44  ;;  %v4815_v43 = vshll.u32 %v10526_v41, 16  ;;  %v4820_v37 = vshrl.u32 %v4775_v10, 16  ;;  %v8471_v14 = vld [vmem:[#allocation2 + $0x88] ss:$8 sps:$4 sm:$0xff]   ;;  %v4779_v19 = vld [vmem:[#allocation2 + $0x20] sm:$0xf] }
 0x1dd   :  { %8153 = vmatprep.mubr.bf16.mxu0 %v8467_v4  ;;  %8198 = vmatpush3.bf16.msra.mxu0 %v8466_v20  ;;  %v10668_v5 = vsel %vm8864_vm5, %v7281_v33, %v5309_v16  ;;  %v4808_v12 = vrot.slane %v4806_v48, 4  ;;  %v4811_v58 = vrot.slane %v4809_v57, 5  ;;  %v4823_v36 = vshll.u32 %v4775_v10, 16  ;;  %v8472_v46 = vld [vmem:[%s11354_s3 + $0x148] sm:$0xff]   ;;  %v10684_v16 = vld [vmem:[#allocation2 + $0x5c] sm:$0x1] }
 0x1de   :  { %8199 = vmatprep.subr.bf16.mxu0 %v8469_v60  ;;  %v7203_v41 = vcombine.low %v10651_v22, %v10659_v62  ;;  %v7310_v20 = vcombine.low %v10663_v28, %v10668_v5  ;;  %v4822_v21 = vrot.slane %v4820_v37, 4  ;;  %v4829_v49 = vshll.u32 %v10530_v24, 16  ;;  %v8474_v48 = vld [vmem:[%s11354_s3 + $0x140] sm:$0xff]   ;;  %v8480_v38 = vld [vmem:[%s11354_s3 + $0x1e8] sm:$0xff]   ;;  %v8481_v22 = vld [vmem:[%s11354_s3 + $0x1b8] sm:$0xff]  }
 0x1df   :  { %8160 = vmatpush3.bf16.msra.mxu1 %v10590_v52  ;;  %v4812_v51 = vor.u32 %v4811_v58, %v4808_v12  ;;  %v4825_v61 = vrot.slane %v4823_v36, 5  ;;  %v7282_v63 = vrot.slane %v5245_v50, 9  ;;  %v5313_v11 = vrot.slane %v10641_v34, 5  ;;  %v10697_v50 = vld [vmem:[#allocation2 + $0x64] sm:$0x1]  ;;  %v8473_v36 = vld [vmem:[%s11354_s3 + $0x118] sm:$0xff]  }
 0x1e0   :  { %8161 = vmatprep.subr.bf16.mxu1 %v8468_v15  ;;  %v4817_v25 = vrot.slane %v4815_v43, 5  ;;  %v7283_v23 = vrot.slane %v5246_v40, 9  ;;  %v5317_v10 = vrot.slane %v10654_v9, 5  ;;  %v4834_v4 = vshrl.u32 %v4777_v1, 16  ;;  %v5247_v40 = vld [vmem:[#allocation2 + $0x58] sm:$0xe] }
 0x1e1   :  { %8200 = vmatpush3.bf16.msra.mxu0 %v8469_v60  ;;  %v4813_v24 = vrot.slane %v4812_v51, 4  ;;  %v4826_v44 = vor.u32 %v4825_v61, %v4822_v21  ;;  %v4831_v33 = vrot.slane %v4829_v49, 5  ;;  %v4837_v52 = vshll.u32 %v4777_v1, 16  ;;  %v5248_v58 = vld [vmem:[#allocation2 + $0x60] sm:$0xe] }
 0x1e2   :  { %8114 = vmatmul.mubr.bf16.gmra.mxu1 %v7199_v6  ;;  %8154 = vmatmul.mubr.bf16.gmra.mxu0 %v8471_v14  ;;  %v10694_v57 = vsel %vm8864_vm5, %v7283_v23, %v5317_v10  ;;  %v4836_v60 = vrot.slane %v4834_v4, 4  ;;  %v4843_v43 = vshll.u32 %v10549_v54, 16  ;;  %v4848_v37 = vshrl.u32 %v4779_v19, 16  ;;  %v4781_v54 = vld [vmem:[#allocation2 + $0x28] sm:$0xf]  ;;  %v8479_v28 = vld [vmem:[%s11354_s3 + $0x100] sm:$0xff]  }
 0x1e3   :  { %8117 = vmatprep.mubr.bf16.mxu1 %v7200_v45  ;;  %8162 = vmatpush3.bf16.msra.mxu1 %v8468_v15  ;;  %v4818_v39 = vsel %vm8631_vm2, %v4813_v24, %v4817_v25  ;;  %v4827_v53 = vrot.slane %v4826_v44, 4  ;;  %v10706_v6 = vsel %vm8864_vm5, %v7282_v63, %v5313_v11  ;;  %v4839_v12 = vrot.slane %v4837_v52, 5  ;;  %v4783_v51 = vld [vmem:[#allocation2 + $0x30] sm:$0xf]  ;;  %v10729_v23 = vld [vmem:[#allocation2 + $0x6c] sm:$0x1] }
 0x1e4   :  { %8163 = vmatprep.subr.bf16.mxu1 %v8470_v55  ;;  %8201 = vmatprep.subr.bf16.mxu0 %v8472_v46  ;;  %v7311_v31 = vcombine.low %v10706_v6, %v10694_v57  ;;  %v4850_v56 = vrot.slane %v4848_v37, 4  ;;  %v4851_v45 = vshll.u32 %v4779_v19, 16  ;;  %v4857_v15 = vshll.u32 %v10567_v2, 16  ;;  %v8475_v19 = vld [vmem:[%s11354_s3 + $0x110] sm:$0xff]   ;;  %v8476_v2 = vld [vmem:[%s11354_s3 + $0x1f8] sm:$0xff]  }
 0x1e5   :  { %8202 = vmatpush3.bf16.msra.mxu0 %v8472_v46  ;;  %8205 = vmatprep.mubr.bf16.mxu0 %v7308_v32  ;;  %v4832_v1 = vsel %vm8631_vm2, %v4827_v53, %v4831_v33  ;;  %v4840_v14 = vor.u32 %v4839_v12, %v4836_v60  ;;  %v7284_v21 = vrot.slane %v5247_v40, 9  ;;  %v5321_v49 = vrot.slane %v10684_v16, 5  ;;  %v5249_v33 = vld [vmem:[#allocation2 + $0x68] sm:$0xe]  ;;  %v5250_v52 = vld [vmem:[#allocation2 + $0x70] sm:$0xe] }
 0x1e6   :  { %8203 = vmatprep.subr.bf16.mxu0 %v8474_v48  ;;  %v10726_v46 = vcombine.low %v4818_v39, %v4832_v1  ;;  %v4845_v7 = vrot.slane %v4843_v43, 5  ;;  %v4853_v0 = vrot.slane %v4851_v45, 5  ;;  %v7285_v32 = vrot.slane %v5248_v58, 9  ;;  %v10750_v58 = vld [vmem:[#allocation2 + $0x74] sm:$0x1] }
 0x1e7   :  { %8164 = vmatpush3.bf16.msra.mxu1 %v8470_v55  ;;  %v4841_v61 = vrot.slane %v4840_v14, 4  ;;  %v4859_v63 = vrot.slane %v4857_v15, 5  ;;  %v5325_v11 = vrot.slane %v10697_v50, 5  ;;  %v4862_v25 = vshrl.u32 %v4781_v54, 16  ;;  %v8478_v55 = vld [vmem:[%s11354_s3 + $0x1f0] sm:$0xff]  }
 0x1e8   :  { %8165 = vmatprep.subr.bf16.mxu1 %v8473_v36  ;;  %v4854_v10 = vor.u32 %v4853_v0, %v4850_v56  ;;  %v10733_v4 = vsel %vm8864_vm5, %v7284_v21, %v5321_v49  ;;  %v4865_v24 = vshll.u32 %v4781_v54, 16  ;;  %v4876_v44 = vshrl.u32 %v4783_v51, 16  ;;  %v8477_v56 = vld [vmem:[%s11354_s3 + $0x108] sm:$0xff]   ;;  %v4787_v45 = vld [vmem:[#allocation2 + $0x40] sm:$0xf] }
 0x1e9   :  { %8204 = vmatpush3.bf16.msra.mxu0 %v8474_v48  ;;  %v10740_v60 = vsel %vm8864_vm5, %v7285_v32, %v5325_v11  ;;  %v4864_v43 = vrot.slane %v4862_v25, 4  ;;  %v4871_v37 = vshll.u32 %v10614_v30, 16  ;;  %v4879_v40 = vshll.u32 %v4783_v51, 16  ;;  %v10774_v51 = vld [vmem:[#allocation2 + $0x7c] sm:$0x1] }
 0x1ea   :  { %8118 = vmatmul.mubr.bf16.gmra.mxu1 %v7201_v59  ;;  %8253 = vmatprep.subr.bf16.mxu0 %v8476_v2  ;;  %v4846_v48 = vsel %vm8631_vm2, %v4841_v61, %v4845_v7  ;;  %v4855_v39 = vrot.slane %v4854_v10, 4  ;;  %v7312_v53 = vcombine.low %v10733_v4, %v10740_v60  ;;  %v4867_v12 = vrot.slane %v4865_v24, 5  ;;  %v4785_v59 = vld [vmem:[#allocation2 + $0x38] sm:$0xf]  ;;  %v10790_v11 = vld [vmem:[#allocation2 + $0x84] sm:$0x1] }
 0x1eb   :  { %8121 = vmatprep.mubr.bf16.mxu1 %v7202_v17  ;;  %8166 = vmatpush3.bf16.msra.mxu1 %v8473_v36  ;;  %v4878_v30 = vrot.slane %v4876_v44, 4  ;;  %v4881_v54 = vrot.slane %v4879_v40, 5  ;;  %v4885_v26 = vshll.u32 %v10623_v47, 16  ;;  %v7286_v18 = vrot.slane %v5249_v33, 9  ;;  %v5251_v0 = vld [vmem:[#allocation2 + $0x78] sm:$0xe] }
 0x1ec   :  { %8167 = vmatprep.subr.bf16.mxu1 %v8475_v19  ;;  %8206 = vmatmul.mubr.bf16.vlgmr.msra.gmra.mxu0 %v7309_v27  ;;  %v4860_v13 = vsel %vm8631_vm2, %v4855_v39, %v4859_v63  ;;  %v4868_v29 = vor.u32 %v4867_v12, %v4864_v43  ;;  %v5329_v17 = vrot.slane %v10729_v23, 5  ;;  %v7287_v36 = vrot.slane %v5250_v52, 9  ;;  %v5252_v25 = vld [vmem:[#allocation2 + $0x80] sm:$0xe]  ;;  %v4789_v52 = vld [vmem:[#allocation2 + $0x58] sm:$0xf] }
 0x1ed   :  { %8209 = vmatprep.mubr.bf16.mxu0 %v7310_v20  ;;  %8254 = vmatpush3.bf16.msra.mxu0 %v8476_v2  ;;  %v10771_v47 = vcombine.low %v4846_v48, %v4860_v13  ;;  %v4873_v3 = vrot.slane %v4871_v37, 5  ;;  %v4882_v27 = vor.u32 %v4881_v54, %v4878_v30  ;;  %v5333_v15 = vrot.slane %v10750_v58, 5  ;;  %v4791_v54 = vld [vmem:[#allocation2 + $0x60] sm:$0xf]  ;;  %v8484_v13 = vld [vmem:[%s11354_s3 + $0x1d8] sm:$0xff]  }
 0x1ee   :  { %8255 = vmatprep.subr.bf16.mxu0 %v8478_v55  ;;  %v4869_v1 = vrot.slane %v4868_v29, 4  ;;  %v4887_v14 = vrot.slane %v4885_v26, 5  ;;  %v4890_v21 = vshrl.u32 %v4785_v59, 16  ;;  %v4893_v49 = vshll.u32 %v4785_v59, 16  ;;  %v10812_v26 = vld [vmem:[#allocation2 + $0x8c] sm:$0x1] }
 0x1ef   :  { %8168 = vmatpush3.bf16.msra.mxu1 %v8475_v19  ;;  %v4883_v5 = vrot.slane %v4882_v27, 4  ;;  %v10781_v20 = vsel %vm8864_vm5, %v7287_v36, %v5333_v15  ;;  %v4899_v2 = vshll.u32 %v10641_v34, 16  ;;  %v4904_v7 = vshrl.u32 %v4787_v45, 16  ;;  %v8482_v34 = vld [vmem:[%s11354_s3 + $0x1e0] sm:$0xff]   ;;  %v4793_v36 = vld [vmem:[#allocation2 + $0x68] sm:$0xf] }
 0x1f0   :  { %8169 = vmatprep.subr.bf16.mxu1 %v8477_v56  ;;  %v4874_v32 = vsel %vm8631_vm2, %v4869_v1, %v4873_v3  ;;  %v10788_v19 = vsel %vm8864_vm5, %v7286_v18, %v5329_v17  ;;  %v4892_v61 = vrot.slane %v4890_v21, 4  ;;  %v4895_v63 = vrot.slane %v4893_v49, 5  ;;  %v10827_v17 = vld [vmem:[#allocation2 + $0x94] sm:$0x1] }
 0x1f1   :  { %8256 = vmatpush3.bf16.msra.mxu0 %v8478_v55  ;;  %v4888_v10 = vsel %vm8631_vm2, %v4883_v5, %v4887_v14  ;;  %v4901_v24 = vrot.slane %v4899_v2, 5  ;;  %v4906_v44 = vrot.slane %v4904_v7, 4  ;;  %v4907_v33 = vshll.u32 %v4787_v45, 16  ;;  %v8483_v15 = vld [vmem:[%s11354_s3 + $0x1b0] sm:$0xff]  }
 0x1f2   :  { %8122 = vmatmul.mubr.bf16.gmra.mxu1 %v7203_v41  ;;  %8257 = vmatprep.subr.bf16.mxu0 %v8480_v38  ;;  %v7313_v43 = vcombine.low %v10788_v19, %v10781_v20  ;;  %v4896_v55 = vor.u32 %v4895_v63, %v4892_v61  ;;  %v4913_v37 = vshll.u32 %v10654_v9, 16  ;;  %v7288_v40 = vrot.slane %v5251_v0, 9  ;;  %v8488_v20 = vld [vmem:[%s11354_s3 + $0x1c8] sm:$0xff]  }
 0x1f3   :  { %8170 = vmatpush3.bf16.msra.mxu1 %v8477_v56  ;;  %8173 = vmatprep.mubr.bf16.mxu1 %v10726_v46  ;;  %v4909_v48 = vrot.slane %v4907_v33, 5  ;;  %v5337_v39 = vrot.slane %v10774_v51, 5  ;;  %v7289_v12 = vrot.slane %v5252_v25, 9  ;;  %v5341_v30 = vrot.slane %v10790_v11, 5  ;;  %v5254_v56 = vld [vmem:[#allocation2 + $0x90] sm:$0xe] }
 0x1f4   :  { %8171 = vmatprep.subr.bf16.mxu1 %v8479_v28  ;;  %8210 = vmatmul.mubr.bf16.gmra.mxu0 %v7311_v31  ;;  %v7262_v9 = vcombine.low %v4874_v32, %v4888_v10  ;;  %v4897_v62 = vrot.slane %v4896_v55, 4  ;;  %v4918_v41 = vshrl.u32 %v4789_v52, 16  ;;  %v4921_v46 = vshll.u32 %v4789_v52, 16  ;;  %v5253_v31 = vld [vmem:[#allocation2 + $0x88] sm:$0xe] }
 0x1f5   :  { %8213 = vmatprep.mubr.bf16.mxu0 %v7312_v53  ;;  %8258 = vmatpush3.bf16.msra.mxu0 %v8480_v38  ;;  %v4910_v18 = vor.u32 %v4909_v48, %v4906_v44  ;;  %v4915_v59 = vrot.slane %v4913_v37, 5  ;;  %v5338_v57 = vsel %vm8864_vm5, %v7288_v40, %v5337_v39  ;;  %v5342_v6 = vsel %vm8864_vm5, %v7289_v12, %v5341_v30  ;;  %v5804_v37 = vld [vmem:[#allocation2 + $0x10] sm:$0xf] }
 0x1f6   :  { %8259 = vmatprep.subr.bf16.mxu0 %v8482_v34  ;;  %v4902_v4 = vsel %vm8631_vm2, %v4897_v62, %v4901_v24  ;;  %v4920_v60 = vrot.slane %v4918_v41, 4  ;;  %v4923_v53 = vrot.slane %v4921_v46, 5  ;;  %v4927_v29 = vshll.u32 %v10684_v16, 16  ;;  %v4795_v16 = vld [vmem:[#allocation2 + $0x70] sm:$0xf]  ;;  %v8487_v62 = vld [vmem:[%s11354_s3 + $0x1a0] sm:$0xff]  }
 0x1f7   :  { %8172 = vmatpush3.bf16.msra.mxu1 %v8479_v28  ;;  %v4911_v45 = vrot.slane %v4910_v18, 4  ;;  %v7314_v38 = vcombine.low %v5338_v57, %v5342_v6  ;;  %v4932_v3 = vshrl.u32 %v4791_v54, 16  ;;  %v4935_v27 = vshll.u32 %v4791_v54, 16  ;;  %v10857_v54 = vld [vmem:[#allocation2 + $0x14] sm:$0x1] }
 0x1f8   :  { %8221 = vmatprep.subr.bf16.mxu1 %v8481_v22  ;;  %v4924_v1 = vor.u32 %v4923_v53, %v4920_v60  ;;  %v4941_v14 = vshll.u32 %v10697_v50, 16  ;;  %v7290_v21 = vrot.slane %v5253_v31, 9  ;;  %v5345_v49 = vrot.slane %v10812_v26, 5  ;;  %v8486_v50 = vld [vmem:[%s11354_s3 + $0x1d0] sm:$0xff]   ;;  %v10865_v31 = vld [vmem:[#allocation2 + $0x1c] sm:$0x1] }
 0x1f9   :  { %8260 = vmatpush3.bf16.msra.mxu0 %v8482_v34  ;;  %v4916_v28 = vsel %vm8631_vm2, %v4911_v45, %v4915_v59  ;;  %v4934_v5 = vrot.slane %v4932_v3, 4  ;;  %v4937_v2 = vrot.slane %v4935_v27, 5  ;;  %v7291_v7 = vrot.slane %v5254_v56, 9  ;;  %v8490_v3 = vld [vmem:[%s11354_s3 + $0x1c0] sm:$0xff]  }
 0x1fa   :  { %8174 = vmatmul.mubr.bf16.vlgmr.msra.gmra.mxu1 %v10771_v47  ;;  %8261 = vmatprep.subr.bf16.mxu0 %v8484_v13  ;;  %v7263_v0 = vcombine.low %v4902_v4, %v4916_v28  ;;  %v4925_v32 = vrot.slane %v4924_v1, 4  ;;  %v4929_v61 = vrot.slane %v4927_v29, 5  ;;  %v4943_v63 = vrot.slane %v4941_v14, 5  ;;  %v8485_v47 = vld [vmem:[%s11354_s3 + $0x1a8] sm:$0xff]   ;;  %v4799_v14 = vld [vmem:[#allocation2 + $0x80] sm:$0xf] }
 0x1fb   :  { %8177 = vmatprep.mubr.bf16.mxu1 %v7262_v9  ;;  %8222 = vmatpush3.bf16.msra.mxu1 %v8481_v22  ;;  %v4938_v25 = vor.u32 %v4937_v2, %v4934_v5  ;;  %v5349_v10 = vrot.slane %v10827_v17, 5  ;;  %v4946_v34 = vshrl.u32 %v4793_v36, 16  ;;  %v4949_v24 = vshll.u32 %v4793_v36, 16  ;;  %v5806_v22 = vld [vmem:[#allocation2 + $0x18] sm:$0xf] }
 0x1fc   :  { %8223 = vmatprep.subr.bf16.mxu1 %v8483_v15  ;;  %8214 = vmatmul.mubr.bf16.gmra.mxu0 %v7313_v43  ;;  %v5346_v44 = vsel %vm8864_vm5, %v7290_v21, %v5345_v49  ;;  %v4955_v33 = vshll.u32 %v10729_v23, 16  ;;  %v4960_v52 = vshrl.u32 %v4795_v16, 16  ;;  %v4963_v55 = vshll.u32 %v4795_v16, 16  ;;  %v8489_v16 = vld [vmem:[%s11354_s3 + $0x198] sm:$0xff]  }
 0x1fd   :  { %8217 = vmatprep.mubr.bf16.mxu0 %v7314_v38  ;;  %8262 = vmatpush3.bf16.msra.mxu0 %v8484_v13  ;;  %v4939_v40 = vrot.slane %v4938_v25, 4  ;;  %v5350_v48 = vsel %vm8864_vm5, %v7291_v7, %v5349_v10  ;;  %v4948_v19 = vrot.slane %v4946_v34, 4  ;;  %v4951_v43 = vrot.slane %v4949_v24, 5  ;;  %v4797_v13 = vld [vmem:[#allocation2 + $0x78] sm:$0xf] }
 0x1fe   :  { %v4930_v39 = vsel %vm8631_vm2, %v4925_v32, %v4929_v61  ;;  %8263 = vmatprep.subr.bf16.mxu0 %v8486_v50  ;;  %v7315_v23 = vcombine.low %v5346_v44, %v5350_v48  ;;  %v4962_v12 = vrot.slane %v4960_v52, 4  ;;  %v4965_v30 = vrot.slane %v4963_v55, 5  ;;  %v5808_v7 = vld [vmem:[#allocation2 + $0x20] sm:$0xf]  ;;  %v10879_v24 = vld [vmem:[#allocation2 + $0x24] sm:$0x1] }
 0x1ff   :  { %8224 = vmatpush3.bf16.msra.mxu1 %v8483_v15  ;;  %v4944_v9 = vsel %vm8631_vm2, %v4939_v40, %v4943_v63  ;;  %v4952_v41 = vor.u32 %v4951_v43, %v4948_v19  ;;  %v4969_v46 = vshll.u32 %v10750_v58, 16  ;;  %v5837_v18 = vshrl.u32 %v5804_v37, 16  ;;  %v5810_v52 = vld [vmem:[#allocation2 + $0x28] sm:$0xf]  ;;  %v8491_v19 = vld [vmem:[%s11354_s3 + $0x190] sm:$0xff]  }
 0x200   :  { %8225 = vmatprep.subr.bf16.mxu1 %v8485_v47  ;;  %v7264_v59 = vcombine.low %v4930_v39, %v4944_v9  ;;  %v4957_v57 = vrot.slane %v4955_v33, 5  ;;  %v4966_v6 = vor.u32 %v4965_v30, %v4962_v12  ;;  %v5840_v56 = vshll.u32 %v5804_v37, 16  ;;  %v10888_v39 = vld [vmem:[#allocation2 + $0x2c] sm:$0x1]  ;;  %v4801_v9 = vld [vmem:[#allocation2 + $0x88] sm:$0xf] }
 0x201   :  { %8264 = vmatpush3.bf16.msra.mxu0 %v8486_v50  ;;  %v4953_v4 = vrot.slane %v4952_v41, 4  ;;  %v5839_v60 = vrot.slane %v5837_v18, 4  ;;  %v5846_v53 = vshll.u32 %v10857_v54, 16  ;;  %v5851_v29 = vshrl.u32 %v5806_v22, 16 }
 0x202   :  { %8178 = vmatmul.mubr.bf16.gmra.mxu1 %v7263_v0  ;;  %8265 = vmatprep.subr.bf16.mxu0 %v8488_v20  ;;  %v4967_v36 = vrot.slane %v4966_v6, 4  ;;  %v4971_v45 = vrot.slane %v4969_v46, 5  ;;  %v5842_v58 = vrot.slane %v5840_v56, 5  ;;  %v5854_v38 = vshll.u32 %v5806_v22, 16 }
 0x203   :  { %8181 = vmatprep.mubr.bf16.mxu1 %v7264_v59  ;;  %8226 = vmatpush3.bf16.msra.mxu1 %v8485_v47  ;;  %v4958_v27 = vsel %vm8631_vm2, %v4953_v4, %v4957_v57  ;;  %v5853_v15 = vrot.slane %v5851_v29, 4  ;;  %v5860_v1 = vshll.u32 %v10865_v31, 16  ;;  %v4974_v21 = vshrl.u32 %v4797_v13, 16  ;;  %v4803_v59 = vld [vmem:[#allocation2 + $0x90] sm:$0xf]  ;;  %v8492_v4 = vld [vmem:[%s11354_s3 + $0x188] sm:$0xff]  }
 0x204   :  { %8227 = vmatprep.subr.bf16.mxu1 %v8487_v62  ;;  %8218 = vmatmul.mubr.bf16.gmra.mxu0 %v7315_v23  ;;  %v4972_v49 = vsel %vm8631_vm2, %v4967_v36, %v4971_v45  ;;  %v5843_v28 = vor.u32 %v5842_v58, %v5839_v60  ;;  %v5856_v5 = vrot.slane %v5854_v38, 5  ;;  %v4977_v2 = vshll.u32 %v4797_v13, 16 }
 0x205   :  { %v7265_v0 = vcombine.low %v4958_v27, %v4972_v49  ;;  %8266 = vmatpush3.bf16.msra.mxu0 %v8488_v20  ;;  %v5848_v32 = vrot.slane %v5846_v53, 5  ;;  %v5862_v61 = vrot.slane %v5860_v1, 5  ;;  %v4976_v63 = vrot.slane %v4974_v21, 4  ;;  %v5812_v21 = vld [vmem:[#allocation2 + $0x30] sm:$0xf] }
 0x206   :  { %v5844_v50 = vrot.slane %v5843_v28, 4  ;;  %v5857_v25 = vor.u32 %v5856_v5, %v5853_v15  ;;  %v4979_v10 = vrot.slane %v4977_v2, 5  ;;  %v4988_v34 = vshrl.u32 %v4799_v14, 16  ;;  %8267 = vmatprep.subr.bf16.mxu0 %v8490_v3  ;;  %v10901_v49 = vld [vmem:[#allocation2 + $0x34] sm:$0x1] }
 0x207   :  { %8228 = vmatpush3.bf16.msra.mxu1 %v8487_v62  ;;  %v4983_v47 = vshll.u32 %v10774_v51, 16  ;;  %v4991_v44 = vshll.u32 %v4799_v14, 16  ;;  %v4997_v33 = vshll.u32 %v10790_v11, 16  ;;  %v5865_v55 = vshrl.u32 %v5808_v7, 16 }
 0x208   :  { %8229 = vmatprep.subr.bf16.mxu1 %v8489_v16  ;;  %v5849_v37 = vsel %vm8631_vm2, %v5844_v50, %v5848_v32  ;;  %v5858_v40 = vrot.slane %v5857_v25, 4  ;;  %v4980_v48 = vor.u32 %v4979_v10, %v4976_v63  ;;  %v4990_v20 = vrot.slane %v4988_v34, 4  ;;  %v10909_v25 = vld [vmem:[#allocation2 + $0x3c] sm:$0x1] }
 0x209   :  { %v4993_v43 = vrot.slane %v4991_v44, 5  ;;  %8268 = vmatpush3.bf16.msra.mxu0 %v8490_v3  ;;  %v5867_v51 = vrot.slane %v5865_v55, 4  ;;  %v5868_v23 = vshll.u32 %v5808_v7, 16  ;;  %v5874_v30 = vshll.u32 %v10879_v24, 16  ;;  %v5814_v7 = vld [vmem:[#allocation2 + $0x38] sm:$0xf] }
 0x20a   :  { %8182 = vmatmul.mubr.bf16.gmra.mxu1 %v7265_v0  ;;  %v5863_v11 = vsel %vm8631_vm2, %v5858_v40, %v5862_v61  ;;  %v4981_v12 = vrot.slane %v4980_v48, 4  ;;  %v5879_v22 = vshrl.u32 %v5810_v52, 16  ;;  %v5882_v18 = vshll.u32 %v5810_v52, 16  ;;  %v8494_v0 = vld [vmem:[%s11354_s3 + $0x180] sm:$0xff]   ;;  %v60_v44 = vld [vmem:[#allocation2 + $0x48] sm:$0x1] }
 0x20b   :  { %v7372_v62 = vcombine.low %v5849_v37, %v5863_v11  ;;  %v4994_v41 = vor.u32 %v4993_v43, %v4990_v20  ;;  %8230 = vmatpush3.bf16.msra.mxu1 %v8489_v16  ;;  %v5870_v46 = vrot.slane %v5868_v23, 5  ;;  %v4985_v57 = vrot.slane %v4983_v47, 5  ;;  %v122_v40 = vld [vmem:[#allocation2 + $0x4c] sm:$0x1] }
 0x20c   :  { %v4999_v6 = vrot.slane %v4997_v33, 5  ;;  %8231 = vmatprep.subr.bf16.mxu1 %v8491_v19  ;;  %v5881_v56 = vrot.slane %v5879_v22, 4  ;;  %v5888_v13 = vshll.u32 %v10888_v39, 16  ;;  %v5884_v29 = vrot.slane %v5882_v18, 5 }
 0x20d   :  { %8269 = vmatprep.mubr.bf16.mxu0 %v7372_v62  ;;  %v4995_v60 = vrot.slane %v4994_v41, 4  ;;  %v5871_v53 = vor.u32 %v5870_v46, %v5867_v51  ;;  %v5002_v36 = vshrl.u32 %v4801_v9, 16  ;;  %v4986_v45 = vsel %vm8631_vm2, %v4981_v12, %v4985_v57  ;;  %v5816_v51 = vld [vmem:[#allocation2 + $0x40] sm:$0xf] }
 0x20e   :  { %v5876_v58 = vrot.slane %v5874_v30, 5  ;;  %v5005_v38 = vshll.u32 %v4801_v9, 16  ;;  %v5016_v3 = vshrl.u32 %v4803_v59, 16  ;;  %v5885_v1 = vor.u32 %v5884_v29, %v5881_v56  ;;  %v5820_v46 = vld [vmem:[#allocation2 + $0x60] sm:$0xf] }
 0x20f   :  { %v5000_v27 = vsel %vm8631_vm2, %v4995_v60, %v4999_v6  ;;  %8232 = vmatpush3.bf16.msra.mxu1 %v8491_v19  ;;  %v5872_v15 = vrot.slane %v5871_v53, 4  ;;  %v5004_v14 = vrot.slane %v5002_v36, 4  ;;  %v5890_v28 = vrot.slane %v5888_v13, 5  ;;  %v10925_v56 = vld [vmem:[#allocation2 + $0x44] sm:$0x1] }
 0x210   :  { %v7266_v16 = vcombine.low %v4986_v45, %v5000_v27  ;;  %v5007_v5 = vrot.slane %v5005_v38, 5  ;;  %v5011_v2 = vshll.u32 %v10812_v26, 16  ;;  %8233 = vmatprep.subr.bf16.mxu1 %v8492_v4  ;;  %v5886_v61 = vrot.slane %v5885_v1, 4 }
 0x211   :  { %v5877_v32 = vsel %vm8631_vm2, %v5872_v15, %v5876_v58  ;;  %v5018_v63 = vrot.slane %v5016_v3, 4  ;;  %v5019_v50 = vshll.u32 %v4803_v59, 16  ;;  %v5025_v34 = vshll.u32 %v10827_v17, 16  ;;  %v10918_v17 = vld [vmem:[%s11354_s3 + $0x238] sm:$0xff]   ;;  %v5822_v3 = vld [vmem:[#allocation2 + $0x68] sm:$0xf] }
 0x212   :  { %8185 = vmatprep.mubr.bf16.mxu1 %v7266_v16  ;;  %v5008_v10 = vor.u32 %v5007_v5, %v5004_v14  ;;  %v5893_v47 = vshrl.u32 %v5812_v21, 16  ;;  %v5896_v26 = vshll.u32 %v5812_v21, 16  ;;  %v5891_v33 = vsel %vm8631_vm2, %v5886_v61, %v5890_v28  ;;  %v8493_v58 = vld [vmem:[#allocation2 + $0x10] ss:$8 sps:$4 sm:$0xff]   ;;  %v10933_v16 = vld [vmem:[#allocation2 + $0x64] sm:$0x1] }
 0x213   :  { %v5021_v52 = vrot.slane %v5019_v50, 5  ;;  %v5902_v55 = vshll.u32 %v10901_v49, 16  ;;  %v5907_v37 = vshrl.u32 %v5814_v7, 16  ;;  %8234 = vmatpush3.bf16.msra.mxu1 %v8492_v4  ;;  %v7373_v48 = vcombine.low %v5877_v32, %v5891_v33 }
 0x214   :  { %v5009_v20 = vrot.slane %v5008_v10, 4  ;;  %v5895_v19 = vrot.slane %v5893_v47, 4  ;;  %v5898_v43 = vrot.slane %v5896_v26, 5  ;;  %8235 = vmatprep.subr.bf16.mxu1 %v8494_v0  ;;  %v5013_v23 = vrot.slane %v5011_v2, 5  ;;  %v10939_v10 = vld [vmem:[#allocation2 + $0x6c] sm:$0x1] }
 0x215   :  { %v5022_v11 = vor.u32 %v5021_v52, %v5018_v63  ;;  %v5909_v12 = vrot.slane %v5907_v37, 4  ;;  %v5910_v30 = vshll.u32 %v5814_v7, 16  ;;  %8270 = vmatmul.mubr.bf16.vlgmr.msra.gmra.mxu0 %v7373_v48  ;;  %v5027_v22 = vrot.slane %v5025_v34, 5  ;;  %v5826_v26 = vld [vmem:[#allocation2 + $0x78] sm:$0xf] }
 0x216   :  { %v5899_v9 = vor.u32 %v5898_v43, %v5895_v19  ;;  %v5916_v62 = vshll.u32 %v10909_v25, 16  ;;  %v61_v41 = vsel %vm9755_vm8, 0, %v60_v44  ;;  %v123_v6 = vsel %vm9762_vm10, 0, %v122_v40 }
 0x217   :  { %v5023_v18 = vrot.slane %v5022_v11, 4  ;;  %v5912_v59 = vrot.slane %v5910_v30, 5  ;;  %8236 = vmatpush3.bf16.msra.mxu1 %v8494_v0  ;;  %62 = vst [vmem:[#allocation2 + $0x48] sm:$0x1] %v61_v41  ;;  %v5921_v13 = vshrl.u32 %v5816_v51, 16  ;;  %v5014_v4 = vsel %vm8631_vm2, %v5009_v20, %v5013_v23 }
 0x218   :  { %v5900_v60 = vrot.slane %v5899_v9, 4  ;;  %v5904_v53 = vrot.slane %v5902_v55, 5  ;;  %124 = vst [vmem:[#allocation2 + $0x4c] sm:$0x1] %v123_v6  ;;  %v5924_v29 = vshll.u32 %v5816_v51, 16  ;;  %8285 = vmatprep.subr.bf16.mxu1 %v10918_v17  ;;  %v5949_v27 = vshrl.u32 %v5820_v46, 16 }
 0x219   :  { %v5028_v36 = vsel %vm8631_vm2, %v5023_v18, %v5027_v22  ;;  %v5913_v45 = vor.u32 %v5912_v59, %v5909_v12  ;;  %v5923_v38 = vrot.slane %v5921_v13, 4  ;;  %v5918_v1 = vrot.slane %v5916_v62, 5  ;;  %v5824_v0 = vld [vmem:[#allocation2 + $0x70] sm:$0xf]  ;;  %v8495_v11 = vld [vmem:[#allocation2 + $0x20] ss:$8 sps:$4 sm:$0xff]  }
 0x21a   :  { %v7267_v15 = vcombine.low %v5014_v4, %v5028_v36  ;;  %v5926_v14 = vrot.slane %v5924_v29, 5  ;;  %v5930_v21 = vshll.u32 %v10925_v56, 16  ;;  %v5905_v28 = vsel %vm8631_vm2, %v5900_v60, %v5904_v53  ;;  %v8498_v22 = vld [vmem:[%s11354_s3 + $0x230] sm:$0xff]   ;;  %v10951_v4 = vld [vmem:[#allocation2 + $0x7c] sm:$0x1] }
 0x21b   :  { %v5914_v5 = vrot.slane %v5913_v45, 4  ;;  %v5951_v2 = vrot.slane %v5949_v27, 4  ;;  %v5952_v7 = vshll.u32 %v5820_v46, 16  ;;  %v5963_v61 = vshrl.u32 %v5822_v3, 16  ;;  %v8497_v46 = vld [vmem:[#allocation2 + $0x30] ss:$8 sps:$4 sm:$0xff]  }
 0x21c   :  { %8186 = vmatmul.mubr.bf16.gmra.mxu1 %v7267_v15  ;;  %v5927_v32 = vor.u32 %v5926_v14, %v5923_v38  ;;  %v5966_v63 = vshll.u32 %v5822_v3, 16  ;;  %v5958_v47 = vshll.u32 %v10933_v16, 16  ;;  %v5977_v37 = vshrl.u32 %v5824_v0, 16  ;;  %v10949_v18 = vld [vmem:[#allocation2 + $0x74] sm:$0x1] }
 0x21d   :  { %v5919_v50 = vsel %vm8631_vm2, %v5914_v5, %v5918_v1  ;;  %8237 = vmatprep.mubr.bf16.mxu1 %v8493_v58  ;;  %v5954_v34 = vrot.slane %v5952_v7, 5  ;;  %v5965_v52 = vrot.slane %v5963_v61, 4  ;;  %v5932_v48 = vrot.slane %v5930_v21, 5  ;;  %v5828_v38 = vld [vmem:[#allocation2 + $0x80] sm:$0xf] }
 0x21e   :  { %v7374_v44 = vcombine.low %v5905_v28, %v5919_v50  ;;  %v5818_v33 = vld [vmem:[#allocation2 + $0x48] sm:$0xf]  ;;  %v5968_v55 = vrot.slane %v5966_v63, 5  ;;  %v5928_v51 = vrot.slane %v5927_v32, 4  ;;  %v5972_v30 = vshll.u32 %v10939_v10, 16 }
 0x21f   :  { %v10942_v40 = vld [vmem:[#allocation2 + $0x4c] sm:$0x1]  ;;  %v5935_v20 = vshrl.u32 %v5818_v33, 16  ;;  %v5938_v19 = vshll.u32 %v5818_v33, 16  ;;  %v5955_v43 = vor.u32 %v5954_v34, %v5951_v2  ;;  %v5980_v59 = vshll.u32 %v5824_v0, 16 }
 0x220   :  { %8273 = vmatprep.mubr.bf16.mxu0 %v7374_v44  ;;  %v5944_v23 = vshll.u32 %v10942_v40, 16  ;;  %v5969_v12 = vor.u32 %v5968_v55, %v5965_v52  ;;  %v5960_v6 = vrot.slane %v5958_v47, 5  ;;  %v5979_v60 = vrot.slane %v5977_v37, 4  ;;  %v5830_v14 = vld [vmem:[#allocation2 + $0x88] sm:$0xf] }
 0x221   :  { %v5937_v9 = vrot.slane %v5935_v20, 4  ;;  %v5940_v62 = vrot.slane %v5938_v19, 5  ;;  %v5956_v41 = vrot.slane %v5955_v43, 4  ;;  %v5991_v53 = vshrl.u32 %v5826_v26, 16  ;;  %v10960_v7 = vld [vmem:[#allocation2 + $0x84] sm:$0x1] }
 0x222   :  { %v5970_v13 = vrot.slane %v5969_v12, 4  ;;  %v5946_v36 = vrot.slane %v5944_v23, 5  ;;  %v5982_v45 = vrot.slane %v5980_v59, 5  ;;  %v5994_v58 = vshll.u32 %v5826_v26, 16  ;;  %v10964_v61 = vld [vmem:[#allocation2 + $0x8c] sm:$0x1] }
 0x223   :  { %v5941_v29 = vor.u32 %v5940_v62, %v5937_v9  ;;  %v5933_v3 = vsel %vm8631_vm2, %v5928_v51, %v5932_v48  ;;  %v5961_v27 = vsel %vm8631_vm2, %v5956_v41, %v5960_v6  ;;  %v5974_v15 = vrot.slane %v5972_v30, 5  ;;  %v90_v33 = vld [vmem:[#allocation2 + $0x98] sm:$0x1]  ;;  %v152_v52 = vld [vmem:[#allocation2 + $0x9c] sm:$0x1]  ;;  %v8502_v62 = vld [vmem:[%s11354_s3 + $0x220] sm:$0xff]  }
 0x224   :  { %8238 = vmatmul.mubr.bf16.vlgmr.msra.gmra.mxu1 %v8495_v11  ;;  %v5993_v1 = vrot.slane %v5991_v53, 4  ;;  %v5986_v28 = vshll.u32 %v10949_v18, 16  ;;  %v5996_v5 = vrot.slane %v5994_v58, 5  ;;  %v6000_v2 = vshll.u32 %v10951_v4, 16  ;;  %v5832_v19 = vld [vmem:[#allocation2 + $0x90] sm:$0xf] }
 0x225   :  { %v5942_v21 = vrot.slane %v5941_v29, 4  ;;  %8241 = vmatprep.mubr.bf16.mxu1 %v8497_v46  ;;  %8286 = vmatpush3.bf16.msra.mxu1 %v10918_v17  ;;  %v5975_v0 = vsel %vm8631_vm2, %v5970_v13, %v5974_v15  ;;  %v5983_v32 = vor.u32 %v5982_v45, %v5979_v60  ;;  %v6005_v63 = vshrl.u32 %v5828_v38, 16  ;;  %v8500_v17 = vld [vmem:[%s11354_s3 + $0x228] sm:$0xff]  }
 0x226   :  { %8287 = vmatprep.subr.bf16.mxu1 %v8498_v22  ;;  %v6008_v50 = vshll.u32 %v5828_v38, 16  ;;  %v7376_v47 = vcombine.low %v5961_v27, %v5975_v0  ;;  %v5997_v26 = vor.u32 %v5996_v5, %v5993_v1  ;;  %v6019_v44 = vshrl.u32 %v5830_v14, 16  ;;  %v8499_v30 = vld [vmem:[#allocation2 + $0x40] ss:$8 sps:$4 sm:$0xff]   ;;  %v8504_v38 = vld [vmem:[%s11354_s3 + $0x218] sm:$0xff]  }
 0x227   :  { %v5947_v34 = vsel %vm8631_vm2, %v5942_v21, %v5946_v36  ;;  %v6007_v37 = vrot.slane %v6005_v63, 4  ;;  %v6014_v20 = vshll.u32 %v10960_v7, 16  ;;  %v6002_v51 = vrot.slane %v6000_v2, 5  ;;  %v8501_v6 = vld [vmem:[#allocation2 + $0x60] ss:$8 sps:$4 sm:$0xff]  }
 0x228   :  { %v7375_v55 = vcombine.low %v5933_v3, %v5947_v34  ;;  %v6010_v48 = vrot.slane %v6008_v50, 5  ;;  %v5998_v43 = vrot.slane %v5997_v26, 4  ;;  %v6021_v23 = vrot.slane %v6019_v44, 4  ;;  %v10989_v21 = vld [vmem:[#allocation2 + $0x94] sm:$0x1] }
 0x229   :  { %8288 = vmatpush3.bf16.msra.mxu1 %v8498_v22  ;;  %v6022_v11 = vshll.u32 %v5830_v14, 16  ;;  %v5984_v12 = vrot.slane %v5983_v32, 4  ;;  %v91_v41 = vsel %vm9755_vm8, 0, %v90_v33  ;;  %v153_v46 = vsel %vm9762_vm10, 0, %v152_v52  ;;  %v8503_v0 = vld [vmem:[#allocation2 + $0x70] ss:$8 sps:$4 sm:$0xff]  }
 0x22a   :  { %8274 = vmatmul.mubr.bf16.gmra.mxu0 %v7375_v55  ;;  %v6011_v9 = vor.u32 %v6010_v48, %v6007_v37  ;;  %8289 = vmatprep.subr.bf16.mxu1 %v8500_v17  ;;  %v6028_v59 = vshll.u32 %v10964_v61, 16  ;;  %92 = vst [vmem:[#allocation2 + $0x98] sm:$0x1] %v91_v41  ;;  %154 = vst [vmem:[#allocation2 + $0x9c] sm:$0x1] %v153_v46  ;;  %v6033_v13 = vshrl.u32 %v5832_v19, 16 }
 0x22b   :  { %8277 = vmatprep.mubr.bf16.mxu0 %v7376_v47  ;;  %v6024_v22 = vrot.slane %v6022_v11, 5  ;;  %v6036_v60 = vshll.u32 %v5832_v19, 16  ;;  %v5988_v53 = vrot.slane %v5986_v28, 5  ;;  %v6016_v36 = vrot.slane %v6014_v20, 5  ;;  %v8506_v28 = vld [vmem:[%s11354_s3 + $0x210] sm:$0xff]  }
 0x22c   :  { %8242 = vmatmul.mubr.bf16.gmra.mxu1 %v8499_v30  ;;  %v6012_v29 = vrot.slane %v6011_v9, 4  ;;  %v6003_v42 = vsel %vm8631_vm2, %v5998_v43, %v6002_v51  ;;  %v6035_v57 = vrot.slane %v6033_v13, 4  ;;  %v6030_v1 = vrot.slane %v6028_v59, 5  ;;  %v8505_v32 = vld [vmem:[#allocation2 + $0x80] ss:$8 sps:$4 sm:$0xff]  }
 0x22d   :  { %v6025_v45 = vor.u32 %v6024_v22, %v6021_v23  ;;  %8245 = vmatprep.mubr.bf16.mxu1 %v8501_v6  ;;  %8290 = vmatpush3.bf16.msra.mxu1 %v8500_v17  ;;  %v6038_v58 = vrot.slane %v6036_v60, 5  ;;  %v5989_v3 = vsel %vm8631_vm2, %v5984_v12, %v5988_v53  ;;  %v6270_v63 = vld [vmem:[#allocation2 + $0x10] sm:$0xe]  ;;  %v6042_v47 = vshll.u32 %v10989_v21, 16  ;;  %v6271_v52 = vld [vmem:[#allocation2 + $0x18] sm:$0xe] }
 0x22e   :  { %8291 = vmatprep.subr.bf16.mxu1 %v8502_v62  ;;  %v6017_v27 = vsel %vm8631_vm2, %v6012_v29, %v6016_v36  ;;  %v7377_v14 = vcombine.low %v5989_v3, %v6003_v42  ;;  %v7388_v55 = vrot.slane %v6270_v63, 9  ;;  %v6320_v37 = vrot.slane %v10857_v54, 5  ;;  %v8508_v43 = vld [vmem:[%s11354_s3 + $0x208] sm:$0xff]   ;;  %v6274_v46 = vld [vmem:[#allocation2 + $0x30] sm:$0xe] }
 0x22f   :  { %v6026_v15 = vrot.slane %v6025_v45, 4  ;;  %v6039_v2 = vor.u32 %v6038_v58, %v6035_v57  ;;  %v7389_v51 = vrot.slane %v6271_v52, 9  ;;  %v6324_v23 = vrot.slane %v10865_v31, 5  ;;  %v6273_v54 = vld [vmem:[#allocation2 + $0x28] sm:$0xe]  ;;  %v8509_v31 = vld [vmem:[%s11354_s3 + $0x200] sm:$0xff]  }
 0x230   :  { %v6044_v11 = vrot.slane %v6042_v47, 5  ;;  %v6321_v9 = vsel %vm8864_vm5, %v7388_v55, %v6320_v37  ;;  %v6272_v6 = vld [vmem:[#allocation2 + $0x20] sm:$0xe]  ;;  %v7391_v53 = vrot.slane %v6273_v54, 9  ;;  %v6332_v29 = vrot.slane %v10888_v39, 5 }
 0x231   :  { %v6031_v5 = vsel %vm8631_vm2, %v6026_v15, %v6030_v1  ;;  %8292 = vmatpush3.bf16.msra.mxu1 %v8502_v62  ;;  %v5834_v17 = vld [vmem:[#allocation2 + $0x98] sm:$0xf]  ;;  %v10996_v34 = vld [vmem:[#allocation2 + $0x9c] sm:$0x1]  ;;  %v6040_v48 = vrot.slane %v6039_v2, 4  ;;  %v6325_v59 = vsel %vm8864_vm5, %v7389_v51, %v6324_v23  ;;  %v7392_v45 = vrot.slane %v6274_v46, 9 }
 0x232   :  { %8278 = vmatmul.mubr.bf16.gmra.mxu0 %v7377_v14  ;;  %v7378_v50 = vcombine.low %v6017_v27, %v6031_v5  ;;  %8293 = vmatprep.subr.bf16.mxu1 %v8504_v38  ;;  %v6047_v26 = vshrl.u32 %v5834_v17, 16  ;;  %v6050_v44 = vshll.u32 %v5834_v17, 16  ;;  %v6056_v33 = vshll.u32 %v10996_v34, 16  ;;  %v8507_v22 = vld [vmem:[#allocation2 + $0x90] ss:$8 sps:$4 sm:$0xff]  }
 0x233   :  { %v6045_v62 = vsel %vm8631_vm2, %v6040_v48, %v6044_v11  ;;  %v7420_v60 = vcombine.low %v6321_v9, %v6325_v59  ;;  %v6275_v36 = vld [vmem:[#allocation2 + $0x38] sm:$0xe]  ;;  %v6336_v57 = vrot.slane %v10901_v49, 5  ;;  %v7390_v58 = vrot.slane %v6272_v6, 9  ;;  %v6276_v39 = vld [vmem:[#allocation2 + $0x40] sm:$0xe] }
 0x234   :  { %8281 = vmatprep.mubr.bf16.mxu0 %v7378_v50  ;;  %8246 = vmatmul.mubr.bf16.gmra.mxu1 %v8503_v0  ;;  %v6049_v20 = vrot.slane %v6047_v26, 4  ;;  %v6052_v19 = vrot.slane %v6050_v44, 5  ;;  %v6058_v30 = vrot.slane %v6056_v33, 5  ;;  %v7393_v3 = vrot.slane %v6275_v36, 9  ;;  %v6277_v1 = vld [vmem:[#allocation2 + $0x48] sm:$0xe] }
 0x235   :  { %8249 = vmatprep.mubr.bf16.mxu1 %v8505_v32  ;;  %8294 = vmatpush3.bf16.msra.mxu1 %v8504_v38  ;;  %v6328_v38 = vrot.slane %v10879_v24, 5  ;;  %v6340_v8 = vrot.slane %v10909_v25, 5  ;;  %v6333_v27 = vsel %vm8864_vm5, %v7391_v53, %v6332_v29  ;;  %v6337_v15 = vsel %vm8864_vm5, %v7392_v45, %v6336_v57  ;;  %v6278_v14 = vld [vmem:[#allocation2 + $0x60] sm:$0xe]  ;;  %v6279_v63 = vld [vmem:[#allocation2 + $0x68] sm:$0xe] }
 0x236   :  { %8295 = vmatprep.subr.bf16.mxu1 %v8506_v28  ;;  %v6053_v12 = vor.u32 %v6052_v19, %v6049_v20  ;;  %v7394_v5 = vrot.slane %v6276_v39, 9  ;;  %v6344_v25 = vrot.slane %v10925_v56, 5  ;;  %v7395_v0 = vrot.slane %v6277_v1, 9  ;;  %v6281_v52 = vld [vmem:[#allocation2 + $0x78] sm:$0xe] }
 0x237   :  { %v6329_v49 = vsel %vm8864_vm5, %v7390_v58, %v6328_v38  ;;  %v6341_v24 = vsel %vm8864_vm5, %v7393_v3, %v6340_v8  ;;  %v6348_v32 = vrot.slane %v10942_v40, 5  ;;  %v7396_v50 = vrot.slane %v6278_v14, 9  ;;  %v6282_v40 = vld [vmem:[#allocation2 + $0x80] sm:$0xe]  ;;  %v6283_v19 = vld [vmem:[#allocation2 + $0x88] sm:$0xe] }
 0x238   :  { %v6054_v41 = vrot.slane %v6053_v12, 4  ;;  %v7422_v2 = vcombine.low %v6337_v15, %v6341_v24  ;;  %v6352_v17 = vrot.slane %v10933_v16, 5  ;;  %v7397_v47 = vrot.slane %v6279_v63, 9  ;;  %v6280_v16 = vld [vmem:[#allocation2 + $0x70] sm:$0xe] }
 0x239   :  { %8296 = vmatpush3.bf16.msra.mxu1 %v8506_v28  ;;  %v7421_v28 = vcombine.low %v6329_v49, %v6333_v27  ;;  %v6356_v26 = vrot.slane %v10939_v10, 5  ;;  %v6345_v44 = vsel %vm8864_vm5, %v7394_v5, %v6344_v25  ;;  %v6349_v33 = vsel %vm8864_vm5, %v7395_v0, %v6348_v32  ;;  %v6284_v54 = vld [vmem:[#allocation2 + $0x90] sm:$0xe] }
 0x23a   :  { %8297 = vmatprep.subr.bf16.mxu1 %v8508_v43  ;;  %v6059_v13 = vsel %vm8631_vm2, %v6054_v41, %v6058_v30  ;;  %v6353_v56 = vsel %vm8864_vm5, %v7396_v50, %v6352_v17  ;;  %v7423_v55 = vcombine.low %v6345_v44, %v6349_v33  ;;  %v7399_v20 = vrot.slane %v6281_v52, 9 }
 0x23b   :  { %v7379_v42 = vcombine.low %v6045_v62, %v6059_v13  ;;  %v6357_v37 = vsel %vm8864_vm5, %v7397_v47, %v6356_v26  ;;  %v6364_v10 = vrot.slane %v10951_v4, 5  ;;  %v6368_v51 = vrot.slane %v10960_v7, 5  ;;  %v6285_v4 = vld [vmem:[#allocation2 + $0x98] sm:$0xe] }
 0x23c   :  { %8250 = vmatmul.mubr.bf16.gmra.mxu1 %v8507_v22  ;;  %v7424_v48 = vcombine.low %v6353_v56, %v6357_v37  ;;  %v7398_v23 = vrot.slane %v6280_v16, 9  ;;  %v6360_v11 = vrot.slane %v10949_v18, 5  ;;  %v7401_v12 = vrot.slane %v6283_v19, 9 }
 0x23d   :  { %8298 = vmatpush3.bf16.msra.mxu1 %v8508_v43  ;;  %8301 = vmatprep.mubr.bf16.mxu1 %v7420_v60  ;;  %v7400_v43 = vrot.slane %v6282_v40, 9  ;;  %v6372_v30 = vrot.slane %v10964_v61, 5  ;;  %v6365_v9 = vsel %vm8864_vm5, %v7399_v20, %v6364_v10  ;;  %v7402_v22 = vrot.slane %v6284_v54, 9 }
 0x23e   :  { %8282 = vmatmul.mubr.bf16.gmra.mxu0 %v7379_v42  ;;  %8299 = vmatprep.subr.bf16.mxu1 %v8509_v31  ;;  %v6361_v41 = vsel %vm8864_vm5, %v7398_v23, %v6360_v11  ;;  %v6376_v59 = vrot.slane %v10989_v21, 5  ;;  %v7403_v61 = vrot.slane %v6285_v4, 9 }
 0x23f   :  { %v6369_v62 = vsel %vm8864_vm5, %v7400_v43, %v6368_v51  ;;  %v7425_v46 = vcombine.low %v6361_v41, %v6365_v9  ;;  %v6373_v7 = vsel %vm8864_vm5, %v7401_v12, %v6372_v30 }
 0x240   :  { %v7426_v18 = vcombine.low %v6369_v62, %v6373_v7  ;;  %v6377_v6 = vsel %vm8864_vm5, %v7402_v22, %v6376_v59 }
 0x241   :  { %8300 = vmatpush3.bf16.msra.mxu1 %v8509_v31  ;;  %v6380_v31 = vrot.slane %v10996_v34, 5 }
 0x243   :  { %v6381_v13 = vsel %vm8864_vm5, %v7403_v61, %v6380_v31 }
 0x244   :  { %8302 = vmatmul.mubr.bf16.vlgmr.msra.gmra.mxu1 %v7421_v28  ;;  %v7427_v60 = vcombine.low %v6377_v6, %v6381_v13 }
 0x245   :  { %8305 = vmatprep.mubr.bf16.mxu1 %v7422_v2 }
 0x24c   :  { %8306 = vmatmul.mubr.bf16.gmra.mxu1 %v7423_v55 }
 0x24d   :  { %8309 = vmatprep.mubr.bf16.mxu1 %v7424_v48 }
 0x254   :  { %8310 = vmatmul.mubr.bf16.gmra.mxu1 %v7425_v46 }
 0x255   :  { %8313 = vmatprep.mubr.bf16.mxu1 %v7426_v18 }
 0x25c   :  { %8314 = vmatmul.mubr.bf16.gmra.mxu1 %v7427_v60 }
 0x264   :  { %v8079_v53 = vpop.f32.mrf.mxu0 }
 0x266   :  { %v4146_v29 = vpop.f32.mrf.mxu0 }
 0x268   :  { %v8080_v36 = vpop.f32.mrf.mxu0 }
 0x26a   :  { %v4149_v42 = vpop.f32.mrf.mxu0 }
 0x26d   :  { %v8083_v45 = vpop.f32.mrf.mxu0 }
 0x26f   :  { %v4162_v57 = vpop.f32.mrf.mxu0 }
 0x271   :  { %v8084_v21 = vpop.f32.mrf.mxu0 }
 0x273   :  { %v4165_v58 = vpop.f32.mrf.mxu0 }
 0x278   :  { %v8047_v38 = vpop.f32.mrf.mxu1 }
 0x279   :  { %v4155_v34 = vadd.f32 %v8079_v53, %v8047_v38 }
 0x27a   :  { %v3953_v3 = vpop.f32.mrf.mxu1  ;;  %v8087_v8 = vpop.f32.mrf.mxu0 }
 0x27b   :  { %v4147_v27 = vadd.f32 %v4146_v29, %v3953_v3 }
 0x27c   :  { %v8048_v39 = vpop.f32.mrf.mxu1  ;;  %v4178_v15 = vpop.f32.mrf.mxu0 }
 0x27d   :  { %v4158_v1 = vadd.f32 %v8080_v36, %v8048_v39 }
 0x27e   :  { %v3956_v35 = vpop.f32.mrf.mxu1  ;;  %v8088_v49 = vpop.f32.mrf.mxu0 }
 0x27f   :  { %v4150_v14 = vadd.f32 %v4149_v42, %v3956_v35 }
 0x280   :  { %v4181_v28 = vpop.f32.mrf.mxu0 }
 0x281   :  { %v8051_v24 = vpop.f32.mrf.mxu1 }
 0x282   :  { %v4171_v5 = vadd.f32 %v8083_v45, %v8051_v24  ;;  %v8091_v2 = vpop.f32.mrf.mxu0 }
 0x283   :  { %v3969_v25 = vpop.f32.mrf.mxu1 }
 0x284   :  { %v4163_v0 = vadd.f32 %v4162_v57, %v3969_v25  ;;  %v4194_v32 = vpop.f32.mrf.mxu0 }
 0x285   :  { %v8052_v63 = vpop.f32.mrf.mxu1 }
 0x286   :  { %v4174_v50 = vadd.f32 %v8084_v21, %v8052_v63  ;;  %v8092_v17 = vpop.f32.mrf.mxu0 }
 0x287   :  { %v3972_v47 = vpop.f32.mrf.mxu1 }
 0x288   :  { %v4166_v26 = vadd.f32 %v4165_v58, %v3972_v47  ;;  %v4197_v44 = vpop.f32.mrf.mxu0 }
 0x28a   :  { %v8055_v33 = vpop.f32.mrf.mxu1  ;;  %v11058_v56 = vpop.f32.mrf.mxu0 }
 0x28b   :  { %v4187_v52 = vadd.f32 %v8087_v8, %v8055_v33 }
 0x28c   :  { %v3985_v40 = vpop.f32.mrf.mxu1  ;;  %v11060_v55 = vpop.f32.mrf.mxu0 }
 0x28d   :  { %v4179_v37 = vadd.f32 %v4178_v15, %v3985_v40 }
 0x28e   :  { %v8056_v16 = vpop.f32.mrf.mxu1  ;;  %v11062_v48 = vpop.f32.mrf.mxu0 }
 0x28f   :  { %v4190_v20 = vadd.f32 %v8088_v49, %v8056_v16 }
 0x290   :  { %v3988_v10 = vpop.f32.mrf.mxu1  ;;  %v11064_v19 = vpop.f32.mrf.mxu0 }
 0x291   :  { %v4182_v43 = vadd.f32 %v4181_v28, %v3988_v10 }
 0x292   :  { %v8059_v51 = vpop.f32.mrf.mxu1  ;;  %v11066_v23 = vpop.f32.mrf.mxu0 }
 0x293   :  { %v4203_v11 = vadd.f32 %v8091_v2, %v8059_v51 }
 0x294   :  { %v4001_v12 = vpop.f32.mrf.mxu1  ;;  %v11068_v30 = vpop.f32.mrf.mxu0 }
 0x295   :  { %v4195_v9 = vadd.f32 %v4194_v32, %v4001_v12 }
 0x296   :  { %v8060_v54 = vpop.f32.mrf.mxu1  ;;  %v11070_v62 = vpop.f32.mrf.mxu0 }
 0x297   :  { %v4206_v4 = vadd.f32 %v8092_v17, %v8060_v54 }
 0x298   :  { %v4004_v41 = vpop.f32.mrf.mxu1  ;;  %v11072_v46 = vpop.f32.mrf.mxu0 }
 0x299   :  { %v4198_v7 = vadd.f32 %v4197_v44, %v4004_v41 }
 0x29a   :  { %v8111_v22 = vpop.f32.mrf.mxu1  ;;  %v11074_v18 = vpop.f32.mrf.mxu0 }
 0x29b   :  { %v11076_v59 = vadd.f32 %v8111_v22, %v4155_v34 }
 0x29c   :  { %v4452_v61 = vpop.f32.mrf.mxu1  ;;  %v11078_v31 = vpop.f32.mrf.mxu0 }
 0x29d   :  { %v11080_v6 = vadd.f32 %v4452_v61, %v4147_v27 }
 0x29e   :  { %v8112_v13 = vpop.f32.mrf.mxu1  ;;  %v11082_v60 = vpop.f32.mrf.mxu0 }
 0x29f   :  { %v11084_v53 = vadd.f32 %v8112_v13, %v4158_v1 }
 0x2a0   :  { %v4455_v29 = vpop.f32.mrf.mxu1  ;;  %v11086_v36 = vpop.f32.mrf.mxu0 }
 0x2a1   :  { %11449 = vst [vmem:[#allocation11_spill] sm:$0xff] %v11086_v36  ;;  %v11088_v42 = vadd.f32 %v4455_v29, %v4150_v14  ;;  %v4760_v36 = vadd.f32 %v11062_v48, %v11084_v53 }
 0x2a2   :  { %v8115_v45 = vpop.f32.mrf.mxu1  ;;  %v11090_v57 = vpop.f32.mrf.mxu0 }
 0x2a3   :  { %11450 = vst [vmem:[#allocation7_spill] sm:$0xff] %v11090_v57  ;;  %v11092_v21 = vadd.f32 %v8115_v45, %v4171_v5 }
 0x2a4   :  { %v4468_v58 = vpop.f32.mrf.mxu1  ;;  %v11094_v38 = vpop.f32.mrf.mxu0 }
 0x2a5   :  { %11451 = vst [vmem:[#allocation8_spill] sm:$0xff] %v11094_v38  ;;  %v11096_v34 = vadd.f32 %v4468_v58, %v4163_v0 }
 0x2a6   :  { %v8116_v3 = vpop.f32.mrf.mxu1  ;;  %v11098_v8 = vpop.f32.mrf.mxu0 }
 0x2a7   :  { %11452 = vst [vmem:[#allocation9_spill] sm:$0xff] %v11098_v8  ;;  %v11100_v27 = vadd.f32 %v8116_v3, %v4174_v50  ;;  %v4761_v53 = vadd.f32 %v11068_v30, %v11096_v34 }
 0x2a8   :  { %v4471_v39 = vpop.f32.mrf.mxu1  ;;  %v11102_v15 = vpop.f32.mrf.mxu0 }
 0x2a9   :  { %11453 = vst [vmem:[#allocation3_spill] sm:$0xff] %v11102_v15  ;;  %v11104_v1 = vadd.f32 %v4471_v39, %v4166_v26 }
 0x2aa   :  { %v8119_v35 = vpop.f32.mrf.mxu1 }
 0x2ab   :  { %v11106_v49 = vadd.f32 %v8119_v35, %v4187_v52  ;;  %v4762_v30 = vadd.f32 %v11072_v46, %v11104_v1 }
 0x2ac   :  { %v4484_v14 = vpop.f32.mrf.mxu1  ;;  %v11108_v28 = vpop.f32.mrf.mxu0 }
 0x2ad   :  { %v11110_v24 = vadd.f32 %v4484_v14, %v4179_v37 }
 0x2ae   :  { %v8120_v5 = vpop.f32.mrf.mxu1  ;;  %v11112_v2 = vpop.f32.mrf.mxu0 }
 0x2af   :  { %v11114_v25 = vadd.f32 %v8120_v5, %v4190_v20 }
 0x2b0   :  { %v4487_v0 = vpop.f32.mrf.mxu1  ;;  %v11116_v32 = vpop.f32.mrf.mxu0 }
 0x2b1   :  { %v11118_v63 = vadd.f32 %v4487_v0, %v4182_v43 }
 0x2b2   :  { %v8123_v50 = vpop.f32.mrf.mxu1  ;;  %v11120_v17 = vpop.f32.mrf.mxu0 }
 0x2b3   :  { %11454 = vst [vmem:[#allocation10_spill] sm:$0xff] %v11118_v63  ;;  %v11122_v47 = vadd.f32 %v8123_v50, %v4203_v11 }
 0x2b4   :  { %v4500_v26 = vpop.f32.mrf.mxu1  ;;  %v11124_v44 = vpop.f32.mrf.mxu0 }
 0x2b5   :  { %11455 = vst [vmem:[#allocation12_spill] sm:$0xff] %v11122_v47  ;;  %v11126_v33 = vadd.f32 %v4500_v26, %v4195_v9 }
 0x2b6   :  { %v8124_v52 = vpop.f32.mrf.mxu1  ;;  %v11130_v16 = vpop.f32.mrf.mxu0 }
 0x2b7   :  { %11456 = vst [vmem:[#allocation22_spill] sm:$0xff] %v11126_v33  ;;  %v11128_v40 = vadd.f32 %v8124_v52, %v4206_v4 }
 0x2b8   :  { %v4503_v37 = vpop.f32.mrf.mxu1  ;;  %v11134_v51 = vpop.f32.mrf.mxu0 }
 0x2b9   :  { %11457 = vst [vmem:[#allocation23_spill] sm:$0xff] %v11128_v40  ;;  %v11132_v20 = vadd.f32 %v4503_v37, %v4198_v7 }
 0x2ba   :  { %v8175_v10 = vpop.f32.mrf.mxu1  ;;  %v11136_v11 = vpop.f32.mrf.mxu0 }
 0x2bb   :  { %11458 = vst [vmem:[#allocation4_spill] sm:$0xff] %v11132_v20 }
 0x2bc   :  { %v5160_v43 = vpop.f32.mrf.mxu1  ;;  %v11138_v22 = vpop.f32.mrf.mxu0 }
 0x2bd   :  { %11459 = vst [vmem:[#allocation13_spill] sm:$0xff] %v11138_v22 }
 0x2be   :  { %v8176_v12 = vpop.f32.mrf.mxu1  ;;  %v11142_v4 = vpop.f32.mrf.mxu0 }
 0x2bf   :  { %11460 = vst [vmem:[#allocation14_spill] sm:$0xff] %v11142_v4  ;;  %v5226_v63 = vadd.f32 %v8176_v12, %v4760_v36 }
 0x2c0   :  { %v5163_v54 = vpop.f32.mrf.mxu1  ;;  %v11146_v7 = vpop.f32.mrf.mxu0 }
 0x2c1   :  { %11461 = vst [vmem:[#allocation15_spill] sm:$0xff] %v11146_v7 }
 0x2c2   :  { %v8179_v41 = vpop.f32.mrf.mxu1  ;;  %v11150_v45 = vpop.f32.mrf.mxu0 }
 0x2c3   :  { %11462 = vst [vmem:[#allocation16_spill] sm:$0xff] %v11150_v45 }
 0x2c4   :  { %v5176_v9 = vpop.f32.mrf.mxu1  ;;  %v11154_v3 = vpop.f32.mrf.mxu0 }
 0x2c5   :  { %11463 = vst [vmem:[#allocation17_spill] sm:$0xff] %v11154_v3 }
 0x2c6   :  { %v11140_v61 = vpop.f32.mrf.mxu1  ;;  %v11158_v35 = vpop.f32.mrf.mxu0 }
 0x2c7   :  { %11464 = vst [vmem:[#allocation18_spill] sm:$0xff] %v11158_v35 }
 0x2c8   :  { %v11144_v13 = vpop.f32.mrf.mxu1  ;;  %v11162_v5 = vpop.f32.mrf.mxu0 }
 0x2c9   :  { %11466 = vst [vmem:[#allocation20_spill] sm:$0xff] %v11162_v5 }
 0x2ca   :  { %v11148_v29 = vpop.f32.mrf.mxu1  ;;  %v11168_v26 = vpop.f32.mrf.mxu0 }
 0x2cb   :  { %11469 = vst [vmem:[#allocation25_spill] sm:$0xff] %v11168_v26 }
 0x2cc   :  { %v11152_v58 = vpop.f32.mrf.mxu1 }
 0x2ce   :  { %v11156_v39 = vpop.f32.mrf.mxu1 }
 0x2d0   :  { %v11160_v14 = vpop.f32.mrf.mxu1 }
 0x2d1   :  { %11465 = vst [vmem:[#allocation19_spill] sm:$0xff] %v11160_v14  ;;  %v4757_v14 = vadd.f32 %v11060_v55, %v11080_v6 }
 0x2d5   :  { %v8271_v15 = vpop.f32.mrf.mxu0 }
 0x2d7   :  { %v6191_v45 = vpop.f32.mrf.mxu0 }
 0x2d9   :  { %v8272_v40 = vpop.f32.mrf.mxu0 }
 0x2db   :  { %v11174_v5 = vpop.f32.mrf.mxu0 }
 0x2dc   :  { %v11164_v0 = vpop.f32.mrf.mxu1 }
 0x2dd   :  { %11467 = vst [vmem:[#allocation21_spill] sm:$0xff] %v11164_v0  ;;  %v4759_v0 = vadd.f32 %v11058_v56, %v11076_v59  ;;  %v4758_v56 = vadd.f32 %v11064_v19, %v11088_v42  ;;  %v5548_v42 = vadd.f32 %v11116_v32, %v5226_v63 }
 0x2de   :  { %v11166_v50 = vpop.f32.mrf.mxu1 }
 0x2df   :  { %11468 = vst [vmem:[#allocation24_spill] sm:$0xff] %v11166_v50  ;;  %v5225_v47 = vadd.f32 %v8175_v10, %v4759_v0  ;;  %v4763_v10 = vadd.f32 %v11066_v23, %v11092_v21  ;;  %v5224_v6 = vadd.f32 %v5163_v54, %v4758_v56  ;;  %v4764_v23 = vadd.f32 %v11070_v62, %v11100_v27  ;;  %v11231_v62 = vld [vmem:[%s11356_s4] ss:$0 sm:$0xff] }
 0x2e0   :  { %v11170_v52 = vpop.f32.mrf.mxu1 }
 0x2e1   :  { %11470 = vst [vmem:[#allocation26_spill] sm:$0xff] %v11170_v52  ;;  %v5547_v59 = vadd.f32 %v11108_v28, %v5225_v47  ;;  %v5229_v48 = vadd.f32 %v8179_v41, %v4763_v10  ;;  %v5227_v28 = vadd.f32 %v5176_v9, %v4761_v53  ;;  %v5230_v54 = vadd.f32 %v11140_v61, %v4764_v23 }
 0x2e2   :  { %v11172_v37 = vpop.f32.mrf.mxu1 }
 0x2e3   :  { %11471 = vst [vmem:[#allocation27_spill] sm:$0xff] %v11172_v37  ;;  %v5549_v46 = vadd.f32 %v11130_v16, %v5227_v28 }
 0x2e4   :  { %v8239_v3 = vpop.f32.mrf.mxu1 }
 0x2e6   :  { %v5725_v20 = vpop.f32.mrf.mxu1 }
 0x2e8   :  { %v8240_v8 = vpop.f32.mrf.mxu1 }
 0x2e9   :  { %v5791_v47 = vadd.f32 %v8240_v8, %v5548_v42 }
 0x2ea   :  { %v5728_v35 = vpop.f32.mrf.mxu1  ;;  %v11180_v26 = vpop.f32.mrf.mxu0 }
 0x2eb   :  { %v6257_v61 = vadd.f32 %v8272_v40, %v5791_v47  ;;  %v4768_v40 = vadd.f32 %v11082_v60, %v11114_v25  ;;  %v11480_v47 = vld [vmem:[#allocation12_spill] sm:$0xff] }
 0x2ec   :  { %v8243_v7 = vpop.f32.mrf.mxu1  ;;  %v11188_v4 = vpop.f32.mrf.mxu0 }
 0x2ee   :  { %v5741_v38 = vpop.f32.mrf.mxu1 }
 0x2f0   :  { %v11176_v33 = vpop.f32.mrf.mxu1 }
 0x2f2   :  { %v11178_v50 = vpop.f32.mrf.mxu1 }
 0x2f3   :  { %11472 = vst [vmem:[#allocation29_spill] sm:$0xff] %v11178_v50  ;;  %v5223_v50 = vadd.f32 %v5160_v43, %v4757_v14  ;;  %v5790_v43 = vadd.f32 %v8239_v3, %v5547_v59 }
 0x2f4   :  { %v11182_v52 = vpop.f32.mrf.mxu1 }
 0x2f5   :  { %11473 = vst [vmem:[#allocation28_spill] sm:$0xff] %v11182_v52  ;;  %v11198_v52 = vpop.f32.mrf.mxu0  ;;  %v5545_v14 = vadd.f32 %v11112_v2, %v5223_v50  ;;  %v5546_v2 = vadd.f32 %v11120_v17, %v5224_v6  ;;  %v6256_v12 = vadd.f32 %v8271_v15, %v5790_v43  ;;  %v5228_v15 = vadd.f32 %v11144_v13, %v4762_v30  ;;  %v11475_v6 = vld [vmem:[#allocation10_spill] sm:$0xff]  ;;  %v11476_v43 = vld [vmem:[#allocation11_spill] sm:$0xff] }
 0x2f6   :  { %v11184_v37 = vpop.f32.mrf.mxu1  ;;  %v4767_v17 = vadd.f32 %v11074_v18, %v11106_v49  ;;  %v5552_v13 = vadd.f32 %v11134_v51, %v5230_v54  ;;  %v4766_v60 = vadd.f32 %v11476_v43, %v11475_v6  ;;  %v11493_v6 = vld [vmem:[#allocation26_spill] sm:$0xff] }
 0x2f7   :  { %11474 = vst [vmem:[#allocation31_spill] sm:$0xff] %v11184_v37  ;;  %v11212_v0 = vpop.f32.mrf.mxu0  ;;  %v5788_v19 = vadd.f32 %v5725_v20, %v5545_v14  ;;  %v5551_v20 = vadd.f32 %v11124_v44, %v5229_v48  ;;  %v5789_v27 = vadd.f32 %v5728_v35, %v5546_v2  ;;  %v4765_v35 = vadd.f32 %v11078_v31, %v11110_v24  ;;  %v11481_v2 = vld [vmem:[#allocation7_spill] sm:$0xff] }
 0x2f8   :  { %v11190_v57 = vpop.f32.mrf.mxu1  ;;  %v5233_v3 = vadd.f32 %v11148_v29, %v4767_v17  ;;  %v5550_v29 = vadd.f32 %v11136_v11, %v5228_v15  ;;  %v11477_v11 = vld [vmem:[#allocation13_spill] sm:$0xff] }
 0x2f9   :  { %v11225_v34 = vpop.f32.mrf.mxu0  ;;  %v6254_v63 = vadd.f32 %v6191_v45, %v5788_v19  ;;  %v5794_v41 = vadd.f32 %v8243_v7, %v5551_v20  ;;  %v5792_v45 = vadd.f32 %v5741_v38, %v5549_v46  ;;  %v6255_v7 = vadd.f32 %v11174_v5, %v5789_v27  ;;  %v11483_v20 = vld [vmem:[#allocation14_spill] sm:$0xff]  ;;  %v11484_v17 = vld [vmem:[#allocation21_spill] sm:$0xff] }
 0x2fa   :  { %v11194_v22 = vpop.f32.mrf.mxu1  ;;  %v5231_v59 = vadd.f32 %v11152_v58, %v4765_v35  ;;  %v5795_v38 = vadd.f32 %v11176_v33, %v5552_v13  ;;  %v5234_v58 = vadd.f32 %v11156_v39, %v4768_v40  ;;  %v5555_v14 = vadd.f32 %v11477_v11, %v5233_v3  ;;  %v11478_v33 = vld [vmem:[#allocation29_spill] sm:$0xff]  ;;  %v11479_v39 = vld [vmem:[#allocation19_spill] sm:$0xff]  ;;  %v11485_v46 = vld [vmem:[#allocation22_spill] sm:$0xff] }
 0x2fb   :  { %v11241_v50 = vpop.f32.mrf.mxu0  ;;  %v6260_v24 = vadd.f32 %v11180_v26, %v5794_v41  ;;  %v6258_v26 = vadd.f32 %v11188_v4, %v5792_v45  ;;  %v5793_v53 = vadd.f32 %v11478_v33, %v5550_v29  ;;  %v5232_v23 = vadd.f32 %v11479_v39, %v4766_v60  ;;  %v11488_v35 = vld [vmem:[#allocation15_spill] sm:$0xff]  ;;  %v11491_v40 = vld [vmem:[#allocation9_spill] sm:$0xff]  ;;  %v11494_v60 = vld [vmem:[#allocation4_spill] sm:$0xff] }
 0x2fc   :  { %v11200_v37 = vpop.f32.mrf.mxu1  ;;  %v11482_v54 = vld [vmem:[#allocation28_spill] sm:$0xff]  ;;  %v6261_v15 = vadd.f32 %v11198_v52, %v5795_v38  ;;  %v5556_v45 = vadd.f32 %v11488_v35, %v5234_v58  ;;  %v11495_v11 = vld [vmem:[#allocation3_spill] sm:$0xff] }
 0x2fd   :  { %v8280_v25 = vpop.f32.mrf.mxu0  ;;  %v5798_v30 = vadd.f32 %v11482_v54, %v5555_v14  ;;  %v6259_v52 = vadd.f32 %v11212_v0, %v5793_v53  ;;  %v4770_v14 = vadd.f32 %v11495_v11, %v11494_v60  ;;  %v11497_v39 = vld [vmem:[#allocation27_spill] sm:$0xff] }
 0x2fe   :  { %v11207_v55 = vpop.f32.mrf.mxu1 }
 0x300   :  { %v11214_v36 = vpop.f32.mrf.mxu1 }
 0x302   :  { %v11219_v21 = vpop.f32.mrf.mxu1 }
 0x304   :  { %v8303_v32 = vpop.f32.mrf.mxu1 }
 0x305   :  { %v6578_v8 = vadd.f32 %v8303_v32, %v6256_v12  ;;  %v4771_v12 = vadd.f32 %v11481_v2, %v11480_v47  ;;  %v5553_v32 = vadd.f32 %v11483_v20, %v5231_v59  ;;  %v11490_v59 = vld [vmem:[#allocation23_spill] sm:$0xff]  ;;  %v11498_v2 = vld [vmem:[#allocation18_spill] sm:$0xff] }
 0x306   :  { %v6513_v1 = vpop.f32.mrf.mxu1  ;;  %v4772_v29 = vadd.f32 %v11491_v40, %v11490_v59 }
 0x307   :  { %v6601_v44 = vadd.f32 %v11231_v62, %v6578_v8  ;;  %v6576_v9 = vadd.f32 %v6513_v1, %v6254_v63  ;;  %v5237_v41 = vadd.f32 %v11484_v17, %v4771_v12  ;;  %v11486_v1 = vld [vmem:[#allocation8_spill] sm:$0xff] }
 0x308   :  { %v8304_v56 = vpop.f32.mrf.mxu1  ;;  %v5238_v43 = vadd.f32 %v11493_v6, %v4772_v29 }
 0x309   :  { %v6617_v18 = vmax.f32 %v6601_v44, 0.0  ;;  %v6599_v49 = vadd.f32 %v11231_v62, %v6576_v9  ;;  %v6579_v16 = vadd.f32 %v8304_v56, %v6257_v61  ;;  %v4769_v44 = vadd.f32 %v11486_v1, %v11485_v46  ;;  %v6226_v9 = vpop.f32.mrf.mxu0  ;;  %v11487_v61 = vld [vmem:[#allocation31_spill] sm:$0xff]  ;;  %v11500_v46 = vld [vmem:[#allocation25_spill] sm:$0xff] }
 0x30a   :  { %v6516_v31 = vpop.f32.mrf.mxu1  ;;  %v5796_v3 = vadd.f32 %v11487_v61, %v5553_v32 }
 0x30b   :  { %6633 = vst [vmem:[%s11357_s5 + $0x10] sm:$0xff] %v6617_v18  ;;  %v6615_v51 = vmax.f32 %v6599_v49, 0.0  ;;  %v6602_v10 = vadd.f32 %v11231_v62, %v6579_v16  ;;  %v6577_v5 = vadd.f32 %v6516_v31, %v6255_v7  ;;  %v11489_v16 = vld [vmem:[#allocation24_spill] sm:$0xff] }
 0x30c   :  { %v8307_v48 = vpop.f32.mrf.mxu1  ;;  %v5235_v7 = vadd.f32 %v11489_v16, %v4769_v44  ;;  %v11492_v31 = vld [vmem:[#allocation16_spill] sm:$0xff] }
 0x30d   :  { %6631 = vst [vmem:[%s11357_s5] sm:$0xff] %v6615_v51  ;;  %v6618_v19 = vmax.f32 %v6602_v10, 0.0  ;;  %v6600_v42 = vadd.f32 %v11231_v62, %v6577_v5  ;;  %v6582_v28 = vadd.f32 %v8307_v48, %v6260_v24  ;;  %v5554_v24 = vadd.f32 %v11492_v31, %v5232_v23  ;;  %v8283_v48 = vpop.f32.mrf.mxu0 }
 0x30e   :  { %v6529_v4 = vpop.f32.mrf.mxu1  ;;  %v6264_v51 = vadd.f32 %v11225_v34, %v5798_v30  ;;  %v5799_v10 = vadd.f32 %v11190_v57, %v5556_v45  ;;  %v6262_v34 = vadd.f32 %v11241_v50, %v5796_v3  ;;  %v5236_v23 = vadd.f32 %v11497_v39, %v4770_v14 }
 0x30f   :  { %6634 = vst [vmem:[%s11357_s5 + $0x18] sm:$0xff] %v6618_v19  ;;  %v6616_v27 = vmax.f32 %v6600_v42, 0.0  ;;  %v6605_v8 = vadd.f32 %v11231_v62, %v6582_v28  ;;  %v6580_v63 = vadd.f32 %v6529_v4, %v6258_v26  ;;  %v11496_v26 = vld [vmem:[#allocation17_spill] sm:$0xff]  ;;  %v5797_v57 = vadd.f32 %v11194_v22, %v5554_v24  ;;  %v6239_v32 = vpop.f32.mrf.mxu0 }
 0x310   :  { %v8308_v13 = vpop.f32.mrf.mxu1  ;;  %v5559_v33 = vadd.f32 %v11496_v26, %v5237_v41  ;;  %v5557_v12 = vadd.f32 %v11498_v2, %v5235_v7  ;;  %v6265_v20 = vadd.f32 %v8280_v25, %v5799_v10  ;;  %v5558_v1 = vadd.f32 %v11500_v46, %v5236_v23 }
 0x311   :  { %6632 = vst [vmem:[%s11357_s5 + $0x8] sm:$0xff] %v6616_v27  ;;  %v6621_v56 = vmax.f32 %v6605_v8, 0.0  ;;  %v6603_v18 = vadd.f32 %v11231_v62, %v6580_v63  ;;  %v6583_v49 = vadd.f32 %v8308_v13, %v6261_v15  ;;  %v11499_v27 = vld [vmem:[#allocation20_spill] sm:$0xff]  ;;  %v6263_v41 = vadd.f32 %v6226_v9, %v5797_v57  ;;  %v8284_v45 = vpop.f32.mrf.mxu0 }
 0x312   :  { %v6532_v38 = vpop.f32.mrf.mxu1  ;;  %v5802_v47 = vadd.f32 %v11200_v37, %v5559_v33  ;;  %v5800_v4 = vadd.f32 %v11207_v55, %v5557_v12  ;;  %v5560_v8 = vadd.f32 %v11499_v27, %v5238_v43 }
 0x313   :  { %6637 = vst [vmem:[%s11357_s5 + $0x30] sm:$0xff] %v6621_v56  ;;  %v6619_v5 = vmax.f32 %v6603_v18, 0.0  ;;  %v6606_v58 = vadd.f32 %v11231_v62, %v6583_v49  ;;  %v6581_v0 = vadd.f32 %v6532_v38, %v6259_v52  ;;  %v5801_v18 = vadd.f32 %v11219_v21, %v5558_v1  ;;  %v6242_v29 = vpop.f32.mrf.mxu0 }
 0x314   :  { %v8311_v53 = vpop.f32.mrf.mxu1  ;;  %v6268_v61 = vadd.f32 %v8283_v48, %v5802_v47  ;;  %v5803_v25 = vadd.f32 %v11214_v36, %v5560_v8  ;;  %v6266_v56 = vadd.f32 %v6239_v32, %v5800_v4 }
 0x315   :  { %6635 = vst [vmem:[%s11357_s5 + $0x20] sm:$0xff] %v6619_v5  ;;  %v6622_v19 = vmax.f32 %v6606_v58, 0.0  ;;  %v6604_v42 = vadd.f32 %v11231_v62, %v6581_v0  ;;  %v6586_v28 = vadd.f32 %v8311_v53, %v6264_v51  ;;  %v6267_v51 = vadd.f32 %v6242_v29, %v5801_v18 }
 0x316   :  { %v6545_v54 = vpop.f32.mrf.mxu1  ;;  %v6269_v40 = vadd.f32 %v8284_v45, %v5803_v25 }
 0x317   :  { %6638 = vst [vmem:[%s11357_s5 + $0x38] sm:$0xff] %v6622_v19  ;;  %v6620_v22 = vmax.f32 %v6604_v42, 0.0  ;;  %v6609_v50 = vadd.f32 %v11231_v62, %v6586_v28  ;;  %v6584_v30 = vadd.f32 %v6545_v54, %v6262_v34 }
 0x318   :  { %v8312_v63 = vpop.f32.mrf.mxu1 }
 0x319   :  { %6636 = vst [vmem:[%s11357_s5 + $0x28] sm:$0xff] %v6620_v22  ;;  %v6625_v37 = vmax.f32 %v6609_v50, 0.0  ;;  %v6607_v15 = vadd.f32 %v11231_v62, %v6584_v30  ;;  %v6587_v17 = vadd.f32 %v8312_v63, %v6265_v20 }
 0x31a   :  { %v6548_v44 = vpop.f32.mrf.mxu1 }
 0x31b   :  { %6641 = vst [vmem:[%s11357_s5 + $0x50] sm:$0xff] %v6625_v37  ;;  %v6623_v55 = vmax.f32 %v6607_v15, 0.0  ;;  %v6610_v3 = vadd.f32 %v11231_v62, %v6587_v17  ;;  %v6585_v35 = vadd.f32 %v6548_v44, %v6263_v41 }
 0x31c   :  { %v8315_v13 = vpop.f32.mrf.mxu1 }
 0x31d   :  { %6639 = vst [vmem:[%s11357_s5 + $0x40] sm:$0xff] %v6623_v55  ;;  %v6626_v9 = vmax.f32 %v6610_v3, 0.0  ;;  %v6608_v36 = vadd.f32 %v11231_v62, %v6585_v35  ;;  %v6590_v49 = vadd.f32 %v8315_v13, %v6268_v61 }
 0x31e   :  { %v6561_v52 = vpop.f32.mrf.mxu1 }
 0x31f   :  { %6642 = vst [vmem:[%s11357_s5 + $0x58] sm:$0xff] %v6626_v9  ;;  %v6624_v16 = vmax.f32 %v6608_v36, 0.0  ;;  %v6613_v7 = vadd.f32 %v11231_v62, %v6590_v49  ;;  %v6588_v59 = vadd.f32 %v6561_v52, %v6266_v56 }
 0x320   :  { %v8316_v21 = vpop.f32.mrf.mxu1 }
 0x321   :  { %6640 = vst [vmem:[%s11357_s5 + $0x48] sm:$0xff] %v6624_v16  ;;  %v6629_v31 = vmax.f32 %v6613_v7, 0.0  ;;  %v6611_v24 = vadd.f32 %v11231_v62, %v6588_v59  ;;  %v6591_v38 = vadd.f32 %v8316_v21, %v6269_v40 }
 0x322   :  { %v6564_v10 = vpop.f32.mrf.mxu1 }
 0x323   :  { %6645 = vst [vmem:[%s11357_s5 + $0x70] sm:$0xff] %v6629_v31  ;;  %v6627_v5 = vmax.f32 %v6611_v24, 0.0  ;;  %v6614_v58 = vadd.f32 %v11231_v62, %v6591_v38  ;;  %v6589_v0 = vadd.f32 %v6564_v10, %v6267_v51 }
 0x325   :  { %6643 = vst [vmem:[%s11357_s5 + $0x60] sm:$0xff] %v6627_v5  ;;  %v6630_v6 = vmax.f32 %v6614_v58, 0.0  ;;  %v6612_v43 = vadd.f32 %v11231_v62, %v6589_v0 }
 0x327   :  { %6646 = vst [vmem:[%s11357_s5 + $0x78] sm:$0xff] %v6630_v6  ;;  %v6628_v60 = vmax.f32 %v6612_v43, 0.0 }
 0x329   :  { %6644 = vst [vmem:[%s11357_s5 + $0x68] sm:$0xff] %v6628_v60 }

</bundles_post_ra>
